<compile_context>
chip_gen: v6e
topology: v6e:2x2x1
jax: 0.10.0
libtpu: 0.0.40
codegen_flags: <defaults>
</compile_context>

<pallas_src>
import jax
import jax.numpy as jnp
from jax.experimental import pallas as pl
from jax.experimental.pallas import tpu as pltpu

EPS = 1e-5


# ------------------------------ fused kernel --------------------------------

def _make_bottleneck_kernel(planes, out_c, fd, h, w, use_final_relu):
    hw = h * w
    m = fd * hw

    def kernel(x_ref, w1_ref, w2_ref, w3_ref,
               s1_ref, b1_ref, s2_ref, b2_ref, s3_ref, b3_ref,
               o_ref, pad_ref, patch_ref):
        # x_ref: (Cin, M) in native NCDHW order (M = fd*H*W frames block).
        # Flip once to channels-last (M, Cin); reused for conv1 and residual.
        x_cl = x_ref[...].astype(jnp.float32).T                      # (M, Cin) f32

        # ---- conv1 (1x1x1) + bn1 + relu ------------------------------------
        y1 = jnp.dot(x_cl.astype(jnp.bfloat16), w1_ref[...],
                     preferred_element_type=jnp.float32)             # (M, planes)
        y1 = jnp.maximum(y1 * s1_ref[...] + b1_ref[...], 0.0)

        # ---- halo lives only in VMEM: zero-padded frame buffer --------------
        pad_ref[...] = jnp.zeros_like(pad_ref)
        pad_ref[:, 1:h + 1, 1:w + 1, :] = y1.reshape(fd, h, w, planes)

        # ---- im2col in VMEM: fold the 9 taps into K = 9*planes --------------
        for kh in range(3):
            for kw in range(3):
                t = kh * 3 + kw
                patch_ref[:, t * planes:(t + 1) * planes] = (
                    pad_ref[:, kh:kh + h, kw:kw + w, :]
                    .reshape(m, planes).astype(patch_ref.dtype))

        # ---- conv2 ((1,3,3), pad (0,1,1)) + bn2 + relu: one big-K matmul ----
        y2 = jnp.dot(patch_ref[...], w2_ref[...],
                     preferred_element_type=jnp.float32)             # (M, planes)
        y2 = jnp.maximum(y2 * s2_ref[...] + b2_ref[...], 0.0)

        # ---- conv3 (1x1x1) + bn3 + residual (+ final relu) ------------------
        out = jnp.dot(y2.astype(jnp.bfloat16), w3_ref[...],
                      preferred_element_type=jnp.float32)            # (M, out_c)
        out = out * s3_ref[...] + b3_ref[...] + x_cl
        if use_final_relu:
            out = jnp.maximum(out, 0.0)
        # Lane-dense store: block last dim is M (multiple of 128 / full extent).
        o_ref[...] = out.T.astype(o_ref.dtype)                       # (out_c, M)

    return kernel


# ------------------------------ param prep ----------------------------------

def _fold_bn(gamma, beta, mean, var):
    s = (gamma / jnp.sqrt(var + EPS)).astype(jnp.float32)
    b = (beta - mean * s).astype(jnp.float32)
    return s.reshape(1, -1), b.reshape(1, -1)


def _prep_params(params):
    planes = params["conv1_w"].shape[0]
    # conv1: (planes, inplanes, 1,1,1) -> (inplanes, planes)
    w1 = params["conv1_w"][:, :, 0, 0, 0].T.astype(jnp.bfloat16)
    # conv2: (planes, planes, 1, 3, 3) -> (kh, kw, ci, co) -> (9*planes, planes)
    w2 = (jnp.transpose(params["conv2_w"][:, :, 0, :, :], (2, 3, 1, 0))
          .reshape(9 * planes, planes).astype(jnp.bfloat16))
    # conv3: (4*planes, planes, 1,1,1) -> (planes, 4*planes)
    w3 = params["conv3_w"][:, :, 0, 0, 0].T.astype(jnp.bfloat16)
    s1, b1 = _fold_bn(params["bn1_gamma"], params["bn1_beta"],
                      params["bn1_mean"], params["bn1_var"])
    s2, b2 = _fold_bn(params["bn2_gamma"], params["bn2_beta"],
                      params["bn2_mean"], params["bn2_var"])
    s3, b3 = _fold_bn(params["bn3_gamma"], params["bn3_beta"],
                      params["bn3_mean"], params["bn3_var"])
    return w1, w2, w3, s1, b1, s2, b2, s3, b3


def _pick_fd(d, hw, fd_max):
    """Largest divisor of D (<= fd_max) whose block is lane-aligned; else full D."""
    for cand in range(min(fd_max, d), 0, -1):
        if d % cand == 0 and (cand * hw) % 128 == 0:
            return cand
    return d   # full-extent block along D*H*W always satisfies the tiling rule


# ------------------------------ entry point ----------------------------------

def bottleneck2d(x_ncdhw, params, *, use_final_relu=True, fd_max=4):
    """Forward pass of Bottleneck2d (stride=1, downsample=None, BN applied).
    Input/output in PyTorch NCDHW layout."""
    n, c, d, h, w = x_ncdhw.shape
    planes = params["conv1_w"].shape[0]
    out_c = params["conv3_w"].shape[0]               # planes * expansion
    assert out_c == c, "downsample=None requires inplanes == planes * 4"

    hw = h * w
    fd = _pick_fd(d, hw, fd_max)
    m = fd * hw
    grid = (n, d // fd)

    w1, w2, w3, s1, b1, s2, b2, s3, b3 = _prep_params(params)

    # Free reshape: merge the trailing spatial dims so blocks are lane-dense.
    xr = x_ncdhw.reshape(n, c, d * hw)

    kernel = _make_bottleneck_kernel(planes, out_c, fd, h, w, use_final_relu)

    bpe = jnp.dtype(x_ncdhw.dtype).itemsize
    w_bytes = (c * planes + 9 * planes * planes + planes * out_c) * 2 \
        + (4 * planes + 2 * out_c) * 4
    flops = 2 * n * d * hw * (c * planes + 9 * planes * planes + planes * out_c)
    bytes_accessed = n * c * d * hw * bpe + n * out_c * d * hw * bpe \
        + grid[0] * grid[1] * w_bytes

    # Rough per-step VMEM need: double-buffered in/out blocks + scratch + values.
    vmem_est = (2 * c * m * bpe + 2 * out_c * m * bpe
                + fd * (h + 2) * (w + 2) * planes * 4
                + m * 9 * planes * 2
                + 2 * w_bytes
                + 4 * m * max(planes, out_c) * 4)
    cp_kwargs = dict(dimension_semantics=("parallel", "parallel"))
    if vmem_est > 24 << 20:
        cp_kwargs["vmem_limit_bytes"] = int(min(vmem_est * 3 // 2, 64 << 20))

    out = pl.pallas_call(
        kernel,
        out_shape=jax.ShapeDtypeStruct((n, out_c, d * hw), x_ncdhw.dtype),
        grid_spec=pltpu.PrefetchScalarGridSpec(
            num_scalar_prefetch=0,
            grid=grid,
            in_specs=[
                pl.BlockSpec((None, c, m), lambda i, j: (i, 0, j)),
                pl.BlockSpec((c, planes), lambda i, j: (0, 0)),
                pl.BlockSpec((9 * planes, planes), lambda i, j: (0, 0)),
                pl.BlockSpec((planes, out_c), lambda i, j: (0, 0)),
                pl.BlockSpec((1, planes), lambda i, j: (0, 0)),
                pl.BlockSpec((1, planes), lambda i, j: (0, 0)),
                pl.BlockSpec((1, planes), lambda i, j: (0, 0)),
                pl.BlockSpec((1, planes), lambda i, j: (0, 0)),
                pl.BlockSpec((1, out_c), lambda i, j: (0, 0)),
                pl.BlockSpec((1, out_c), lambda i, j: (0, 0)),
            ],
            out_specs=pl.BlockSpec((None, out_c, m), lambda i, j: (i, 0, j)),
            scratch_shapes=[
                pltpu.VMEM((fd, h + 2, w + 2, planes), jnp.float32),   # padded y1
                pltpu.VMEM((m, 9 * planes), jnp.bfloat16),             # im2col patch
            ],
        ),
        compiler_params=pltpu.CompilerParams(**cp_kwargs),
        cost_estimate=pl.CostEstimate(flops=int(flops), transcendentals=0,
                                      bytes_accessed=int(bytes_accessed)),
    )(xr, w1, w2, w3, s1, b1, s2, b2, s3, b3)

    return out.reshape(n, out_c, d, h, w)


# -------------------------------- reference ----------------------------------

def _reference(x_ncdhw, params, use_final_relu=True):
    def conv(x, w, padding):
        return jax.lax.conv_general_dilated(
            x, w, window_strides=(1, 1, 1), padding=padding,
            dimension_numbers=("NCDHW", "OIDHW", "NCDHW"))

    def bn(x, g, b, m, v):
        shp = (1, -1, 1, 1, 1)
        return (x - m.reshape(shp)) / jnp.sqrt(v.reshape(shp) + EPS) \
            * g.reshape(shp) + b.reshape(shp)

    out = conv(x_ncdhw, params["conv1_w"], ((0, 0), (0, 0), (0, 0)))
    out = jnp.maximum(bn(out, params["bn1_gamma"], params["bn1_beta"],
                         params["bn1_mean"], params["bn1_var"]), 0.0)
    out = conv(out, params["conv2_w"], ((0, 0), (1, 1), (1, 1)))
    out = jnp.maximum(bn(out, params["bn2_gamma"], params["bn2_beta"],
                         params["bn2_mean"], params["bn2_var"]), 0.0)
    out = conv(out, params["conv3_w"], ((0, 0), (0, 0), (0, 0)))
    out = bn(out, params["bn3_gamma"], params["bn3_beta"],
             params["bn3_mean"], params["bn3_var"])
    out = out + x_ncdhw
    if use_final_relu:
        out = jnp.maximum(out, 0.0)
    return out


# ----------------------------------- main -------------------------------------

if __name__ == "__main__":
    # Small shapes: batch=2, inplanes=16, planes=4 (expansion 4 -> out=16 so the
    # downsample=None residual matches), D=4, H=W=8, stride=1.
    N, inplanes, planes = 2, 16, 4
    D, H, W = 4, 8, 8
    out_c = planes * 4

    key = jax.random.PRNGKey(0)
    ks = jax.random.split(key, 16)

    params = {
        "conv1_w": 0.1 * jax.random.normal(ks[0], (planes, inplanes, 1, 1, 1), jnp.float32),
        "conv2_w": 0.1 * jax.random.normal(ks[1], (planes, planes, 1, 3, 3), jnp.float32),
        "conv3_w": 0.1 * jax.random.normal(ks[2], (out_c, planes, 1, 1, 1), jnp.float32),
        "bn1_gamma": jax.random.uniform(ks[3], (planes,), jnp.float32, 0.5, 1.5),
        "bn1_beta": 0.1 * jax.random.normal(ks[4], (planes,), jnp.float32),
        "bn1_mean": 0.1 * jax.random.normal(ks[5], (planes,), jnp.float32),
        "bn1_var": jax.random.uniform(ks[6], (planes,), jnp.float32, 0.5, 1.5),
        "bn2_gamma": jax.random.uniform(ks[7], (planes,), jnp.float32, 0.5, 1.5),
        "bn2_beta": 0.1 * jax.random.normal(ks[8], (planes,), jnp.float32),
        "bn2_mean": 0.1 * jax.random.normal(ks[9], (planes,), jnp.float32),
        "bn2_var": jax.random.uniform(ks[10], (planes,), jnp.float32, 0.5, 1.5),
        "bn3_gamma": jax.random.uniform(ks[11], (out_c,), jnp.float32, 0.5, 1.5),
        "bn3_beta": 0.1 * jax.random.normal(ks[12], (out_c,), jnp.float32),
        "bn3_mean": 0.1 * jax.random.normal(ks[13], (out_c,), jnp.float32),
        "bn3_var": jax.random.uniform(ks[14], (out_c,), jnp.float32, 0.5, 1.5),
    }

    x = jax.random.normal(ks[15], (N, inplanes, D, H, W), jnp.float32)

    fwd = jax.jit(lambda xx, pp: bottleneck2d(xx, pp))
    out = jax.block_until_ready(fwd(x, params))
    ref = jax.block_until_ready(_reference(x, params))

    assert out.shape == (N, out_c, D, H, W), out.shape
    max_err = float(jnp.max(jnp.abs(out.astype(jnp.float32) - ref)))
    # bf16 matmul path vs f32 reference -> a few 1e-3 absolute error expected.
    assert jnp.allclose(out.astype(jnp.float32), ref, atol=2e-2, rtol=2e-2), \
        f"max abs err {max_err}"

    print("KERNEL_OK")
</pallas_src>

<mosaic_0001>
module attributes {stable_mosaic.version = 11 : i64} {
  func.func @kernel(%arg0: i32, %arg1: i32, %arg2: memref<1x16x256xf32, #tpu.memory_space<vmem>>, %arg3: memref<16x4xbf16, #tpu.memory_space<vmem>>, %arg4: memref<36x4xbf16, #tpu.memory_space<vmem>>, %arg5: memref<4x16xbf16, #tpu.memory_space<vmem>>, %arg6: memref<1x4xf32, #tpu.memory_space<vmem>>, %arg7: memref<1x4xf32, #tpu.memory_space<vmem>>, %arg8: memref<1x4xf32, #tpu.memory_space<vmem>>, %arg9: memref<1x4xf32, #tpu.memory_space<vmem>>, %arg10: memref<1x16xf32, #tpu.memory_space<vmem>>, %arg11: memref<1x16xf32, #tpu.memory_space<vmem>>, %arg12: memref<1x16x256xf32, #tpu.memory_space<vmem>>, %arg13: memref<4x10x10x4xf32, #tpu.memory_space<vmem>>, %arg14: memref<256x36xbf16, #tpu.memory_space<vmem>>) attributes {dimension_semantics = [#tpu.dimension_semantics<parallel>, #tpu.dimension_semantics<parallel>], iteration_bounds = array<i64: 2, 1>, scalar_prefetch = 0 : i64, scratch_operands = 2 : i64, tpu.core_type = #tpu.core_type<tc>, window_params = [{transform_indices = @transform_0, window_bounds = array<i64: 1, 16, 256>}, {pipeline_mode = #tpu.pipeline_mode<synchronous>, transform_indices = @transform_1, window_bounds = array<i64: 16, 4>}, {pipeline_mode = #tpu.pipeline_mode<synchronous>, transform_indices = @transform_2, window_bounds = array<i64: 36, 4>}, {pipeline_mode = #tpu.pipeline_mode<synchronous>, transform_indices = @transform_3, window_bounds = array<i64: 4, 16>}, {pipeline_mode = #tpu.pipeline_mode<synchronous>, transform_indices = @transform_4, window_bounds = array<i64: 1, 4>}, {pipeline_mode = #tpu.pipeline_mode<synchronous>, transform_indices = @transform_5, window_bounds = array<i64: 1, 4>}, {pipeline_mode = #tpu.pipeline_mode<synchronous>, transform_indices = @transform_6, window_bounds = array<i64: 1, 4>}, {pipeline_mode = #tpu.pipeline_mode<synchronous>, transform_indices = @transform_7, window_bounds = array<i64: 1, 4>}, {pipeline_mode = #tpu.pipeline_mode<synchronous>, transform_indices = @transform_8, window_bounds = array<i64: 1, 16>}, {pipeline_mode = #tpu.pipeline_mode<synchronous>, transform_indices = @transform_9, window_bounds = array<i64: 1, 16>}, {transform_indices = @transform_10, window_bounds = array<i64: 1, 16, 256>}]} {
    %c0 = arith.constant 0 : index
    %c0_0 = arith.constant 0 : index
    %c0_1 = arith.constant 0 : index
    %0 = vector.load %arg2[%c0, %c0_0, %c0_1] : memref<1x16x256xf32, #tpu.memory_space<vmem>>, vector<1x16x256xf32>
    %1 = vector.shape_cast %0 : vector<1x16x256xf32> to vector<16x256xf32>
    %2 = tpu.transpose %1, [1, 0] : vector<16x256xf32> -> vector<256x16xf32>
    %3 = arith.truncf %2 : vector<256x16xf32> to vector<256x16xbf16>
    %c0_2 = arith.constant 0 : index
    %c0_3 = arith.constant 0 : index
    %4 = vector.load %arg3[%c0_2, %c0_3] : memref<16x4xbf16, #tpu.memory_space<vmem>>, vector<16x4xbf16>
    %cst = arith.constant dense<0.000000e+00> : vector<256x4xf32>
    %5 = tpu.matmul %3, %4, %cst {dimension_numbers = #tpu.dot_dimension_numbers<[1], [0], [0], [1], [0, 0, 1, 1], [], []>} : vector<256x16xbf16>, vector<16x4xbf16>, vector<256x4xf32> -> vector<256x4xf32>
    %c0_4 = arith.constant 0 : index
    %c0_5 = arith.constant 0 : index
    %6 = vector.load %arg6[%c0_4, %c0_5] : memref<1x4xf32, #tpu.memory_space<vmem>>, vector<1x4xf32>
    %7 = vector.broadcast %6 : vector<1x4xf32> to vector<256x4xf32>
    %8 = arith.mulf %5, %7 : vector<256x4xf32>
    %c0_6 = arith.constant 0 : index
    %c0_7 = arith.constant 0 : index
    %9 = vector.load %arg7[%c0_6, %c0_7] : memref<1x4xf32, #tpu.memory_space<vmem>>, vector<1x4xf32>
    %10 = vector.broadcast %9 : vector<1x4xf32> to vector<256x4xf32>
    %11 = arith.addf %8, %10 : vector<256x4xf32>
    %cst_8 = arith.constant 0.000000e+00 : f32
    %12 = vector.broadcast %cst_8 : f32 to vector<256x4xf32>
    %13 = arith.maximumf %11, %12 : vector<256x4xf32>
    %cst_9 = arith.constant 0.000000e+00 : f32
    %14 = vector.broadcast %cst_9 : f32 to vector<4x10x10x4xf32>
    %c0_10 = arith.constant 0 : index
    %c0_11 = arith.constant 0 : index
    %c0_12 = arith.constant 0 : index
    %c0_13 = arith.constant 0 : index
    %15 = vector.load %arg13[%c0_10, %c0_11, %c0_12, %c0_13] : memref<4x10x10x4xf32, #tpu.memory_space<vmem>>, vector<4x10x10x4xf32>
    tpu.vector_store %arg13[%c0_10, %c0_11, %c0_12, %c0_13], %14 {strides = array<i32>} : memref<4x10x10x4xf32, #tpu.memory_space<vmem>>, vector<4x10x10x4xf32>,
    %16 = vector.shape_cast %13 : vector<256x4xf32> to vector<4x8x8x4xf32>
    %c0_14 = arith.constant 0 : index
    %c1 = arith.constant 1 : index
    %c1_15 = arith.constant 1 : index
    %c0_16 = arith.constant 0 : index
    %17 = vector.load %arg13[%c0_14, %c1, %c1_15, %c0_16] : memref<4x10x10x4xf32, #tpu.memory_space<vmem>>, vector<4x8x8x4xf32>
    tpu.vector_store %arg13[%c0_14, %c1, %c1_15, %c0_16], %16 {strides = array<i32>} : memref<4x10x10x4xf32, #tpu.memory_space<vmem>>, vector<4x8x8x4xf32>,
    %c0_17 = arith.constant 0 : index
    %c0_18 = arith.constant 0 : index
    %c0_19 = arith.constant 0 : index
    %c0_20 = arith.constant 0 : index
    %18 = vector.load %arg13[%c0_17, %c0_18, %c0_19, %c0_20] : memref<4x10x10x4xf32, #tpu.memory_space<vmem>>, vector<4x8x8x4xf32>
    %19 = vector.shape_cast %18 : vector<4x8x8x4xf32> to vector<256x4xf32>
    %20 = arith.truncf %19 : vector<256x4xf32> to vector<256x4xbf16>
    %c0_21 = arith.constant 0 : index
    %c0_22 = arith.constant 0 : index
    %21 = vector.load %arg14[%c0_21, %c0_22] : memref<256x36xbf16, #tpu.memory_space<vmem>>, vector<256x4xbf16>
    tpu.vector_store %arg14[%c0_21, %c0_22], %20 {strides = array<i32>} : memref<256x36xbf16, #tpu.memory_space<vmem>>, vector<256x4xbf16>,
    %c0_23 = arith.constant 0 : index
    %c0_24 = arith.constant 0 : index
    %c1_25 = arith.constant 1 : index
    %c0_26 = arith.constant 0 : index
    %22 = vector.load %arg13[%c0_23, %c0_24, %c1_25, %c0_26] : memref<4x10x10x4xf32, #tpu.memory_space<vmem>>, vector<4x8x8x4xf32>
    %23 = vector.shape_cast %22 : vector<4x8x8x4xf32> to vector<256x4xf32>
    %24 = arith.truncf %23 : vector<256x4xf32> to vector<256x4xbf16>
    %c0_27 = arith.constant 0 : index
    %c4 = arith.constant 4 : index
    %25 = vector.load %arg14[%c0_27, %c4] : memref<256x36xbf16, #tpu.memory_space<vmem>>, vector<256x4xbf16>
    tpu.vector_store %arg14[%c0_27, %c4], %24 {strides = array<i32>} : memref<256x36xbf16, #tpu.memory_space<vmem>>, vector<256x4xbf16>,
    %c0_28 = arith.constant 0 : index
    %c0_29 = arith.constant 0 : index
    %c2 = arith.constant 2 : index
    %c0_30 = arith.constant 0 : index
    %26 = vector.load %arg13[%c0_28, %c0_29, %c2, %c0_30] : memref<4x10x10x4xf32, #tpu.memory_space<vmem>>, vector<4x8x8x4xf32>
    %27 = vector.shape_cast %26 : vector<4x8x8x4xf32> to vector<256x4xf32>
    %28 = arith.truncf %27 : vector<256x4xf32> to vector<256x4xbf16>
    %c0_31 = arith.constant 0 : index
    %c8 = arith.constant 8 : index
    %29 = vector.load %arg14[%c0_31, %c8] : memref<256x36xbf16, #tpu.memory_space<vmem>>, vector<256x4xbf16>
    tpu.vector_store %arg14[%c0_31, %c8], %28 {strides = array<i32>} : memref<256x36xbf16, #tpu.memory_space<vmem>>, vector<256x4xbf16>,
    %c0_32 = arith.constant 0 : index
    %c1_33 = arith.constant 1 : index
    %c0_34 = arith.constant 0 : index
    %c0_35 = arith.constant 0 : index
    %30 = vector.load %arg13[%c0_32, %c1_33, %c0_34, %c0_35] : memref<4x10x10x4xf32, #tpu.memory_space<vmem>>, vector<4x8x8x4xf32>
    %31 = vector.shape_cast %30 : vector<4x8x8x4xf32> to vector<256x4xf32>
    %32 = arith.truncf %31 : vector<256x4xf32> to vector<256x4xbf16>
    %c0_36 = arith.constant 0 : index
    %c12 = arith.constant 12 : index
    %33 = vector.load %arg14[%c0_36, %c12] : memref<256x36xbf16, #tpu.memory_space<vmem>>, vector<256x4xbf16>
    tpu.vector_store %arg14[%c0_36, %c12], %32 {strides = array<i32>} : memref<256x36xbf16, #tpu.memory_space<vmem>>, vector<256x4xbf16>,
    %c0_37 = arith.constant 0 : index
    %c1_38 = arith.constant 1 : index
    %c1_39 = arith.constant 1 : index
    %c0_40 = arith.constant 0 : index
    %34 = vector.load %arg13[%c0_37, %c1_38, %c1_39, %c0_40] : memref<4x10x10x4xf32, #tpu.memory_space<vmem>>, vector<4x8x8x4xf32>
    %35 = vector.shape_cast %34 : vector<4x8x8x4xf32> to vector<256x4xf32>
    %36 = arith.truncf %35 : vector<256x4xf32> to vector<256x4xbf16>
    %c0_41 = arith.constant 0 : index
    %c16 = arith.constant 16 : index
    %37 = vector.load %arg14[%c0_41, %c16] : memref<256x36xbf16, #tpu.memory_space<vmem>>, vector<256x4xbf16>
    tpu.vector_store %arg14[%c0_41, %c16], %36 {strides = array<i32>} : memref<256x36xbf16, #tpu.memory_space<vmem>>, vector<256x4xbf16>,
    %c0_42 = arith.constant 0 : index
    %c1_43 = arith.constant 1 : index
    %c2_44 = arith.constant 2 : index
    %c0_45 = arith.constant 0 : index
    %38 = vector.load %arg13[%c0_42, %c1_43, %c2_44, %c0_45] : memref<4x10x10x4xf32, #tpu.memory_space<vmem>>, vector<4x8x8x4xf32>
    %39 = vector.shape_cast %38 : vector<4x8x8x4xf32> to vector<256x4xf32>
    %40 = arith.truncf %39 : vector<256x4xf32> to vector<256x4xbf16>
    %c0_46 = arith.constant 0 : index
    %c20 = arith.constant 20 : index
    %41 = vector.load %arg14[%c0_46, %c20] : memref<256x36xbf16, #tpu.memory_space<vmem>>, vector<256x4xbf16>
    tpu.vector_store %arg14[%c0_46, %c20], %40 {strides = array<i32>} : memref<256x36xbf16, #tpu.memory_space<vmem>>, vector<256x4xbf16>,
    %c0_47 = arith.constant 0 : index
    %c2_48 = arith.constant 2 : index
    %c0_49 = arith.constant 0 : index
    %c0_50 = arith.constant 0 : index
    %42 = vector.load %arg13[%c0_47, %c2_48, %c0_49, %c0_50] : memref<4x10x10x4xf32, #tpu.memory_space<vmem>>, vector<4x8x8x4xf32>
    %43 = vector.shape_cast %42 : vector<4x8x8x4xf32> to vector<256x4xf32>
    %44 = arith.truncf %43 : vector<256x4xf32> to vector<256x4xbf16>
    %c0_51 = arith.constant 0 : index
    %c24 = arith.constant 24 : index
    %45 = vector.load %arg14[%c0_51, %c24] : memref<256x36xbf16, #tpu.memory_space<vmem>>, vector<256x4xbf16>
    tpu.vector_store %arg14[%c0_51, %c24], %44 {strides = array<i32>} : memref<256x36xbf16, #tpu.memory_space<vmem>>, vector<256x4xbf16>,
    %c0_52 = arith.constant 0 : index
    %c2_53 = arith.constant 2 : index
    %c1_54 = arith.constant 1 : index
    %c0_55 = arith.constant 0 : index
    %46 = vector.load %arg13[%c0_52, %c2_53, %c1_54, %c0_55] : memref<4x10x10x4xf32, #tpu.memory_space<vmem>>, vector<4x8x8x4xf32>
    %47 = vector.shape_cast %46 : vector<4x8x8x4xf32> to vector<256x4xf32>
    %48 = arith.truncf %47 : vector<256x4xf32> to vector<256x4xbf16>
    %c0_56 = arith.constant 0 : index
    %c28 = arith.constant 28 : index
    %49 = vector.load %arg14[%c0_56, %c28] : memref<256x36xbf16, #tpu.memory_space<vmem>>, vector<256x4xbf16>
    tpu.vector_store %arg14[%c0_56, %c28], %48 {strides = array<i32>} : memref<256x36xbf16, #tpu.memory_space<vmem>>, vector<256x4xbf16>,
    %c0_57 = arith.constant 0 : index
    %c2_58 = arith.constant 2 : index
    %c2_59 = arith.constant 2 : index
    %c0_60 = arith.constant 0 : index
    %50 = vector.load %arg13[%c0_57, %c2_58, %c2_59, %c0_60] : memref<4x10x10x4xf32, #tpu.memory_space<vmem>>, vector<4x8x8x4xf32>
    %51 = vector.shape_cast %50 : vector<4x8x8x4xf32> to vector<256x4xf32>
    %52 = arith.truncf %51 : vector<256x4xf32> to vector<256x4xbf16>
    %c0_61 = arith.constant 0 : index
    %c32 = arith.constant 32 : index
    %53 = vector.load %arg14[%c0_61, %c32] : memref<256x36xbf16, #tpu.memory_space<vmem>>, vector<256x4xbf16>
    tpu.vector_store %arg14[%c0_61, %c32], %52 {strides = array<i32>} : memref<256x36xbf16, #tpu.memory_space<vmem>>, vector<256x4xbf16>,
    %c0_62 = arith.constant 0 : index
    %c0_63 = arith.constant 0 : index
    %54 = vector.load %arg14[%c0_62, %c0_63] : memref<256x36xbf16, #tpu.memory_space<vmem>>, vector<256x36xbf16>
    %c0_64 = arith.constant 0 : index
    %c0_65 = arith.constant 0 : index
    %55 = vector.load %arg4[%c0_64, %c0_65] : memref<36x4xbf16, #tpu.memory_space<vmem>>, vector<36x4xbf16>
    %cst_66 = arith.constant dense<0.000000e+00> : vector<256x4xf32>
    %56 = tpu.matmul %54, %55, %cst_66 {dimension_numbers = #tpu.dot_dimension_numbers<[1], [0], [0], [1], [0, 0, 1, 1], [], []>} : vector<256x36xbf16>, vector<36x4xbf16>, vector<256x4xf32> -> vector<256x4xf32>
    %c0_67 = arith.constant 0 : index
    %c0_68 = arith.constant 0 : index
    %57 = vector.load %arg8[%c0_67, %c0_68] : memref<1x4xf32, #tpu.memory_space<vmem>>, vector<1x4xf32>
    %58 = vector.broadcast %57 : vector<1x4xf32> to vector<256x4xf32>
    %59 = arith.mulf %56, %58 : vector<256x4xf32>
    %c0_69 = arith.constant 0 : index
    %c0_70 = arith.constant 0 : index
    %60 = vector.load %arg9[%c0_69, %c0_70] : memref<1x4xf32, #tpu.memory_space<vmem>>, vector<1x4xf32>
    %61 = vector.broadcast %60 : vector<1x4xf32> to vector<256x4xf32>
    %62 = arith.addf %59, %61 : vector<256x4xf32>
    %cst_71 = arith.constant 0.000000e+00 : f32
    %63 = vector.broadcast %cst_71 : f32 to vector<256x4xf32>
    %64 = arith.maximumf %62, %63 : vector<256x4xf32>
    %65 = arith.truncf %64 : vector<256x4xf32> to vector<256x4xbf16>
    %c0_72 = arith.constant 0 : index
    %c0_73 = arith.constant 0 : index
    %66 = vector.load %arg5[%c0_72, %c0_73] : memref<4x16xbf16, #tpu.memory_space<vmem>>, vector<4x16xbf16>
    %cst_74 = arith.constant dense<0.000000e+00> : vector<256x16xf32>
    %67 = tpu.matmul %65, %66, %cst_74 {dimension_numbers = #tpu.dot_dimension_numbers<[1], [0], [0], [1], [0, 0, 1, 1], [], []>} : vector<256x4xbf16>, vector<4x16xbf16>, vector<256x16xf32> -> vector<256x16xf32>
    %c0_75 = arith.constant 0 : index
    %c0_76 = arith.constant 0 : index
    %68 = vector.load %arg10[%c0_75, %c0_76] : memref<1x16xf32, #tpu.memory_space<vmem>>, vector<1x16xf32>
    %69 = vector.broadcast %68 : vector<1x16xf32> to vector<256x16xf32>
    %70 = arith.mulf %67, %69 : vector<256x16xf32>
    %c0_77 = arith.constant 0 : index
    %c0_78 = arith.constant 0 : index
    %71 = vector.load %arg11[%c0_77, %c0_78] : memref<1x16xf32, #tpu.memory_space<vmem>>, vector<1x16xf32>
    %72 = vector.broadcast %71 : vector<1x16xf32> to vector<256x16xf32>
    %73 = arith.addf %70, %72 : vector<256x16xf32>
    %74 = arith.addf %73, %2 : vector<256x16xf32>
    %cst_79 = arith.constant 0.000000e+00 : f32
    %75 = vector.broadcast %cst_79 : f32 to vector<256x16xf32>
    %76 = arith.maximumf %74, %75 : vector<256x16xf32>
    %77 = tpu.transpose %76, [1, 0] : vector<256x16xf32> -> vector<16x256xf32>
    %c0_80 = arith.constant 0 : index
    %c0_81 = arith.constant 0 : index
    %c0_82 = arith.constant 0 : index
    %78 = vector.load %arg12[%c0_80, %c0_81, %c0_82] : memref<1x16x256xf32, #tpu.memory_space<vmem>>, vector<1x16x256xf32>
    %79 = vector.shape_cast %78 : vector<1x16x256xf32> to vector<16x256xf32>
    %80 = vector.shape_cast %77 : vector<16x256xf32> to vector<1x16x256xf32>
    tpu.vector_store %arg12[%c0_80, %c0_81, %c0_82], %80 {strides = array<i32>} : memref<1x16x256xf32, #tpu.memory_space<vmem>>, vector<1x16x256xf32>,
    return
  }
  func.func @transform_0(%arg0: i32, %arg1: i32) -> (i32, i32, i32) {
    %c0_i32 = arith.constant 0 : i32
    %c0_i32_0 = arith.constant 0 : i32
    return %arg0, %c0_i32, %arg1 : i32, i32, i32
  }
  func.func @transform_1(%arg0: i32, %arg1: i32) -> (i32, i32) {
    %c0_i32 = arith.constant 0 : i32
    %c0_i32_0 = arith.constant 0 : i32
    %c0_i32_1 = arith.constant 0 : i32
    return %c0_i32, %c0_i32_0 : i32, i32
  }
  func.func @transform_2(%arg0: i32, %arg1: i32) -> (i32, i32) {
    %c0_i32 = arith.constant 0 : i32
    %c0_i32_0 = arith.constant 0 : i32
    %c0_i32_1 = arith.constant 0 : i32
    return %c0_i32, %c0_i32_0 : i32, i32
  }
  func.func @transform_3(%arg0: i32, %arg1: i32) -> (i32, i32) {
    %c0_i32 = arith.constant 0 : i32
    %c0_i32_0 = arith.constant 0 : i32
    %c0_i32_1 = arith.constant 0 : i32
    return %c0_i32, %c0_i32_0 : i32, i32
  }
  func.func @transform_4(%arg0: i32, %arg1: i32) -> (i32, i32) {
    %c0_i32 = arith.constant 0 : i32
    %c0_i32_0 = arith.constant 0 : i32
    %c0_i32_1 = arith.constant 0 : i32
    return %c0_i32, %c0_i32_0 : i32, i32
  }
  func.func @transform_5(%arg0: i32, %arg1: i32) -> (i32, i32) {
    %c0_i32 = arith.constant 0 : i32
    %c0_i32_0 = arith.constant 0 : i32
    %c0_i32_1 = arith.constant 0 : i32
    return %c0_i32, %c0_i32_0 : i32, i32
  }
  func.func @transform_6(%arg0: i32, %arg1: i32) -> (i32, i32) {
    %c0_i32 = arith.constant 0 : i32
    %c0_i32_0 = arith.constant 0 : i32
    %c0_i32_1 = arith.constant 0 : i32
    return %c0_i32, %c0_i32_0 : i32, i32
  }
  func.func @transform_7(%arg0: i32, %arg1: i32) -> (i32, i32) {
    %c0_i32 = arith.constant 0 : i32
    %c0_i32_0 = arith.constant 0 : i32
    %c0_i32_1 = arith.constant 0 : i32
    return %c0_i32, %c0_i32_0 : i32, i32
  }
  func.func @transform_8(%arg0: i32, %arg1: i32) -> (i32, i32) {
    %c0_i32 = arith.constant 0 : i32
    %c0_i32_0 = arith.constant 0 : i32
    %c0_i32_1 = arith.constant 0 : i32
    return %c0_i32, %c0_i32_0 : i32, i32
  }
  func.func @transform_9(%arg0: i32, %arg1: i32) -> (i32, i32) {
    %c0_i32 = arith.constant 0 : i32
    %c0_i32_0 = arith.constant 0 : i32
    %c0_i32_1 = arith.constant 0 : i32
    return %c0_i32, %c0_i32_0 : i32, i32
  }
  func.func @transform_10(%arg0: i32, %arg1: i32) -> (i32, i32, i32) {
    %c0_i32 = arith.constant 0 : i32
    %c0_i32_0 = arith.constant 0 : i32
    return %arg0, %c0_i32, %arg1 : i32, i32, i32
  }
}

</mosaic_0001>

<bundles_post_ra>
// kernel: _lambda_.1
= control target key start
LH: loop header
LB: loop body
LE: loop exit
PB: predicated region body
PF: predicated region fallthrough
CT: control target
= control target key end

     0   :  { %s5128_s13 = smov 0   ;;  %s5130_s14 = smov 0   ;;  %s6740_s0 = inlined_call_operand.vmem [shape: f32[2,16,256], index: 0, kind: input, shape index: {}]   ;;  %s6741_s1 = inlined_call_operand.vmem [shape: bf16[16,4], index: 1, kind: input, shape index: {}]   ;;  %s6742_s2 = inlined_call_operand.vmem [shape: bf16[36,4], index: 2, kind: input, shape index: {}]   ;;  %s6743_s3 = inlined_call_operand.vmem [shape: bf16[4,16], index: 3, kind: input, shape index: {}]   ;;  %s6744_s4 = inlined_call_operand.vmem [shape: f32[1,4], index: 4, kind: input, shape index: {}]   ;;  %s6745_s5 = inlined_call_operand.vmem [shape: f32[1,4], index: 5, kind: input, shape index: {}]   ;;  %s6746_s6 = inlined_call_operand.vmem [shape: f32[1,4], index: 6, kind: input, shape index: {}]   ;;  %s6747_s7 = inlined_call_operand.vmem [shape: f32[1,4], index: 7, kind: input, shape index: {}]   ;;  %s6748_s8 = inlined_call_operand.vmem [shape: f32[1,16], index: 8, kind: input, shape index: {}]   ;;  %s6749_s9 = inlined_call_operand.vmem [shape: f32[1,16], index: 9, kind: input, shape index: {}]   ;;  %s6750_s10 = inlined_call_operand.vmem [shape: f32[2,16,256], index: 10, kind: output, shape index: {}]  }
   0x1   :  { %s5132_s15 = smov 0  }
   0x2 LB: > { %s32_s16 = sadd.s32 1, %s5058_s14  ;;  %p4163_p0 = scmp.ge.s32.totalorder %s5062_s15, 1  ;;  %s5062_s15 = sphi %s5132_s15, %s20_s15   ;;  %s5058_s14 = sphi %s5130_s14, %s6797_s14   ;;  %s5054_s13 = sphi %s5128_s13, %s6796_s13  }
   0x3   : > { %p34_p1 = scmp.ge.s32.totalorder %s32_s16, 2  ;;  %p333_p2 = scmp.lt.s32.totalorder %s5062_s15, 3 }
   0x5   : > { %s6799_s16 = smov (%p34_p1, %s32_s16), 0  ;;  %p334_p3 = pnand %p4163_p0, %p333_p2 }
   0x7   : > { %337 = sbr.rel (%p334_p3) target bundleno = 1479 (0x5c7), region = 60 }
   0xc   : > { %p380_p4 = scmp.lt.s32.totalorder %s5054_s13, 1  ;;  %v5018_v4 = vld [vmem:[%s6741_s1] sm:$0xff]   ;;  %vm812_vm0 = vcmask 31744   ;;  %vm814_vm1 = vcmask 25600   ;;  %v5064_v5 = vmov 0.0   ;;  %s5065_s23 = smov 4  }
   0xd   : > { %4875 = vmatprep.subr.bf16.mxu0 %v5018_v4  ;;  %4981 = vmatprep.subr.bf16.mxu1 %v5018_v4  ;;  %813 = vst.msk [vmem:[#allocation2] sm:$0xff] %vm812_vm0, %v5064_v5  ;;  %816 = vst.msk [vmem:[#allocation2 + $0x10] sm:$0xff] %vm812_vm0, %v5064_v5  ;;  %s5066_s24 = smov 24   ;;  %s5067_s25 = smov 28   ;;  %vm492_vm2 = vcmask 130048   ;;  %vm1344_vm3 = vcmask 60448  }
   0xe   : > { %s6801_s13 = smov (!%p380_p4, %s5054_s13), 1  ;;  %4876 = vmatpush3.bf16.msra.mxu0 %v5018_v4  ;;  %4982 = vmatpush3.bf16.msra.mxu1 %v5018_v4  ;;  %815 = vst.msk [vmem:[#allocation2 + $0x8] sm:$0x3] %vm814_vm1, %v5064_v5  ;;  %817 = vst.msk [vmem:[#allocation2 + $0x18] sm:$0x3] %vm814_vm1, %v5064_v5  ;;  %s5068_s26 = smov 8  }
   0xf   : > { %s4532_s17 = sshll.u32 %s6801_s13, 5  ;;  %818 = vst.msk [vmem:[#allocation2 + $0x20] sm:$0xff] %vm812_vm0, %v5064_v5  ;;  %820 = vst.msk [vmem:[#allocation2 + $0x30] sm:$0xff] %vm812_vm0, %v5064_v5  ;;  %s5069_s27 = smov 32   ;;  %vm1087_vm4 = vcmask 27648   ;;  %vm1601_vm5 = vcmask 93248  }
  0x10   : > { %s387_s20 = scalar_lea.vmem %s6740_s0, %s4532_s17  ;;  %819 = vst.msk [vmem:[#allocation2 + $0x28] sm:$0x3] %vm814_vm1, %v5064_v5  ;;  %821 = vst.msk [vmem:[#allocation2 + $0x38] sm:$0x3] %vm814_vm1, %v5064_v5  ;;  %s5070_s12 = smov 12   ;;  %vm3358_vm6 = vcmask 1041408  }
  0x11   : > { %v400_v0 = vld [vmem:[%s387_s20] sm:$0xff]  ;;  %v401_v1 = vld [vmem:[%s387_s20 + $0x8] sm:$0xff]  ;;  %v402_v2 = vld [vmem:[%s387_s20 + $0x10] sm:$0xff]  ;;  %822 = vst.msk [vmem:[#allocation2 + $0x40] sm:$0xff] %vm812_vm0, %v5064_v5  ;;  %s5071_s18 = smov 16   ;;  %s5072_s19 = smov 20  }
  0x12   : > { %404 = vxpose.xlu0.b32.start [1/2] (short) %v400_v0, 128  ;;  %436 = vxpose.xlu1.b32.start [1/2] (short) %v401_v1, 128  ;;  %v403_v3 = vld [vmem:[%s387_s20 + $0x18] sm:$0xff]  ;;  %823 = vst.msk [vmem:[#allocation2 + $0x48] sm:$0x3] %vm814_vm1, %v5064_v5  ;;  %825 = vst.msk [vmem:[#allocation2 + $0x58] sm:$0x3] %vm814_vm1, %v5064_v5  ;;  %vm1858_vm7 = vcmask 126048   ;;  %s6701_s20 = scalar_lea.vmem %s6750_s10, %s4532_s17 }
  0x13   : > { %824 = vst.msk [vmem:[#allocation2 + $0x50] sm:$0xff] %vm812_vm0, %v5064_v5  ;;  %826 = vst.msk [vmem:[#allocation2 + $0x60] sm:$0xff] %vm812_vm0, %v5064_v5  ;;  %vm2115_vm8 = vcmask 158848   ;;  %vm2372_vm9 = vcmask 191648   ;;  %vm2630_vm10 = vcmask 224448   ;;  %vm2887_vm11 = vcmask 257248  }
  0x14   : > { %827 = vst.msk [vmem:[#allocation2 + $0x68] sm:$0x3] %vm814_vm1, %v5064_v5  ;;  %829 = vst.msk [vmem:[#allocation2 + $0x78] sm:$0x3] %vm814_vm1, %v5064_v5  ;;  %vm3144_vm12 = vcmask 290048   ;;  %vm3309_vm13 = vcmask 293888  }
  0x15   : > { %828 = vst.msk [vmem:[#allocation2 + $0x70] sm:$0xff] %vm812_vm0, %v5064_v5  ;;  %830 = vst.msk [vmem:[#allocation2 + $0x80] sm:$0xff] %vm812_vm0, %v5064_v5  ;;  %v1120_v6 = vld [vmem:[#allocation2 + $0x1] sm:$0xff] }
  0x16   : > { %405 = vxpose.xlu0.b32.end [2/2] (short) %v402_v2, 128  ;;  %437 = vxpose.xlu1.b32.end [2/2] (short) %v403_v3, 128  ;;  %831 = vst.msk [vmem:[#allocation2 + $0x88] sm:$0x3] %vm814_vm1, %v5064_v5  ;;  %833 = vst.msk [vmem:[#allocation2 + $0x98] sm:$0x3] %vm814_vm1, %v5064_v5  ;;  %v4566_v7 = vpack.c.bf16 %v1120_v6, %v1120_v6  ;;  %v1377_v42 = vld [vmem:[#allocation2 + $0x2] sm:$0xff] }
  0x17   : > { %832 = vst.msk [vmem:[#allocation2 + $0x90] sm:$0xff] %vm812_vm0, %v5064_v5  ;;  %834 = vst.msk [vmem:[#allocation2 + $0xa0] sm:$0xff] %vm812_vm0, %v5064_v5  ;;  %v4598_v44 = vpack.c.bf16 %v1377_v42, %v1377_v42 }
  0x18   : > { %835 = vst.msk [vmem:[#allocation2 + $0xa8] sm:$0x3] %vm814_vm1, %v5064_v5  ;;  %837 = vst.msk [vmem:[#allocation2 + $0xb8] sm:$0x3] %vm814_vm1, %v5064_v5 }
  0x19   : > { %836 = vst.msk [vmem:[#allocation2 + $0xb0] sm:$0xff] %vm812_vm0, %v5064_v5  ;;  %838 = vst.msk [vmem:[#allocation2 + $0xc0] sm:$0xff] %vm812_vm0, %v5064_v5 }
  0x1a   : > { %839 = vst.msk [vmem:[#allocation2 + $0xc8] sm:$0x3] %vm814_vm1, %v5064_v5  ;;  %841 = vst.msk [vmem:[#allocation2 + $0xd8] sm:$0x3] %vm814_vm1, %v5064_v5 }
  0x1b   : > { %840 = vst.msk [vmem:[#allocation2 + $0xd0] sm:$0xff] %vm812_vm0, %v5064_v5  ;;  %842 = vst.msk [vmem:[#allocation2 + $0xe0] sm:$0xff] %vm812_vm0, %v5064_v5 }
  0x1c   : > { %843 = vst.msk [vmem:[#allocation2 + $0xe8] sm:$0x3] %vm814_vm1, %v5064_v5  ;;  %845 = vst.msk [vmem:[#allocation2 + $0xf8] sm:$0x3] %vm814_vm1, %v5064_v5 }
  0x1d   : > { %844 = vst.msk [vmem:[#allocation2 + $0xf0] sm:$0xff] %vm812_vm0, %v5064_v5  ;;  %846 = vst.msk [vmem:[#allocation2 + $0x100] sm:$0xff] %vm812_vm0, %v5064_v5 }
  0x1e   : > { %847 = vst.msk [vmem:[#allocation2 + $0x108] sm:$0x3] %vm814_vm1, %v5064_v5  ;;  %849 = vst.msk [vmem:[#allocation2 + $0x118] sm:$0x3] %vm814_vm1, %v5064_v5  ;;  %v2413_v8 = vld [vmem:[#allocation2 + $0x90] sm:$0xff] }
  0x1f   : > { %848 = vst.msk [vmem:[#allocation2 + $0x110] sm:$0xff] %vm812_vm0, %v5064_v5  ;;  %850 = vst.msk [vmem:[#allocation2 + $0x120] sm:$0xff] %vm812_vm0, %v5064_v5  ;;  %v4733_v9 = vpack.c.bf16 %v2413_v8, %v2413_v8  ;;  %v2670_v10 = vld [vmem:[#allocation2 + $0x91] sm:$0xff]  ;;  %v1128_v46 = vld [vmem:[#allocation2 + $0xa1] sm:$0xff] }
  0x20   : > { %851 = vst.msk [vmem:[#allocation2 + $0x128] sm:$0x3] %vm814_vm1, %v5064_v5  ;;  %853 = vst.msk [vmem:[#allocation2 + $0x138] sm:$0x3] %vm814_vm1, %v5064_v5  ;;  %v4765_v11 = vpack.c.bf16 %v2670_v10, %v2670_v10  ;;  %v2927_v43 = vld [vmem:[#allocation2 + $0x92] sm:$0xff]  ;;  %v4574_v48 = vpack.c.bf16 %v1128_v46, %v1128_v46  ;;  %v1385_v50 = vld [vmem:[#allocation2 + $0xa2] sm:$0xff] }
  0x21   : > { %852 = vst.msk [vmem:[#allocation2 + $0x130] sm:$0xff] %vm812_vm0, %v5064_v5  ;;  %854 = vst.msk [vmem:[#allocation2 + $0x140] sm:$0xff] %vm812_vm0, %v5064_v5  ;;  %v4797_v45 = vpack.c.bf16 %v2927_v43, %v2927_v43  ;;  %v4606_v52 = vpack.c.bf16 %v1385_v50, %v1385_v50 }
  0x22   : > { %855 = vst.msk [vmem:[#allocation2 + $0x148] sm:$0x3] %vm814_vm1, %v5064_v5  ;;  %857 = vst.msk [vmem:[#allocation2 + $0x158] sm:$0x3] %vm814_vm1, %v5064_v5 }
  0x23   : > { %856 = vst.msk [vmem:[#allocation2 + $0x150] sm:$0xff] %vm812_vm0, %v5064_v5  ;;  %858 = vst.msk [vmem:[#allocation2 + $0x160] sm:$0xff] %vm812_vm0, %v5064_v5 }
  0x24   : > { %859 = vst.msk [vmem:[#allocation2 + $0x168] sm:$0x3] %vm814_vm1, %v5064_v5  ;;  %861 = vst.msk [vmem:[#allocation2 + $0x178] sm:$0x3] %vm814_vm1, %v5064_v5 }
  0x25   : > { %860 = vst.msk [vmem:[#allocation2 + $0x170] sm:$0xff] %vm812_vm0, %v5064_v5  ;;  %862 = vst.msk [vmem:[#allocation2 + $0x180] sm:$0xff] %vm812_vm0, %v5064_v5 }
  0x26   : > { %863 = vst.msk [vmem:[#allocation2 + $0x188] sm:$0x3] %vm814_vm1, %v5064_v5  ;;  %865 = vst.msk [vmem:[#allocation2 + $0x198] sm:$0x3] %vm814_vm1, %v5064_v5 }
  0x27   : > { %864 = vst.msk [vmem:[#allocation2 + $0x190] sm:$0xff] %vm812_vm0, %v5064_v5  ;;  %866 = vst.msk [vmem:[#allocation2 + $0x1a0] sm:$0xff] %vm812_vm0, %v5064_v5 }
  0x28   : > { %867 = vst.msk [vmem:[#allocation2 + $0x1a8] sm:$0x3] %vm814_vm1, %v5064_v5  ;;  %869 = vst.msk [vmem:[#allocation2 + $0x1b8] sm:$0x3] %vm814_vm1, %v5064_v5  ;;  %v2421_v47 = vld [vmem:[#allocation2 + $0x130] sm:$0xff] }
  0x29   : > { %868 = vst.msk [vmem:[#allocation2 + $0x1b0] sm:$0xff] %vm812_vm0, %v5064_v5  ;;  %870 = vst.msk [vmem:[#allocation2 + $0x1c0] sm:$0xff] %vm812_vm0, %v5064_v5  ;;  %v4741_v49 = vpack.c.bf16 %v2421_v47, %v2421_v47  ;;  %v2678_v51 = vld [vmem:[#allocation2 + $0x131] sm:$0xff]  ;;  %v1136_v54 = vld [vmem:[#allocation2 + $0x141] sm:$0xff] }
  0x2a   : > { %871 = vst.msk [vmem:[#allocation2 + $0x1c8] sm:$0x3] %vm814_vm1, %v5064_v5  ;;  %873 = vst.msk [vmem:[#allocation2 + $0x1d8] sm:$0x3] %vm814_vm1, %v5064_v5  ;;  %v4773_v53 = vpack.c.bf16 %v2678_v51, %v2678_v51  ;;  %v2935_v55 = vld [vmem:[#allocation2 + $0x132] sm:$0xff]  ;;  %v4582_v56 = vpack.c.bf16 %v1136_v54, %v1136_v54 }
  0x2b   : > { %872 = vst.msk [vmem:[#allocation2 + $0x1d0] sm:$0xff] %vm812_vm0, %v5064_v5  ;;  %874 = vst.msk [vmem:[#allocation2 + $0x1e0] sm:$0xff] %vm812_vm0, %v5064_v5  ;;  %v4805_v57 = vpack.c.bf16 %v2935_v55, %v2935_v55 }
  0x2c   : > { %875 = vst.msk [vmem:[#allocation2 + $0x1e8] sm:$0x3] %vm814_vm1, %v5064_v5  ;;  %877 = vst.msk [vmem:[#allocation2 + $0x1f8] sm:$0x3] %vm814_vm1, %v5064_v5 }
  0x2d   : > { %876 = vst.msk [vmem:[#allocation2 + $0x1f0] sm:$0xff] %vm812_vm0, %v5064_v5  ;;  %878 = vst.msk [vmem:[#allocation2 + $0x200] sm:$0xff] %vm812_vm0, %v5064_v5 }
  0x2e   : > { %879 = vst.msk [vmem:[#allocation2 + $0x208] sm:$0x3] %vm814_vm1, %v5064_v5  ;;  %881 = vst.msk [vmem:[#allocation2 + $0x218] sm:$0x3] %vm814_vm1, %v5064_v5 }
  0x2f   : > { %880 = vst.msk [vmem:[#allocation2 + $0x210] sm:$0xff] %vm812_vm0, %v5064_v5  ;;  %882 = vst.msk [vmem:[#allocation2 + $0x220] sm:$0xff] %vm812_vm0, %v5064_v5 }
  0x30   : > { %883 = vst.msk [vmem:[#allocation2 + $0x228] sm:$0x3] %vm814_vm1, %v5064_v5  ;;  %885 = vst.msk [vmem:[#allocation2 + $0x238] sm:$0x3] %vm814_vm1, %v5064_v5 }
  0x31   : > { %884 = vst.msk [vmem:[#allocation2 + $0x230] sm:$0xff] %vm812_vm0, %v5064_v5  ;;  %886 = vst.msk [vmem:[#allocation2 + $0x240] sm:$0xff] %vm812_vm0, %v5064_v5 }
  0x32   : > { %887 = vst.msk [vmem:[#allocation2 + $0x248] sm:$0x3] %vm814_vm1, %v5064_v5  ;;  %889 = vst.msk [vmem:[#allocation2 + $0x258] sm:$0x3] %vm814_vm1, %v5064_v5 }
  0x33   : > { %888 = vst.msk [vmem:[#allocation2 + $0x250] sm:$0xff] %vm812_vm0, %v5064_v5  ;;  %890 = vst.msk [vmem:[#allocation2 + $0x260] sm:$0xff] %vm812_vm0, %v5064_v5 }
  0x34   : > { %891 = vst.msk [vmem:[#allocation2 + $0x268] sm:$0x3] %vm814_vm1, %v5064_v5  ;;  %893 = vst.msk [vmem:[#allocation2 + $0x278] sm:$0x3] %vm814_vm1, %v5064_v5 }
  0x35   : > { %892 = vst.msk [vmem:[#allocation2 + $0x270] sm:$0xff] %vm812_vm0, %v5064_v5 }
  0x6c   : > { %1505 = vrot.lane.b32.xlu1 %v4598_v44, %s5068_s26 }
  0x70   : > { %1264 = vrot.lane.b32.xlu1 %v4574_v48, %s5065_s23 }
  0x74   : > { %1521 = vrot.lane.b32.xlu1 %v4606_v52, %s5068_s26 }
  0x77   : > { %1248 = vrot.lane.b32.xlu0 %v4566_v7, %s5065_s23 }
  0x78   : > { %1280 = vrot.lane.b32.xlu1 %v4582_v56, %s5065_s23 }
  0x7b   : > { %2548 = vrot.lane.b32.xlu0 %v4733_v9, %s5066_s24 }
  0x7f   : > { %2805 = vrot.lane.b32.xlu0 %v4765_v11, %s5067_s25 }
  0x83   : > { %3062 = vrot.lane.b32.xlu0 %v4797_v45, %s5069_s27  ;;  %v5454_v45 = vld [vmem:[%s6745_s5] ss:$0 sm:$0xff] }
  0x87   : > { %2564 = vrot.lane.b32.xlu0 %v4741_v49, %s5066_s24 }
  0x8b   : > { %2821 = vrot.lane.b32.xlu0 %v4773_v53, %s5067_s25 }
  0x8e   : > { %v5320_v12 = vpop.trf.xlu0  ;;  %v5322_v13 = vpop.trf.xlu1 }
  0x8f   : > { %3078 = vrot.lane.b32.xlu0 %v4805_v57, %s5069_s27 }
  0x92   : > { %v5324_v14 = vpop.trf.xlu0  ;;  %v5326_v15 = vpop.trf.xlu1 }
  0x93   : > { %6766 = vst [vmem:[#allocation4_spill] sm:$0xff] %v5326_v15  ;;  %v468_v16 = vpack.c.bf16 %v5324_v14, %v5320_v12  ;;  %v476_v17 = vpack.c.bf16 %v5326_v15, %v5322_v13 }
  0x95   : > { %4877 = vmatprep.mubr.msk.bf16.mxu0 %vm492_vm2, %v468_v16  ;;  %4893 = vmatprep.mubr.msk.bf16.mxu1 %vm492_vm2, %v476_v17  ;;  %v927_v16 = vld [vmem:[#allocation2] sm:$0xff] }
  0x96   : > { %v5334_v18 = vpop.trf.xlu0  ;;  %v5336_v19 = vpop.trf.xlu1  ;;  %v4534_v17 = vpack.c.bf16 %v927_v16, %v927_v16 }
  0x97   : > { %6767 = vst [vmem:[#allocation5_spill] sm:$0xff] %v5336_v19 }
  0x98   : > { %1088 = vst.msk [vmem:[#allocation3] sm:$0xf] %vm1087_vm4, %v4534_v17 }
  0x9a   : > { %v5338_v20 = vpop.trf.xlu0  ;;  %v5340_v21 = vpop.trf.xlu1 }
  0x9b   : > { %6768 = vst [vmem:[#allocation6_spill] sm:$0xff] %v5340_v21  ;;  %v469_v22 = vpack.c.bf16 %v5338_v20, %v5334_v18  ;;  %v477_v23 = vpack.c.bf16 %v5340_v21, %v5336_v19 }
  0x9d   : > { %4878 = vmatmul.mubr.msk.bf16.vlgmr.msra.gmra.mxu0 %vm492_vm2, %v469_v22  ;;  %4894 = vmatmul.mubr.msk.bf16.vlgmr.msra.gmra.mxu1 %vm492_vm2, %v477_v23 }
  0x9e   : > { %v5348_v24 = vpop.trf.xlu0  ;;  %v5398_v58 = vpop.trf.xlu1 }
  0x9f   : > { %6769 = vst [vmem:[#allocation7_spill] sm:$0xff] %v5398_v58 }
  0xa2   : > { %v5350_v25 = vpop.trf.xlu0  ;;  %v5400_v59 = vpop.trf.xlu1 }
  0xa3   : > { %v470_v26 = vpack.c.bf16 %v5350_v25, %v5348_v24  ;;  %6770 = vst [vmem:[#allocation8_spill] sm:$0xff] %v5400_v59  ;;  %v478_v60 = vpack.c.bf16 %v5400_v59, %v5398_v58 }
  0xa5   : > { %4881 = vmatprep.mubr.msk.bf16.mxu0 %vm492_vm2, %v470_v26  ;;  %4897 = vmatprep.mubr.msk.bf16.mxu1 %vm492_vm2, %v478_v60  ;;  %v935_v26 = vld [vmem:[#allocation2 + $0xa0] sm:$0xff] }
  0xa6   : > { %v5355_v27 = vpop.trf.xlu0  ;;  %v5405_v61 = vpop.trf.xlu1 }
  0xa7   : > { %6771 = vst [vmem:[#allocation9_spill] sm:$0xff] %v5405_v61 }
  0xaa   : > { %v5357_v28 = vpop.trf.xlu0  ;;  %v5407_v62 = vpop.trf.xlu1 }
  0xab   : > { %v471_v29 = vpack.c.bf16 %v5357_v28, %v5355_v27  ;;  %6772 = vst [vmem:[#allocation10_spill] sm:$0xff] %v5407_v62  ;;  %v479_v63 = vpack.c.bf16 %v5407_v62, %v5405_v61 }
  0xad   : > { %4882 = vmatmul.mubr.msk.bf16.gmra.mxu0 %vm492_vm2, %v471_v29  ;;  %4898 = vmatmul.mubr.msk.bf16.gmra.mxu1 %vm492_vm2, %v479_v63  ;;  %v4542_v29 = vpack.c.bf16 %v935_v26, %v935_v26 }
  0xae   : > { %v5362_v30 = vpop.trf.xlu0  ;;  %v5412_v0 = vpop.trf.xlu1 }
  0xaf   : > { %6773 = vst [vmem:[#allocation11_spill] sm:$0xff] %v5412_v0  ;;  %1096 = vst.msk [vmem:[#allocation3 + $0x20] sm:$0xf] %vm1087_vm4, %v4542_v29 }
  0xb2   : > { %v5364_v31 = vpop.trf.xlu0  ;;  %v5414_v1 = vpop.trf.xlu1 }
  0xb3   : > { %v472_v32 = vpack.c.bf16 %v5364_v31, %v5362_v30  ;;  %6774 = vst [vmem:[#allocation12_spill] sm:$0xff] %v5414_v1  ;;  %v480_v2 = vpack.c.bf16 %v5414_v1, %v5412_v0 }
  0xb5   : > { %4885 = vmatprep.mubr.msk.bf16.mxu0 %vm492_vm2, %v472_v32  ;;  %4901 = vmatprep.mubr.msk.bf16.mxu1 %vm492_vm2, %v480_v2 }
  0xb6   : > { %v5369_v33 = vpop.trf.xlu0  ;;  %v5419_v3 = vpop.trf.xlu1 }
  0xb7   : > { %6775 = vst [vmem:[#allocation13_spill] sm:$0xff] %v5419_v3 }
  0xba   : > { %v5371_v34 = vpop.trf.xlu0  ;;  %v5421_v4 = vpop.trf.xlu1 }
  0xbb   : > { %v473_v35 = vpack.c.bf16 %v5371_v34, %v5369_v33  ;;  %6776 = vst [vmem:[#allocation14_spill] sm:$0xff] %v5421_v4  ;;  %v481_v5 = vpack.c.bf16 %v5421_v4, %v5419_v3 }
  0xbd   : > { %4886 = vmatmul.mubr.msk.bf16.gmra.mxu0 %vm492_vm2, %v473_v35  ;;  %4902 = vmatmul.mubr.msk.bf16.gmra.mxu1 %vm492_vm2, %v481_v5 }
  0xbe   : > { %v5376_v36 = vpop.trf.xlu0  ;;  %v5426_v6 = vpop.trf.xlu1 }
  0xbf   : > { %6777 = vst [vmem:[#allocation15_spill] sm:$0xff] %v5426_v6 }
  0xc2   : > { %v5378_v37 = vpop.trf.xlu0  ;;  %v5428_v7 = vpop.trf.xlu1 }
  0xc3   : > { %v474_v38 = vpack.c.bf16 %v5378_v37, %v5376_v36  ;;  %6778 = vst [vmem:[#allocation16_spill] sm:$0xff] %v5428_v7  ;;  %v482_v8 = vpack.c.bf16 %v5428_v7, %v5426_v6 }
  0xc5   : > { %4889 = vmatprep.mubr.msk.bf16.mxu0 %vm492_vm2, %v474_v38  ;;  %4905 = vmatprep.mubr.msk.bf16.mxu1 %vm492_vm2, %v482_v8  ;;  %v943_v38 = vld [vmem:[#allocation2 + $0x140] sm:$0xff] }
  0xc6   : > { %v5383_v39 = vpop.trf.xlu0  ;;  %v5433_v9 = vpop.trf.xlu1  ;;  %v4550_v42 = vpack.c.bf16 %v943_v38, %v943_v38 }
  0xc7   : > { %6779 = vst [vmem:[#allocation17_spill] sm:$0xff] %v5433_v9 }
  0xc8   : > { %1104 = vst.msk [vmem:[#allocation3 + $0x40] sm:$0xf] %vm1087_vm4, %v4550_v42 }
  0xca   : > { %v5385_v40 = vpop.trf.xlu0  ;;  %v5435_v10 = vpop.trf.xlu1 }
  0xcb   : > { %v475_v41 = vpack.c.bf16 %v5385_v40, %v5383_v39  ;;  %6780 = vst [vmem:[#allocation18_spill] sm:$0xff] %v5435_v10  ;;  %v483_v11 = vpack.c.bf16 %v5435_v10, %v5433_v9 }
  0xcd   : > { %4890 = vmatmul.mubr.msk.bf16.gmra.mxu0 %vm492_vm2, %v475_v41  ;;  %4906 = vmatmul.mubr.msk.bf16.gmra.mxu1 %vm492_vm2, %v483_v11  ;;  %v5449_v41 = vld [vmem:[%s6744_s4] ss:$0 sm:$0xff] }
  0xde   : > { %v1506_v23 = vpop.permute.xlu1 %1505 }
  0xe2   : > { %v1265_v32 = vpop.permute.xlu1 %1264 }
  0xe3   : > { %1353 = vst.msk [vmem:[#allocation3 + $0x20] sm:$0xf] %vm1344_vm3, %v1265_v32 }
  0xe6   : > { %v1522_v35 = vpop.permute.xlu1 %1521 }
  0xe7   : > { %1610 = vst.msk [vmem:[#allocation3 + $0x20] sm:$0xf] %vm1601_vm5, %v1522_v35 }
  0xe9   : > { %v1249_v22 = vpop.permute.xlu0 %1248 }
  0xea   : > { %1345 = vst.msk [vmem:[#allocation3] sm:$0xf] %vm1344_vm3, %v1249_v22  ;;  %v1281_v43 = vpop.permute.xlu1 %1280 }
  0xeb   : > { %1602 = vst.msk [vmem:[#allocation3] sm:$0xf] %vm1601_vm5, %v1506_v23 }
  0xec   : > { %1361 = vst.msk [vmem:[#allocation3 + $0x40] sm:$0xf] %vm1344_vm3, %v1281_v43 }
 0x15d   : > { %v4879_v44 = vpop.f32.mrf.mxu0  ;;  %v4895_v46 = vpop.f32.mrf.mxu1 }
 0x15e   : > { %v711_v47 = vmul.f32 %v4879_v44, %v5449_v41  ;;  %v727_v48 = vmul.f32 %v4895_v46, %v5449_v41 }
 0x15f   : > { %v575_v49 = vpop.f32.mrf.mxu0  ;;  %v639_v50 = vpop.f32.mrf.mxu1 }
 0x160   : > { %v750_v51 = vadd.f32 %v5454_v45, %v711_v47  ;;  %v709_v52 = vmul.f32 %v5449_v41, %v575_v49  ;;  %v766_v53 = vadd.f32 %v5454_v45, %v727_v48  ;;  %v725_v54 = vmul.f32 %v5449_v41, %v639_v50 }
 0x161   : > { %v4880_v55 = vpop.f32.mrf.mxu0  ;;  %v4896_v56 = vpop.f32.mrf.mxu1 }
 0x162   : > { %v782_v57 = vmax.f32 %v750_v51, 0.0  ;;  %v748_v60 = vadd.f32 %v5454_v45, %v709_v52  ;;  %v712_v63 = vmul.f32 %v4880_v55, %v5449_v41  ;;  %v798_v2 = vmax.f32 %v766_v53, 0.0 }
 0x163   : > { %v578_v5 = vpop.f32.mrf.mxu0  ;;  %v764_v8 = vadd.f32 %v5454_v45, %v725_v54  ;;  %v728_v11 = vmul.f32 %v4896_v56, %v5449_v41  ;;  %v642_v16 = vpop.f32.mrf.mxu1 }
 0x164   : > { %897 = vst.msk [vmem:[#allocation2 + $0x31] sm:$0xff] %vm812_vm0, %v782_v57  ;;  %v780_v17 = vmax.f32 %v748_v60, 0.0  ;;  %v751_v22 = vadd.f32 %v5454_v45, %v712_v63  ;;  %v710_v23 = vmul.f32 %v5449_v41, %v578_v5  ;;  %913 = vst.msk [vmem:[#allocation2 + $0x171] sm:$0xff] %vm812_vm0, %v798_v2  ;;  %v726_v26 = vmul.f32 %v5449_v41, %v642_v16 }
 0x165   : > { %v796_v29 = vmax.f32 %v764_v8, 0.0  ;;  %v767_v32 = vadd.f32 %v5454_v45, %v728_v11 }
 0x166   : > { %895 = vst.msk [vmem:[#allocation2 + $0x11] sm:$0xff] %vm812_vm0, %v780_v17  ;;  %v783_v35 = vmax.f32 %v751_v22, 0.0  ;;  %v749_v38 = vadd.f32 %v5454_v45, %v710_v23  ;;  %v765_v42 = vadd.f32 %v5454_v45, %v726_v26 }
 0x167   : > { %911 = vst.msk [vmem:[#allocation2 + $0x151] sm:$0xff] %vm812_vm0, %v796_v29  ;;  %v799_v43 = vmax.f32 %v767_v32, 0.0 }
 0x168   : > { %898 = vst.msk [vmem:[#allocation2 + $0x41] sm:$0xff] %vm812_vm0, %v783_v35  ;;  %v781_v44 = vmax.f32 %v749_v38, 0.0  ;;  %v797_v46 = vmax.f32 %v765_v42, 0.0 }
 0x169   : > { %914 = vst.msk [vmem:[#allocation2 + $0x181] sm:$0xff] %vm812_vm0, %v799_v43 }
 0x16a   : > { %896 = vst.msk [vmem:[#allocation2 + $0x21] sm:$0xff] %vm812_vm0, %v781_v44  ;;  %912 = vst.msk [vmem:[#allocation2 + $0x161] sm:$0xff] %vm812_vm0, %v797_v46 }
 0x16b   : > { %v1380_v47 = vld [vmem:[#allocation2 + $0x32] sm:$0xff] }
 0x16c   : > { %v1123_v48 = vld [vmem:[#allocation2 + $0x31] sm:$0xff]  ;;  %v4601_v50 = vpack.c.bf16 %v1380_v47, %v1380_v47 }
 0x16d   : > { %v2407_v49 = vld [vmem:[#allocation2 + $0x30] sm:$0xff]  ;;  %v4569_v51 = vpack.c.bf16 %v1123_v48, %v1123_v48  ;;  %v4883_v55 = vpop.f32.mrf.mxu0 }
 0x16e   : > { %v4727_v52 = vpack.c.bf16 %v2407_v49, %v2407_v49  ;;  %v1652_v53 = vld [vmem:[#allocation2 + $0x170] sm:$0xff]  ;;  %1511 = vrot.lane.b32.xlu0 %v4601_v50, %s5068_s26  ;;  %v715_v2 = vmul.f32 %v4883_v55, %v5449_v41 }
 0x16f   : > { %v1634_v54 = vld [vmem:[#allocation2 + $0x10] sm:$0xff]  ;;  %v5482_v56 = vpack.c.bf16 %v1652_v53, %v1652_v53  ;;  %1254 = vrot.lane.b32.xlu1 %v4569_v51, %s5065_s23  ;;  %v1637_v63 = vld [vmem:[#allocation2 + $0x40] sm:$0xff]  ;;  %v591_v5 = vpop.f32.mrf.mxu0 }
 0x170   : > { %v5486_v57 = vpack.c.bf16 %v1634_v54, %v1634_v54  ;;  %1091 = vst.msk [vmem:[#allocation3 + $0xc] sm:$0xf] %vm1087_vm4, %v4727_v52  ;;  %v944_v60 = vld [vmem:[#allocation2 + $0x150] sm:$0xff]  ;;  %v5494_v11 = vpack.c.bf16 %v1637_v63, %v1637_v63  ;;  %v713_v16 = vmul.f32 %v5449_v41, %v591_v5  ;;  %v754_v17 = vadd.f32 %v5454_v45, %v715_v2  ;;  %v947_v44 = vld [vmem:[#allocation2 + $0x180] sm:$0xff] }
 0x171   : > { %v5490_v8 = vpack.c.bf16 %v944_v60, %v944_v60  ;;  %1107 = vst.msk [vmem:[#allocation3 + $0x4c] sm:$0xf] %vm1087_vm4, %v5482_v56  ;;  %v1635_v22 = vld [vmem:[#allocation2 + $0x20] sm:$0xff]  ;;  %v4884_v23 = vpop.f32.mrf.mxu0  ;;  %v4554_v49 = vpack.c.bf16 %v947_v44, %v947_v44  ;;  %v1378_v55 = vld [vmem:[#allocation2 + $0x12] sm:$0xff] }
 0x172   : > { %1089 = vst.msk [vmem:[#allocation3 + $0x4] sm:$0xf] %vm1087_vm4, %v5486_v57  ;;  %2536 = vrot.lane.b32.xlu0 %v4727_v52, %s5066_s24  ;;  %v5504_v26 = vpack.c.bf16 %v1635_v22, %v1635_v22  ;;  %v752_v29 = vadd.f32 %v5454_v45, %v713_v16  ;;  %1092 = vst.msk [vmem:[#allocation3 + $0x10] sm:$0xf] %vm1087_vm4, %v5494_v11  ;;  %v1651_v32 = vld [vmem:[#allocation2 + $0x160] sm:$0xff]  ;;  %v786_v35 = vmax.f32 %v754_v17, 0.0 }
 0x173   : > { %1105 = vst.msk [vmem:[#allocation3 + $0x44] sm:$0xf] %vm1087_vm4, %v5490_v8  ;;  %1766 = vrot.lane.b32.xlu1 %v4727_v52, %s5070_s12  ;;  %v716_v38 = vmul.f32 %v4884_v23, %v5449_v41  ;;  %v594_v42 = vpop.f32.mrf.mxu0  ;;  %v5510_v43 = vpack.c.bf16 %v1651_v32, %v1651_v32  ;;  %1108 = vst.msk [vmem:[#allocation3 + $0x50] sm:$0xf] %vm1087_vm4, %v4554_v49  ;;  %v1121_v60 = vld [vmem:[#allocation2 + $0x11] sm:$0xff]  ;;  %v4599_v63 = vpack.c.bf16 %v1378_v55, %v1378_v55  ;;  %v1894_v55 = vld [vmem:[#allocation2 + $0x41] sm:$0xff] }
 0x174   : > { %v784_v46 = vmax.f32 %v752_v29, 0.0  ;;  %v714_v47 = vmul.f32 %v5449_v41, %v594_v42  ;;  %1090 = vst.msk [vmem:[#allocation3 + $0x8] sm:$0xf] %vm1087_vm4, %v5504_v26  ;;  %v4567_v2 = vpack.c.bf16 %v1121_v60, %v1121_v60 }
 0x175   : > { %901 = vst.msk [vmem:[#allocation2 + $0x71] sm:$0xff] %vm812_vm0, %v786_v35  ;;  %v755_v48 = vadd.f32 %v5454_v45, %v716_v38 }
 0x176   : > { %1106 = vst.msk [vmem:[#allocation3 + $0x48] sm:$0xf] %vm1087_vm4, %v5510_v43  ;;  %2793 = vrot.lane.b32.xlu0 %v4569_v51, %s5067_s25  ;;  %v753_v52 = vadd.f32 %v5454_v45, %v714_v47 }
 0x177   : > { %2023 = vrot.lane.b32.xlu1 %v4569_v51, %s5071_s18  ;;  %899 = vst.msk [vmem:[#allocation2 + $0x51] sm:$0xff] %vm812_vm0, %v784_v46  ;;  %v787_v53 = vmax.f32 %v755_v48, 0.0  ;;  %v1137_v51 = vld [vmem:[#allocation2 + $0x151] sm:$0xff] }
 0x178   : > { %v785_v54 = vmax.f32 %v753_v52, 0.0  ;;  %v4583_v23 = vpack.c.bf16 %v1137_v51, %v1137_v51 }
 0x179   : > { %902 = vst.msk [vmem:[#allocation2 + $0x81] sm:$0xff] %vm812_vm0, %v787_v53 }
 0x17a   : > { %3050 = vrot.lane.b32.xlu0 %v4601_v50, %s5069_s27  ;;  %900 = vst.msk [vmem:[#allocation2 + $0x61] sm:$0xff] %vm812_vm0, %v785_v54 }
 0x17b   : > { %2280 = vrot.lane.b32.xlu1 %v4601_v50, %s5072_s19 }
 0x17c   : > { %v2411_v5 = vld [vmem:[#allocation2 + $0x70] sm:$0xff] }
 0x17d   : > { %v5528_v16 = vpack.c.bf16 %v2411_v5, %v2411_v5  ;;  %v4887_v22 = vpop.f32.mrf.mxu0  ;;  %v4665_v5 = vpack.c.bf16 %v1894_v55, %v1894_v55 }
 0x17e   : > { %v2409_v17 = vld [vmem:[#allocation2 + $0x50] sm:$0xff]  ;;  %1507 = vrot.lane.b32.xlu0 %v4599_v63, %s5068_s26  ;;  %v719_v32 = vmul.f32 %v4887_v22, %v5449_v41  ;;  %v2151_v22 = vld [vmem:[#allocation2 + $0x42] sm:$0xff] }
 0x17f   : > { %1250 = vrot.lane.b32.xlu1 %v4567_v2, %s5065_s23  ;;  %v5532_v29 = vpack.c.bf16 %v2409_v17, %v2409_v17  ;;  %v607_v50 = vpop.f32.mrf.mxu0  ;;  %1095 = vst.msk [vmem:[#allocation3 + $0x1c] sm:$0xf] %vm1087_vm4, %v5528_v16 }
 0x180   : > { %v717_v35 = vmul.f32 %v5449_v41, %v607_v50  ;;  %v758_v38 = vadd.f32 %v5454_v45, %v719_v32 }
 0x181   : > { %1093 = vst.msk [vmem:[#allocation3 + $0x14] sm:$0xf] %vm1087_vm4, %v5532_v29  ;;  %v1639_v42 = vld [vmem:[#allocation2 + $0x60] sm:$0xff]  ;;  %v4888_v44 = vpop.f32.mrf.mxu0 }
 0x182   : > { %1282 = vrot.lane.b32.xlu0 %v4583_v23, %s5065_s23  ;;  %v5544_v46 = vpack.c.bf16 %v1639_v42, %v1639_v42  ;;  %v756_v47 = vadd.f32 %v5454_v45, %v717_v35  ;;  %v790_v48 = vmax.f32 %v758_v38, 0.0  ;;  %v720_v49 = vmul.f32 %v4888_v44, %v5449_v41 }
 0x183   : > { %1762 = vrot.lane.b32.xlu1 %v5486_v57, %s5070_s12  ;;  %v610_v52 = vpop.f32.mrf.mxu0 }
 0x184   : > { %v788_v53 = vmax.f32 %v756_v47, 0.0  ;;  %v718_v54 = vmul.f32 %v5449_v41, %v610_v52  ;;  %1094 = vst.msk [vmem:[#allocation3 + $0x18] sm:$0xf] %vm1087_vm4, %v5544_v46  ;;  %v759_v60 = vadd.f32 %v5454_v45, %v720_v49 }
 0x185   : > { %905 = vst.msk [vmem:[#allocation2 + $0xd1] sm:$0xff] %vm812_vm0, %v790_v48  ;;  %v1892_v48 = vld [vmem:[#allocation2 + $0x21] sm:$0xff] }
 0x186   : > { %1768 = vrot.lane.b32.xlu0 %v5494_v11, %s5070_s12  ;;  %903 = vst.msk [vmem:[#allocation2 + $0xb1] sm:$0xff] %vm812_vm0, %v788_v53  ;;  %v757_v57 = vadd.f32 %v5454_v45, %v718_v54  ;;  %v791_v51 = vmax.f32 %v759_v60, 0.0 }
 0x187   : > { %2019 = vrot.lane.b32.xlu1 %v4567_v2, %s5071_s18  ;;  %v4697_v2 = vpack.c.bf16 %v2151_v22, %v2151_v22 }
 0x188   : > { %v789_v17 = vmax.f32 %v757_v57, 0.0  ;;  %906 = vst.msk [vmem:[#allocation2 + $0xe1] sm:$0xff] %vm812_vm0, %v791_v51 }
 0x18a   : > { %2025 = vrot.lane.b32.xlu0 %v4665_v5, %s5071_s18  ;;  %904 = vst.msk [vmem:[#allocation2 + $0xc1] sm:$0xff] %vm812_vm0, %v789_v17  ;;  %v4663_v17 = vpack.c.bf16 %v1892_v48, %v1892_v48 }
 0x18b   : > { %2276 = vrot.lane.b32.xlu1 %v4599_v63, %s5072_s19 }
 0x18c   : > { %v2415_v23 = vld [vmem:[#allocation2 + $0xd0] sm:$0xff] }
 0x18d   : > { %v5562_v32 = vpack.c.bf16 %v2415_v23, %v2415_v23  ;;  %v1642_v50 = vld [vmem:[#allocation2 + $0xb0] sm:$0xff]  ;;  %v4891_v35 = vpop.f32.mrf.mxu0 }
 0x18e   : > { %2282 = vrot.lane.b32.xlu0 %v4697_v2, %s5072_s19  ;;  %v5567_v38 = vpack.c.bf16 %v1642_v50, %v1642_v50  ;;  %v723_v42 = vmul.f32 %v4891_v35, %v5449_v41  ;;  %v2149_v50 = vld [vmem:[#allocation2 + $0x22] sm:$0xff] }
 0x18f   : > { %2538 = vrot.lane.b32.xlu1 %v5494_v11, %s5066_s24  ;;  %v623_v63 = vpop.f32.mrf.mxu0  ;;  %1099 = vst.msk [vmem:[#allocation3 + $0x2c] sm:$0xf] %vm1087_vm4, %v5562_v32  ;;  %v1645_v44 = vld [vmem:[#allocation2 + $0xe0] sm:$0xff] }
 0x190   : > { %v721_v47 = vmul.f32 %v5449_v41, %v623_v63  ;;  %1097 = vst.msk [vmem:[#allocation3 + $0x24] sm:$0xf] %vm1087_vm4, %v5567_v38  ;;  %v5575_v49 = vpack.c.bf16 %v1645_v44, %v1645_v44  ;;  %v762_v11 = vadd.f32 %v5454_v45, %v723_v42  ;;  %v1127_v63 = vld [vmem:[#allocation2 + $0x71] sm:$0xff] }
 0x191   : > { %v1643_v52 = vld [vmem:[#allocation2 + $0xc0] sm:$0xff]  ;;  %v4892_v53 = vpop.f32.mrf.mxu0 }
 0x192   : > { %1764 = vrot.lane.b32.xlu0 %v5504_v26, %s5070_s12  ;;  %v5581_v54 = vpack.c.bf16 %v1643_v52, %v1643_v52  ;;  %v760_v55 = vadd.f32 %v5454_v45, %v721_v47  ;;  %v794_v60 = vmax.f32 %v762_v11, 0.0  ;;  %v724_v57 = vmul.f32 %v4892_v53, %v5449_v41  ;;  %1100 = vst.msk [vmem:[#allocation3 + $0x30] sm:$0xf] %vm1087_vm4, %v5575_v49 }
 0x193   : > { %2795 = vrot.lane.b32.xlu1 %v4665_v5, %s5067_s25  ;;  %v626_v51 = vpop.f32.mrf.mxu0  ;;  %v4695_v47 = vpack.c.bf16 %v2149_v50, %v2149_v50  ;;  %v4573_v11 = vpack.c.bf16 %v1127_v63, %v1127_v63  ;;  %v2666_v50 = vld [vmem:[#allocation2 + $0x51] sm:$0xff] }
 0x194   : > { %v792_v22 = vmax.f32 %v760_v55, 0.0  ;;  %v722_v23 = vmul.f32 %v5449_v41, %v626_v51  ;;  %1098 = vst.msk [vmem:[#allocation3 + $0x28] sm:$0xf] %vm1087_vm4, %v5581_v54  ;;  %v763_v35 = vadd.f32 %v5454_v45, %v724_v57 }
 0x195   : > { %909 = vst.msk [vmem:[#allocation2 + $0x111] sm:$0xff] %vm812_vm0, %v794_v60 }
 0x196   : > { %2021 = vrot.lane.b32.xlu0 %v4663_v17, %s5071_s18  ;;  %907 = vst.msk [vmem:[#allocation2 + $0xf1] sm:$0xff] %vm812_vm0, %v792_v22  ;;  %v761_v42 = vadd.f32 %v5454_v45, %v722_v23  ;;  %v795_v44 = vmax.f32 %v763_v35, 0.0  ;;  %v5022_v35 = vld [vmem:[%s6742_s2] sm:$0xff]  }
 0x197   : > { %1256 = vrot.lane.b32.xlu1 %v4665_v5, %s5065_s23  ;;  %v1384_v5 = vld [vmem:[#allocation2 + $0x72] sm:$0xff] }
 0x198   : > { %v793_v48 = vmax.f32 %v761_v42, 0.0  ;;  %910 = vst.msk [vmem:[#allocation2 + $0x121] sm:$0xff] %vm812_vm0, %v795_v44  ;;  %v4605_v55 = vpack.c.bf16 %v1384_v5, %v1384_v5  ;;  %v2923_v42 = vld [vmem:[#allocation2 + $0x52] sm:$0xff]  ;;  %v5643_v44 = vpop.permute.xlu0 %2548  ;;  %v1898_v5 = vld [vmem:[#allocation2 + $0x81] sm:$0xff] }
 0x199   : > { %v4793_v63 = vpack.c.bf16 %v2923_v42, %v2923_v42 }
 0x19a   : > { %2278 = vrot.lane.b32.xlu0 %v4695_v47, %s5072_s19  ;;  %908 = vst.msk [vmem:[#allocation2 + $0x101] sm:$0xff] %vm812_vm0, %v793_v48 }
 0x19b   : > { %3052 = vrot.lane.b32.xlu1 %v4697_v2, %s5069_s27 }
 0x19c   : > { %v2419_v52 = vld [vmem:[#allocation2 + $0x110] sm:$0xff] }
 0x19d   : > { %v5600_v53 = vpack.c.bf16 %v2419_v52, %v2419_v52  ;;  %v2417_v60 = vld [vmem:[#allocation2 + $0xf0] sm:$0xff] }
 0x19e   : > { %1262 = vrot.lane.b32.xlu0 %v4573_v11, %s5065_s23  ;;  %v5606_v57 = vpack.c.bf16 %v2417_v60, %v2417_v60 }
 0x19f   : > { %1513 = vrot.lane.b32.xlu1 %v4697_v2, %s5068_s26  ;;  %1103 = vst.msk [vmem:[#allocation3 + $0x3c] sm:$0xf] %vm1087_vm4, %v5600_v53  ;;  %v5019_v2 = vld [vmem:[%s6742_s2 + $0x10] ss:$0 sps:$4 sm:$0x33]  }
 0x1a0   : > { %1101 = vst.msk [vmem:[#allocation3 + $0x34] sm:$0xf] %vm1087_vm4, %v5606_v57  ;;  %4983 = vmatprep.subr.msk.bf16.mxu1 %vm3358_vm6, %v5019_v2  ;;  %v3360_v23 = vsel %vm3358_vm6, %v5019_v2, 0 }
 0x1a1   : > { %v1647_v51 = vld [vmem:[#allocation2 + $0x100] sm:$0xff]  ;;  %4910 = vmatpush3.bf16.msra.mxu1 %v3360_v23 }
 0x1a2   : > { %1519 = vrot.lane.b32.xlu0 %v4605_v55, %s5068_s26  ;;  %v5610_v22 = vpack.c.bf16 %v1647_v51, %v1647_v51  ;;  %v1896_v51 = vld [vmem:[#allocation2 + $0x61] sm:$0xff] }
 0x1a3   : > { %1252 = vrot.lane.b32.xlu1 %v4663_v17, %s5065_s23  ;;  %v4667_v2 = vpack.c.bf16 %v1896_v51, %v1896_v51 }
 0x1a4   : > { %1102 = vst.msk [vmem:[#allocation3 + $0x38] sm:$0xf] %vm1087_vm4, %v5610_v22 }
 0x1a6   : > { %2544 = vrot.lane.b32.xlu0 %v5528_v16, %s5066_s24 }
 0x1a7   : > { %1509 = vrot.lane.b32.xlu1 %v4695_v47, %s5068_s26 }
 0x1aa   : > { %2801 = vrot.lane.b32.xlu0 %v4573_v11, %s5067_s25 }
 0x1ab   : > { %2534 = vrot.lane.b32.xlu1 %v5504_v26, %s5066_s24  ;;  %v5021_v26 = vld [vmem:[%s6742_s2 + $0x8] sm:$0xff]  }
 0x1ac   : > { %4911 = vmatprep.subr.bf16.mxu1 %v5021_v26 }
 0x1ad   : > { %4912 = vmatpush3.bf16.msra.mxu1 %v5021_v26  ;;  %v1131_v26 = vld [vmem:[#allocation2 + $0xd1] sm:$0xff] }
 0x1ae   : > { %3058 = vrot.lane.b32.xlu0 %v4605_v55, %s5069_s27  ;;  %4913 = vmatprep.subr.bf16.mxu1 %v5022_v35  ;;  %v4577_v42 = vpack.c.bf16 %v1131_v26, %v1131_v26 }
 0x1af   : > { %2791 = vrot.lane.b32.xlu1 %v4663_v17, %s5067_s25  ;;  %v4761_v17 = vpack.c.bf16 %v2666_v50, %v2666_v50  ;;  %v2153_v50 = vld [vmem:[#allocation2 + $0x62] sm:$0xff] }
 0x1b1   : > { %4914 = vmatpush3.bf16.msra.mxu1 %v5022_v35 }
 0x1b2   : > { %2540 = vrot.lane.b32.xlu0 %v5532_v29, %s5066_s24 }
 0x1b3   : > { %3048 = vrot.lane.b32.xlu1 %v4695_v47, %s5069_s27  ;;  %v1641_v47 = vld [vmem:[#allocation2 + $0x80] sm:$0xff] }
 0x1b4   : > { %v4637_v48 = vpack.c.bf16 %v1641_v47, %v1641_v47 }
 0x1b6   : > { %2797 = vrot.lane.b32.xlu0 %v4761_v17, %s5067_s25 }
 0x1b7   : > { %1774 = vrot.lane.b32.xlu1 %v5528_v16, %s5070_s12  ;;  %v5650_v16 = vpop.permute.xlu0 %2805 }
 0x1ba   : > { %1258 = vrot.lane.b32.xlu0 %v4761_v17, %s5065_s23 }
 0x1bb   : > { %2031 = vrot.lane.b32.xlu1 %v4573_v11, %s5071_s18  ;;  %v4669_v11 = vpack.c.bf16 %v1898_v5, %v1898_v5  ;;  %v5654_v52 = vpop.permute.xlu0 %3062 }
 0x1be   : > { %3054 = vrot.lane.b32.xlu0 %v4793_v63, %s5069_s27 }
 0x1bf   : > { %2288 = vrot.lane.b32.xlu1 %v4605_v55, %s5072_s19  ;;  %v2155_v55 = vld [vmem:[#allocation2 + $0x82] sm:$0xff] }
 0x1c0   : > { %v4701_v60 = vpack.c.bf16 %v2155_v55, %v2155_v55 }
 0x1c2   : > { %1515 = vrot.lane.b32.xlu0 %v4793_v63, %s5068_s26 }
 0x1c3   : > { %1770 = vrot.lane.b32.xlu1 %v5532_v29, %s5070_s12  ;;  %v5660_v29 = vpop.permute.xlu0 %2564 }
 0x1c6   : > { %1776 = vrot.lane.b32.xlu0 %v4637_v48, %s5070_s12 }
 0x1c7   : > { %2027 = vrot.lane.b32.xlu1 %v4761_v17, %s5071_s18  ;;  %v5665_v23 = vpop.permute.xlu0 %2821  ;;  %v4699_v17 = vpack.c.bf16 %v2153_v50, %v2153_v50 }
 0x1ca   : > { %2033 = vrot.lane.b32.xlu0 %v4669_v11, %s5071_s18 }
 0x1cb   : > { %2284 = vrot.lane.b32.xlu1 %v4793_v63, %s5072_s19  ;;  %v5671_v35 = vpop.permute.xlu0 %3078  ;;  %v1388_v63 = vld [vmem:[#allocation2 + $0xd2] sm:$0xff] }
 0x1cc   : > { %v4609_v47 = vpack.c.bf16 %v1388_v63, %v1388_v63 }
 0x1ce   : > { %2290 = vrot.lane.b32.xlu0 %v4701_v60, %s5072_s19 }
 0x1cf   : > { %2546 = vrot.lane.b32.xlu1 %v4637_v48, %s5066_s24 }
 0x1d2   : > { %1772 = vrot.lane.b32.xlu0 %v5544_v46, %s5070_s12 }
 0x1d3   : > { %2803 = vrot.lane.b32.xlu1 %v4669_v11, %s5067_s25 }
 0x1d6   : > { %2029 = vrot.lane.b32.xlu0 %v4667_v2, %s5071_s18 }
 0x1d7   : > { %3060 = vrot.lane.b32.xlu1 %v4701_v60, %s5069_s27  ;;  %v4899_v60 = vpop.f32.mrf.mxu1 }
 0x1d8   : > { %v731_v51 = vmul.f32 %v4899_v60, %v5449_v41 }
 0x1d9   : > { %v655_v50 = vpop.f32.mrf.mxu1 }
 0x1da   : > { %2286 = vrot.lane.b32.xlu0 %v4699_v17, %s5072_s19 }
 0x1db   : > { %1260 = vrot.lane.b32.xlu1 %v4667_v2, %s5065_s23 }
 0x1de   : > { %1270 = vrot.lane.b32.xlu0 %v4577_v42, %s5065_s23 }
 0x1df   : > { %1517 = vrot.lane.b32.xlu1 %v4699_v17, %s5068_s26 }
 0x1e0   : > { %v1512_v5 = vpop.permute.xlu0 %1511 }
 0x1e1   : > { %v1255_v48 = vpop.permute.xlu1 %1254 }
 0x1e2   : > { %1348 = vst.msk [vmem:[#allocation3 + $0xc] sm:$0xf] %vm1344_vm3, %v1255_v48  ;;  %1527 = vrot.lane.b32.xlu0 %v4609_v47, %s5068_s26  ;;  %v729_v48 = vmul.f32 %v5449_v41, %v655_v50 }
 0x1e3   : > { %1605 = vst.msk [vmem:[#allocation3 + $0xc] sm:$0xf] %vm1601_vm5, %v1512_v5  ;;  %2542 = vrot.lane.b32.xlu1 %v5544_v46, %s5066_s24  ;;  %v770_v46 = vadd.f32 %v5454_v45, %v731_v51  ;;  %v4900_v5 = vpop.f32.mrf.mxu1 }
 0x1e4   : > { %v5682_v55 = vpop.permute.xlu0 %2536  ;;  %v768_v10 = vadd.f32 %v5454_v45, %v729_v48  ;;  %v732_v9 = vmul.f32 %v4900_v5, %v5449_v41 }
 0x1e5   : > { %v5680_v11 = vpop.permute.xlu1 %1766  ;;  %v658_v60 = vpop.f32.mrf.mxu1 }
 0x1e6   : > { %2552 = vrot.lane.b32.xlu0 %v5562_v32, %s5066_s24  ;;  %v800_v51 = vmax.f32 %v768_v10, 0.0  ;;  %v771_v50 = vadd.f32 %v5454_v45, %v732_v9  ;;  %v730_v4 = vmul.f32 %v5449_v41, %v658_v60  ;;  %v1386_v9 = vld [vmem:[#allocation2 + $0xb2] sm:$0xff] }
 0x1e7   : > { %2799 = vrot.lane.b32.xlu1 %v4667_v2, %s5067_s25  ;;  %v802_v2 = vmax.f32 %v770_v46, 0.0  ;;  %v4903_v60 = vpop.f32.mrf.mxu1 }
 0x1e8   : > { %v5690_v63 = vpop.permute.xlu0 %2793  ;;  %915 = vst.msk [vmem:[#allocation2 + $0x191] sm:$0xff] %vm812_vm0, %v800_v51  ;;  %v803_v46 = vmax.f32 %v771_v50, 0.0  ;;  %v769_v48 = vadd.f32 %v5454_v45, %v730_v4 }
 0x1e9   : > { %v5688_v26 = vpop.permute.xlu1 %2023  ;;  %917 = vst.msk [vmem:[#allocation2 + $0x1b1] sm:$0xff] %vm812_vm0, %v802_v2  ;;  %v4607_v2 = vpack.c.bf16 %v1386_v9, %v1386_v9 }
 0x1ea   : > { %2809 = vrot.lane.b32.xlu0 %v4577_v42, %s5067_s25  ;;  %918 = vst.msk [vmem:[#allocation2 + $0x1c1] sm:$0xff] %vm812_vm0, %v803_v46  ;;  %v801_v10 = vmax.f32 %v769_v48, 0.0 }
 0x1eb   : > { %3056 = vrot.lane.b32.xlu1 %v4699_v17, %s5069_s27  ;;  %v1129_v17 = vld [vmem:[#allocation2 + $0xb1] sm:$0xff] }
 0x1ec   : > { %v5700_v6 = vpop.permute.xlu0 %3050  ;;  %v4575_v1 = vpack.c.bf16 %v1129_v17, %v1129_v17  ;;  %916 = vst.msk [vmem:[#allocation2 + $0x1a1] sm:$0xff] %vm812_vm0, %v801_v10 }
 0x1ed   : > { %v5698_v7 = vpop.permute.xlu1 %2280 }
 0x1ee   : > { %3066 = vrot.lane.b32.xlu0 %v4609_v47, %s5069_s27 }
 0x1ef   : > { %1782 = vrot.lane.b32.xlu1 %v5562_v32, %s5070_s12  ;;  %v2425_v48 = vld [vmem:[#allocation2 + $0x190] sm:$0xff] }
 0x1f0   : > { %v1508_v3 = vpop.permute.xlu0 %1507  ;;  %v1656_v0 = vld [vmem:[#allocation2 + $0x1b0] sm:$0xff] }
 0x1f1   : > { %v1251_v5 = vpop.permute.xlu1 %1250 }
 0x1f2   : > { %1346 = vst.msk [vmem:[#allocation3 + $0x4] sm:$0xf] %vm1344_vm3, %v1251_v5  ;;  %1266 = vrot.lane.b32.xlu0 %v4575_v1, %s5065_s23  ;;  %v1902_v5 = vld [vmem:[#allocation2 + $0xe1] sm:$0xff] }
 0x1f3   : > { %1603 = vst.msk [vmem:[#allocation3 + $0x4] sm:$0xf] %vm1601_vm5, %v1508_v3  ;;  %2039 = vrot.lane.b32.xlu1 %v4577_v42, %s5071_s18  ;;  %v735_v3 = vmul.f32 %v4903_v60, %v5449_v41  ;;  %v671_v42 = vpop.f32.mrf.mxu1 }
 0x1f4   : > { %v1283_v4 = vpop.permute.xlu0 %1282  ;;  %v733_v46 = vmul.f32 %v5449_v41, %v671_v42 }
 0x1f5   : > { %v1763_v32 = vpop.permute.xlu1 %1762  ;;  %1362 = vst.msk [vmem:[#allocation3 + $0x44] sm:$0xf] %vm1344_vm3, %v1283_v4  ;;  %v774_v17 = vadd.f32 %v5454_v45, %v735_v3  ;;  %v4904_v10 = vpop.f32.mrf.mxu1  ;;  %v1655_v3 = vld [vmem:[#allocation2 + $0x1a0] sm:$0xff] }
 0x1f6   : > { %1859 = vst.msk [vmem:[#allocation3] sm:$0xf] %vm1858_vm7, %v1763_v32  ;;  %1523 = vrot.lane.b32.xlu0 %v4607_v2, %s5068_s26  ;;  %v772_v32 = vadd.f32 %v5454_v45, %v733_v46  ;;  %v736_v4 = vmul.f32 %v4904_v10, %v5449_v41  ;;  %v2159_v46 = vld [vmem:[#allocation2 + $0xe2] sm:$0xff]  ;;  %v5742_v10 = vpack.c.bf16 %v1655_v3, %v1655_v3 }
 0x1f7   : > { %2296 = vrot.lane.b32.xlu1 %v4609_v47, %s5072_s19  ;;  %v5725_v47 = vpack.c.bf16 %v2425_v48, %v2425_v48  ;;  %v806_v9 = vmax.f32 %v774_v17, 0.0  ;;  %v674_v60 = vpop.f32.mrf.mxu1  ;;  %v5755_v3 = vpack.c.bf16 %v2159_v46, %v2159_v46 }
 0x1f8   : > { %v1769_v50 = vpop.permute.xlu0 %1768  ;;  %v775_v48 = vadd.f32 %v5454_v45, %v736_v4  ;;  %v734_v17 = vmul.f32 %v5449_v41, %v674_v60  ;;  %1110 = vst.msk [vmem:[#allocation3 + $0x58] sm:$0xf] %vm1087_vm4, %v5742_v10 }
 0x1f9   : > { %v2020_v51 = vpop.permute.xlu1 %2019  ;;  %1862 = vst.msk [vmem:[#allocation3 + $0xc] sm:$0xf] %vm1858_vm7, %v1769_v50  ;;  %v5735_v50 = vpack.c.bf16 %v1902_v5, %v1902_v5 }
 0x1fa   : > { %2116 = vst.msk [vmem:[#allocation3] sm:$0xf] %vm2115_vm8, %v2020_v51  ;;  %1784 = vrot.lane.b32.xlu0 %v5575_v49, %s5070_s12  ;;  %v807_v5 = vmax.f32 %v775_v48, 0.0 }
 0x1fb   : > { %1778 = vrot.lane.b32.xlu1 %v5567_v38, %s5070_s12  ;;  %1109 = vst.msk [vmem:[#allocation3 + $0x54] sm:$0xf] %vm1087_vm4, %v5725_v47  ;;  %v804_v38 = vmax.f32 %v772_v32, 0.0  ;;  %v5749_v32 = vpack.c.bf16 %v1656_v0, %v1656_v0 }
 0x1fc   : > { %v2026_v51 = vpop.permute.xlu0 %2025  ;;  %921 = vst.msk [vmem:[#allocation2 + $0x211] sm:$0xff] %vm812_vm0, %v806_v9  ;;  %v773_v9 = vadd.f32 %v5454_v45, %v734_v17  ;;  %922 = vst.msk [vmem:[#allocation2 + $0x221] sm:$0xff] %vm812_vm0, %v807_v5 }
 0x1fd   : > { %v2277_v42 = vpop.permute.xlu1 %2276  ;;  %2119 = vst.msk [vmem:[#allocation3 + $0xc] sm:$0xf] %vm2115_vm8, %v2026_v51  ;;  %v1900_v51 = vld [vmem:[#allocation2 + $0xc1] sm:$0xff] }
 0x1fe   : > { %2373 = vst.msk [vmem:[#allocation3] sm:$0xf] %vm2372_vm9, %v2277_v42  ;;  %2041 = vrot.lane.b32.xlu0 %v5735_v50, %s5071_s18  ;;  %v5773_v5 = vpack.c.bf16 %v1900_v51, %v1900_v51 }
 0x1ff   : > { %2035 = vrot.lane.b32.xlu1 %v4575_v1, %s5071_s18  ;;  %919 = vst.msk [vmem:[#allocation2 + $0x1f1] sm:$0xff] %vm812_vm0, %v804_v38  ;;  %v805_v1 = vmax.f32 %v773_v9, 0.0  ;;  %v4907_v38 = vpop.f32.mrf.mxu1 }
 0x200   : > { %v2283_v60 = vpop.permute.xlu0 %2282  ;;  %1111 = vst.msk [vmem:[#allocation3 + $0x5c] sm:$0xf] %vm1087_vm4, %v5749_v32 }
 0x201   : > { %v5753_v4 = vpop.permute.xlu1 %2538  ;;  %2376 = vst.msk [vmem:[#allocation3 + $0xc] sm:$0xf] %vm2372_vm9, %v2283_v60  ;;  %v687_v48 = vpop.f32.mrf.mxu1 }
 0x202   : > { %2298 = vrot.lane.b32.xlu0 %v5755_v3, %s5072_s19  ;;  %920 = vst.msk [vmem:[#allocation2 + $0x201] sm:$0xff] %vm812_vm0, %v805_v1  ;;  %v737_v60 = vmul.f32 %v5449_v41, %v687_v48  ;;  %v2157_v1 = vld [vmem:[#allocation2 + $0xc2] sm:$0xff] }
 0x203   : > { %2292 = vrot.lane.b32.xlu1 %v4607_v2, %s5072_s19  ;;  %v739_v2 = vmul.f32 %v4907_v38, %v5449_v41  ;;  %v1661_v62 = vld [vmem:[#allocation2 + $0x220] sm:$0xff]  ;;  %v5787_v59 = vpack.c.bf16 %v2157_v1, %v2157_v1  ;;  %v1660_v15 = vld [vmem:[#allocation2 + $0x210] sm:$0xff] }
 0x204   : > { %v1765_v42 = vpop.permute.xlu0 %1764  ;;  %v776_v51 = vadd.f32 %v5454_v45, %v737_v60  ;;  %v5795_v21 = vpack.c.bf16 %v1661_v62, %v1661_v62 }
 0x205   : > { %v5765_v0 = vpop.permute.xlu1 %2795  ;;  %1860 = vst.msk [vmem:[#allocation3 + $0x4] sm:$0xf] %vm1858_vm7, %v1765_v42  ;;  %v778_v9 = vadd.f32 %v5454_v45, %v739_v2  ;;  %v1135_v2 = vld [vmem:[#allocation2 + $0x111] sm:$0xff] }
 0x206   : > { %1780 = vrot.lane.b32.xlu0 %v5581_v54, %s5070_s12  ;;  %v808_v58 = vmax.f32 %v776_v51, 0.0  ;;  %v1658_v19 = vld [vmem:[#allocation2 + $0x1f0] sm:$0xff]  ;;  %v5803_v1 = vpack.c.bf16 %v1135_v2, %v1135_v2  ;;  %1116 = vst.msk [vmem:[#allocation3 + $0x70] sm:$0xf] %vm1087_vm4, %v5795_v21 }
 0x207   : > { %2554 = vrot.lane.b32.xlu1 %v5575_v49, %s5066_s24  ;;  %v4908_v49 = vpop.f32.mrf.mxu1  ;;  %v810_v42 = vmax.f32 %v778_v9, 0.0  ;;  %v5807_v62 = vpack.c.bf16 %v1658_v19, %v1658_v19 }
 0x208   : > { %v2022_v46 = vpop.permute.xlu0 %2021  ;;  %v740_v38 = vmul.f32 %v4908_v49, %v5449_v41  ;;  %923 = vst.msk [vmem:[#allocation2 + $0x231] sm:$0xff] %vm812_vm0, %v808_v58 }
 0x209   : > { %v1257_v17 = vpop.permute.xlu1 %1256  ;;  %2117 = vst.msk [vmem:[#allocation3 + $0x4] sm:$0xf] %vm2115_vm8, %v2022_v46  ;;  %v690_v48 = vpop.f32.mrf.mxu1 }
 0x20a   : > { %1349 = vst.msk [vmem:[#allocation3 + $0x10] sm:$0xf] %vm1344_vm3, %v1257_v17  ;;  %2037 = vrot.lane.b32.xlu0 %v5773_v5, %s5071_s18  ;;  %v1659_v17 = vld [vmem:[#allocation2 + $0x200] sm:$0xff]  ;;  %v779_v9 = vadd.f32 %v5454_v45, %v740_v38  ;;  %v738_v60 = vmul.f32 %v5449_v41, %v690_v48 }
 0x20b   : > { %2811 = vrot.lane.b32.xlu1 %v5735_v50, %s5067_s25  ;;  %925 = vst.msk [vmem:[#allocation2 + $0x251] sm:$0xff] %vm812_vm0, %v810_v42  ;;  %v5793_v49 = vpack.c.bf16 %v1659_v17, %v1659_v17  ;;  %v1392_v42 = vld [vmem:[#allocation2 + $0x112] sm:$0xff] }
 0x20c   : > { %v2279_v61 = vpop.permute.xlu0 %2278  ;;  %v777_v41 = vadd.f32 %v5454_v45, %v738_v60  ;;  %1113 = vst.msk [vmem:[#allocation3 + $0x64] sm:$0xf] %vm1087_vm4, %v5807_v62 }
 0x20d   : > { %v5785_v46 = vpop.permute.xlu1 %3052  ;;  %2374 = vst.msk [vmem:[#allocation3 + $0x4] sm:$0xf] %vm2372_vm9, %v2279_v61  ;;  %v811_v61 = vmax.f32 %v779_v9, 0.0 }
 0x20e   : > { %2632 = vst.msk [vmem:[#allocation3 + $0x4] sm:$0xf] %vm2630_vm10, %v5682_v55  ;;  %2294 = vrot.lane.b32.xlu0 %v5787_v59, %s5072_s19  ;;  %v5811_v55 = vpack.c.bf16 %v1660_v15, %v1660_v15  ;;  %v809_v19 = vmax.f32 %v777_v41, 0.0  ;;  %v5830_v15 = vpack.c.bf16 %v1392_v42, %v1392_v42 }
 0x20f   : > { %1272 = vrot.lane.b32.xlu1 %v5735_v50, %s5065_s23  ;;  %2889 = vst.msk [vmem:[#allocation3 + $0x4] sm:$0xf] %vm2887_vm11, %v5690_v63  ;;  %v2433_v38 = vld [vmem:[#allocation2 + $0x230] sm:$0xff] }
 0x210   : > { %1114 = vst.msk [vmem:[#allocation3 + $0x68] sm:$0xf] %vm1087_vm4, %v5793_v49  ;;  %v1263_v50 = vpop.permute.xlu0 %1262  ;;  %1115 = vst.msk [vmem:[#allocation3 + $0x6c] sm:$0xf] %vm1087_vm4, %v5811_v55 }
 0x211   : > { %3146 = vst.msk [vmem:[#allocation3 + $0x4] sm:$0xf] %vm3144_vm12, %v5700_v6  ;;  %v1514_v58 = vpop.permute.xlu1 %1513 }
 0x212   : > { %926 = vst.msk [vmem:[#allocation2 + $0x261] sm:$0xff] %vm812_vm0, %v811_v61  ;;  %1278 = vrot.lane.b32.xlu0 %v5803_v1, %s5065_s23  ;;  %924 = vst.msk [vmem:[#allocation2 + $0x241] sm:$0xff] %vm812_vm0, %v809_v19  ;;  %v1664_v9 = vld [vmem:[#allocation2 + $0x250] sm:$0xff] }
 0x213   : > { %1606 = vst.msk [vmem:[#allocation3 + $0x10] sm:$0xf] %vm1601_vm5, %v1514_v58  ;;  %3068 = vrot.lane.b32.xlu1 %v5755_v3, %s5069_s27 }
 0x214   : > { %1352 = vst.msk [vmem:[#allocation3 + $0x1c] sm:$0xf] %vm1344_vm3, %v1263_v50  ;;  %v1520_v45 = vpop.permute.xlu0 %1519 }
 0x215   : > { %v1253_v6 = vpop.permute.xlu1 %1252  ;;  %1609 = vst.msk [vmem:[#allocation3 + $0x1c] sm:$0xf] %vm1601_vm5, %v1520_v45 }
 0x216   : > { %1347 = vst.msk [vmem:[#allocation3 + $0x8] sm:$0xf] %vm1344_vm3, %v1253_v6  ;;  %1535 = vrot.lane.b32.xlu0 %v5830_v15, %s5068_s26 }
 0x217   : > { %1529 = vrot.lane.b32.xlu1 %v5755_v3, %s5068_s26  ;;  %v5850_v3 = vpack.c.bf16 %v2433_v38, %v2433_v38 }
 0x218   : > { %v5839_v51 = vpop.permute.xlu0 %2544 }
 0x219   : > { %v1510_v63 = vpop.permute.xlu1 %1509  ;;  %v1663_v2 = vld [vmem:[#allocation2 + $0x240] sm:$0xff]  ;;  %1117 = vst.msk [vmem:[#allocation3 + $0x74] sm:$0xf] %vm1087_vm4, %v5850_v3 }
 0x21a   : > { %1604 = vst.msk [vmem:[#allocation3 + $0x8] sm:$0xf] %vm1601_vm5, %v1510_v63  ;;  %2560 = vrot.lane.b32.xlu0 %v5600_v53, %s5066_s24 }
 0x21b   : > { %1861 = vst.msk [vmem:[#allocation3 + $0x8] sm:$0xf] %vm1858_vm7, %v5680_v11  ;;  %1268 = vrot.lane.b32.xlu1 %v5773_v5, %s5065_s23  ;;  %v5856_v11 = vpack.c.bf16 %v1663_v2, %v1663_v2 }
 0x21c   : > { %2118 = vst.msk [vmem:[#allocation3 + $0x8] sm:$0xf] %vm2115_vm8, %v5688_v26  ;;  %v5854_v17 = vpop.permute.xlu0 %2801 }
 0x21d   : > { %2375 = vst.msk [vmem:[#allocation3 + $0x8] sm:$0xf] %vm2372_vm9, %v5698_v7  ;;  %v2535_v48 = vpop.permute.xlu1 %2534  ;;  %v5869_v7 = vpack.c.bf16 %v1664_v9, %v1664_v9 }
 0x21e   : > { %2633 = vst.msk [vmem:[#allocation3 + $0x8] sm:$0xf] %vm2630_vm10, %v5753_v4  ;;  %2631 = vst.msk [vmem:[#allocation3] sm:$0xf] %vm2630_vm10, %v2535_v48  ;;  %2817 = vrot.lane.b32.xlu0 %v5803_v1, %s5067_s25 }
 0x21f   : > { %2890 = vst.msk [vmem:[#allocation3 + $0x8] sm:$0xf] %vm2887_vm11, %v5765_v0  ;;  %1525 = vrot.lane.b32.xlu1 %v5787_v59, %s5068_s26 }
 0x220   : > { %1118 = vst.msk [vmem:[#allocation3 + $0x78] sm:$0xf] %vm1087_vm4, %v5856_v11  ;;  %v5875_v4 = vpop.permute.xlu0 %3058  ;;  %1119 = vst.msk [vmem:[#allocation3 + $0x7c] sm:$0xf] %vm1087_vm4, %v5869_v7 }
 0x221   : > { %3147 = vst.msk [vmem:[#allocation3 + $0x8] sm:$0xf] %vm3144_vm12, %v5785_v46  ;;  %v2792_v26 = vpop.permute.xlu1 %2791  ;;  %v2674_v46 = vld [vmem:[#allocation2 + $0xf1] sm:$0xff] }
 0x222   : > { %2888 = vst.msk [vmem:[#allocation3] sm:$0xf] %vm2887_vm11, %v2792_v26  ;;  %3074 = vrot.lane.b32.xlu0 %v5830_v15, %s5069_s27 }
 0x223   : > { %2550 = vrot.lane.b32.xlu1 %v5581_v54, %s5066_s24  ;;  %v4769_v54 = vpack.c.bf16 %v2674_v46, %v2674_v46 }
 0x224   : > { %v2541_v60 = vpop.permute.xlu0 %2540 }
 0x225   : > { %v3049_v0 = vpop.permute.xlu1 %3048  ;;  %2634 = vst.msk [vmem:[#allocation3 + $0xc] sm:$0xf] %vm2630_vm10, %v2541_v60  ;;  %v2163_v60 = vld [vmem:[#allocation2 + $0x122] sm:$0xff] }
 0x226   : > { %3145 = vst.msk [vmem:[#allocation3] sm:$0xf] %vm3144_vm12, %v3049_v0  ;;  %2556 = vrot.lane.b32.xlu0 %v5606_v57, %s5066_s24 }
 0x227   : > { %2807 = vrot.lane.b32.xlu1 %v5773_v5, %s5067_s25  ;;  %v2931_v5 = vld [vmem:[#allocation2 + $0xf2] sm:$0xff] }
 0x228   : > { %v2798_v41 = vpop.permute.xlu0 %2797  ;;  %v4801_v6 = vpack.c.bf16 %v2931_v5, %v2931_v5 }
 0x229   : > { %v5890_v61 = vpop.permute.xlu1 %1774  ;;  %2891 = vst.msk [vmem:[#allocation3 + $0xc] sm:$0xf] %vm2887_vm11, %v2798_v41 }
 0x22a   : > { %2813 = vrot.lane.b32.xlu0 %v4769_v54, %s5067_s25 }
 0x22b   : > { %3064 = vrot.lane.b32.xlu1 %v5787_v59, %s5069_s27 }
 0x22c   : > { %v1259_v58 = vpop.permute.xlu0 %1258 }
 0x22d   : > { %v5896_v42 = vpop.permute.xlu1 %2031  ;;  %v5020_v50 = vld [vmem:[#allocation3] sm:$0xff]   ;;  %1350 = vst.msk [vmem:[#allocation3 + $0x14] sm:$0xf] %vm1344_vm3, %v1259_v58  ;;  %v4709_v58 = vpack.c.bf16 %v2163_v60, %v2163_v60 }
 0x22e   : > { %1274 = vrot.lane.b32.xlu0 %v4769_v54, %s5065_s23  ;;  %4915 = vmatprep.mubr.msk.bf16.mxu1 %vm3309_vm13, %v5020_v50  ;;  %v1904_v50 = vld [vmem:[#allocation2 + $0x101] sm:$0xff] }
 0x22f   : > { %1790 = vrot.lane.b32.xlu1 %v5600_v53, %s5070_s12  ;;  %v1649_v53 = vld [vmem:[#allocation2 + $0x120] sm:$0xff] }
 0x230   : > { %v3055_v59 = vpop.permute.xlu0 %3054  ;;  %v4645_v48 = vpack.c.bf16 %v1649_v53, %v1649_v53 }
 0x231   : > { %v5903_v19 = vpop.permute.xlu1 %2288  ;;  %3148 = vst.msk [vmem:[#allocation3 + $0xc] sm:$0xf] %vm3144_vm12, %v3055_v59  ;;  %v4675_v59 = vpack.c.bf16 %v1904_v50, %v1904_v50 }
 0x232   : > { %3070 = vrot.lane.b32.xlu0 %v4801_v6, %s5069_s27 }
 0x233   : > { %2047 = vrot.lane.b32.xlu1 %v5803_v1, %s5071_s18  ;;  %v1906_v1 = vld [vmem:[#allocation2 + $0x121] sm:$0xff] }
 0x234   : > { %v1516_v63 = vpop.permute.xlu0 %1515  ;;  %v4677_v0 = vpack.c.bf16 %v1906_v1, %v1906_v1 }
 0x235   : > { %v1771_v45 = vpop.permute.xlu1 %1770  ;;  %1607 = vst.msk [vmem:[#allocation3 + $0x14] sm:$0xf] %vm1601_vm5, %v1516_v63  ;;  %v1139_v63 = vld [vmem:[#allocation2 + $0x171] sm:$0xff] }
 0x236   : > { %1863 = vst.msk [vmem:[#allocation3 + $0x10] sm:$0xf] %vm1858_vm7, %v1771_v45  ;;  %1531 = vrot.lane.b32.xlu0 %v4801_v6, %s5068_s26 }
 0x237   : > { %2304 = vrot.lane.b32.xlu1 %v5830_v15, %s5072_s19 }
 0x238   : > { %v1777_v2 = vpop.permute.xlu0 %1776  ;;  %v5023_v9 = vld [vmem:[#allocation3 + $0x8] sm:$0xff]  }
 0x239   : > { %v2028_v38 = vpop.permute.xlu1 %2027  ;;  %1866 = vst.msk [vmem:[#allocation3 + $0x1c] sm:$0xf] %vm1858_vm7, %v1777_v2  ;;  %4916 = vmatmul.mubr.msk.bf16.vlgmr.msra.gmra.mxu1 %vm3309_vm13, %v5023_v9  ;;  %v5950_v2 = vpack.c.bf16 %v1139_v63, %v1139_v63 }
 0x23a   : > { %2120 = vst.msk [vmem:[#allocation3 + $0x10] sm:$0xf] %vm2115_vm8, %v2028_v38  ;;  %1792 = vrot.lane.b32.xlu0 %v4645_v48, %s5070_s12 }
 0x23b   : > { %1786 = vrot.lane.b32.xlu1 %v5606_v57, %s5070_s12 }
 0x23c   : > { %v2034_v15 = vpop.permute.xlu0 %2033 }
 0x23d   : > { %v2285_v26 = vpop.permute.xlu1 %2284  ;;  %2123 = vst.msk [vmem:[#allocation3 + $0x1c] sm:$0xf] %vm2115_vm8, %v2034_v15  ;;  %v1653_v15 = vld [vmem:[#allocation2 + $0x180] sm:$0xff] }
 0x23e   : > { %2377 = vst.msk [vmem:[#allocation3 + $0x10] sm:$0xf] %vm2372_vm9, %v2285_v26  ;;  %2049 = vrot.lane.b32.xlu0 %v4677_v0, %s5071_s18 }
 0x23f   : > { %2043 = vrot.lane.b32.xlu1 %v4769_v54, %s5071_s18 }
 0x240   : > { %v2291_v41 = vpop.permute.xlu0 %2290 }
 0x241   : > { %v2547_v46 = vpop.permute.xlu1 %2546  ;;  %2380 = vst.msk [vmem:[#allocation3 + $0x1c] sm:$0xf] %vm2372_vm9, %v2291_v41  ;;  %v1393_v41 = vld [vmem:[#allocation2 + $0x142] sm:$0xff] }
 0x242   : > { %2638 = vst.msk [vmem:[#allocation3 + $0x1c] sm:$0xf] %vm2630_vm10, %v5643_v44  ;;  %2306 = vrot.lane.b32.xlu0 %v4709_v58, %s5072_s19 }
 0x243   : > { %2300 = vrot.lane.b32.xlu1 %v4801_v6, %s5072_s19  ;;  %2895 = vst.msk [vmem:[#allocation3 + $0x1c] sm:$0xf] %vm2887_vm11, %v5650_v16  ;;  %v2161_v6 = vld [vmem:[#allocation2 + $0x102] sm:$0xff] }
 0x244   : > { %3152 = vst.msk [vmem:[#allocation3 + $0x1c] sm:$0xf] %vm3144_vm12, %v5654_v52  ;;  %v1773_v54 = vpop.permute.xlu0 %1772  ;;  %v4707_v45 = vpack.c.bf16 %v2161_v6, %v2161_v6 }
 0x245   : > { %v2804_v57 = vpop.permute.xlu1 %2803  ;;  %1864 = vst.msk [vmem:[#allocation3 + $0x14] sm:$0xf] %vm1858_vm7, %v1773_v54 }
 0x246   : > { %1788 = vrot.lane.b32.xlu0 %v5610_v22, %s5070_s12 }
 0x247   : > { %2562 = vrot.lane.b32.xlu1 %v4645_v48, %s5066_s24  ;;  %v1394_v48 = vld [vmem:[#allocation2 + $0x152] sm:$0xff] }
 0x248   : > { %v2030_v5 = vpop.permute.xlu0 %2029 }
 0x249   : > { %v3061_v44 = vpop.permute.xlu1 %3060  ;;  %2121 = vst.msk [vmem:[#allocation3 + $0x14] sm:$0xf] %vm2115_vm8, %v2030_v5 }
 0x24a   : > { %2045 = vrot.lane.b32.xlu0 %v4675_v59, %s5071_s18 }
 0x24b   : > { %2819 = vrot.lane.b32.xlu1 %v4677_v0, %s5067_s25 }
 0x24c   : > { %v2287_v52 = vpop.permute.xlu0 %2286 }
 0x24d   : > { %v1261_v16 = vpop.permute.xlu1 %1260  ;;  %2378 = vst.msk [vmem:[#allocation3 + $0x14] sm:$0xf] %vm2372_vm9, %v2287_v52 }
 0x24e   : > { %1351 = vst.msk [vmem:[#allocation3 + $0x18] sm:$0xf] %vm1344_vm3, %v1261_v16  ;;  %2302 = vrot.lane.b32.xlu0 %v4707_v45, %s5072_s19 }
 0x24f   : > { %2636 = vst.msk [vmem:[#allocation3 + $0x14] sm:$0xf] %vm2630_vm10, %v5839_v51  ;;  %3076 = vrot.lane.b32.xlu1 %v4709_v58, %s5069_s27 }
 0x250   : > { %2893 = vst.msk [vmem:[#allocation3 + $0x14] sm:$0xf] %vm2887_vm11, %v5854_v17  ;;  %v1271_v38 = vpop.permute.xlu0 %1270 }
 0x251   : > { %3150 = vst.msk [vmem:[#allocation3 + $0x14] sm:$0xf] %vm3144_vm12, %v5875_v4  ;;  %v1518_v53 = vpop.permute.xlu1 %1517  ;;  %v5963_v4 = vpack.c.bf16 %v1394_v48, %v1394_v48  ;;  %v2167_v48 = vld [vmem:[#allocation2 + $0x182] sm:$0xff] }
 0x252   : > { %1608 = vst.msk [vmem:[#allocation3 + $0x18] sm:$0xf] %vm1601_vm5, %v1518_v53  ;;  %1286 = vrot.lane.b32.xlu0 %v5950_v2, %s5065_s23 }
 0x253   : > { %1356 = vst.msk [vmem:[#allocation3 + $0x2c] sm:$0xf] %vm1344_vm3, %v1271_v38  ;;  %1276 = vrot.lane.b32.xlu1 %v4675_v59, %s5065_s23 }
 0x254   : > { %1865 = vst.msk [vmem:[#allocation3 + $0x18] sm:$0xf] %vm1858_vm7, %v5890_v61  ;;  %v1528_v17 = vpop.permute.xlu0 %1527  ;;  %v1396_v61 = vld [vmem:[#allocation2 + $0x172] sm:$0xff] }
 0x255   : > { %2122 = vst.msk [vmem:[#allocation3 + $0x18] sm:$0xf] %vm2115_vm8, %v5896_v42  ;;  %v2543_v51 = vpop.permute.xlu1 %2542  ;;  %v5975_v9 = vpack.c.bf16 %v1396_v61, %v1396_v61  ;;  %v6024_v61 = vpack.c.bf16 %v2167_v48, %v2167_v48  ;;  %v1143_v48 = vld [vmem:[#allocation2 + $0x1b1] sm:$0xff] }
 0x256   : > { %2379 = vst.msk [vmem:[#allocation3 + $0x18] sm:$0xf] %vm2372_vm9, %v5903_v19  ;;  %1539 = vrot.lane.b32.xlu0 %v5963_v4, %s5068_s26 }
 0x257   : > { %2637 = vst.msk [vmem:[#allocation3 + $0x18] sm:$0xf] %vm2630_vm10, %v2547_v46  ;;  %2635 = vst.msk [vmem:[#allocation3 + $0x10] sm:$0xf] %vm2630_vm10, %v2543_v51  ;;  %1533 = vrot.lane.b32.xlu1 %v4707_v45, %s5068_s26  ;;  %v5992_v46 = vpack.c.bf16 %v1653_v15, %v1653_v15  ;;  %v1907_v15 = vld [vmem:[#allocation2 + $0x151] sm:$0xff] }
 0x258   : > { %1613 = vst.msk [vmem:[#allocation3 + $0x2c] sm:$0xf] %vm1601_vm5, %v1528_v17  ;;  %v5973_v19 = vpop.permute.xlu0 %2552 }
 0x259   : > { %2894 = vst.msk [vmem:[#allocation3 + $0x18] sm:$0xf] %vm2887_vm11, %v2804_v57  ;;  %v2800_v42 = vpop.permute.xlu1 %2799 }
 0x25a   : > { %3151 = vst.msk [vmem:[#allocation3 + $0x18] sm:$0xf] %vm3144_vm12, %v3061_v44  ;;  %1543 = vrot.lane.b32.xlu0 %v5975_v9, %s5068_s26  ;;  %v1910_v44 = vld [vmem:[#allocation2 + $0x181] sm:$0xff] }
 0x25b   : > { %2892 = vst.msk [vmem:[#allocation3 + $0x10] sm:$0xf] %vm2887_vm11, %v2800_v42  ;;  %2558 = vrot.lane.b32.xlu1 %v5610_v22, %s5066_s24  ;;  %v1138_v22 = vld [vmem:[#allocation2 + $0x161] sm:$0xff]  ;;  %v6010_v52 = vpack.c.bf16 %v1910_v44, %v1910_v44  ;;  %v2682_v44 = vld [vmem:[#allocation2 + $0x191] sm:$0xff] }
 0x25c   : > { %v5982_v26 = vpop.permute.xlu0 %2809  ;;  %v5999_v54 = vpack.c.bf16 %v1138_v22, %v1138_v22 }
 0x25d   : > { %v3057_v1 = vpop.permute.xlu1 %3056 }
 0x25e   : > { %3149 = vst.msk [vmem:[#allocation3 + $0x10] sm:$0xf] %vm3144_vm12, %v3057_v1  ;;  %1796 = vrot.lane.b32.xlu0 %v5510_v43, %s5070_s12 }
 0x25f   : > { %2815 = vrot.lane.b32.xlu1 %v4675_v59, %s5067_s25  ;;  %v4614_v59 = vpack.c.bf16 %v1393_v41, %v1393_v41 }
 0x260   : > { %v5990_v60 = vpop.permute.xlu0 %3066 }
 0x261   : > { %v5988_v0 = vpop.permute.xlu1 %1782  ;;  %v5025_v5 = vld [vmem:[#allocation3 + $0x18] sm:$0xff]  }
 0x262   : > { %1800 = vrot.lane.b32.xlu0 %v5992_v46, %s5070_s12 }
 0x263   : > { %3072 = vrot.lane.b32.xlu1 %v4707_v45, %s5069_s27  ;;  %v1395_v45 = vld [vmem:[#allocation2 + $0x162] sm:$0xff] }
 0x264   : > { %v1267_v57 = vpop.permute.xlu0 %1266  ;;  %v6016_v38 = vpack.c.bf16 %v1395_v45, %v1395_v45  ;;  %v2939_v45 = vld [vmem:[#allocation2 + $0x192] sm:$0xff] }
 0x265   : > { %v5997_v58 = vpop.permute.xlu1 %2039  ;;  %v5024_v50 = vld [vmem:[#allocation3 + $0x10] sm:$0xff]   ;;  %1354 = vst.msk [vmem:[#allocation3 + $0x24] sm:$0xf] %vm1344_vm3, %v1267_v57  ;;  %v4678_v57 = vpack.c.bf16 %v1907_v15, %v1907_v15 }
 0x266   : > { %2053 = vrot.lane.b32.xlu0 %v5999_v54, %s5071_s18  ;;  %4919 = vmatprep.mubr.msk.bf16.mxu1 %vm3309_vm13, %v5024_v50 }
 0x267   : > { %1284 = vrot.lane.b32.xlu1 %v5999_v54, %s5065_s23  ;;  %4920 = vmatmul.mubr.msk.bf16.gmra.mxu1 %vm3309_vm13, %v5025_v5 }
 0x268   : > { %v1524_v16 = vpop.permute.xlu0 %1523 }
 0x269   : > { %v6007_v6 = vpop.permute.xlu1 %2296  ;;  %1611 = vst.msk [vmem:[#allocation3 + $0x24] sm:$0xf] %vm1601_vm5, %v1524_v16 }
 0x26a   : > { %2057 = vrot.lane.b32.xlu0 %v6010_v52, %s5071_s18 }
 0x26b   : > { %1537 = vrot.lane.b32.xlu1 %v4614_v59, %s5068_s26  ;;  %v6047_v59 = vpack.c.bf16 %v2682_v44, %v2682_v44 }
 0x26c   : > { %v1785_v53 = vpop.permute.xlu0 %1784 }
 0x26d   : > { %v1779_v63 = vpop.permute.xlu1 %1778  ;;  %1870 = vst.msk [vmem:[#allocation3 + $0x2c] sm:$0xf] %vm1858_vm7, %v1785_v53  ;;  %v6079_v53 = vpack.c.bf16 %v2939_v45, %v2939_v45 }
 0x26e   : > { %1867 = vst.msk [vmem:[#allocation3 + $0x20] sm:$0xf] %vm1858_vm7, %v1779_v63  ;;  %2310 = vrot.lane.b32.xlu0 %v6016_v38, %s5072_s19 }
 0x26f   : > { %1541 = vrot.lane.b32.xlu1 %v6016_v38, %s5068_s26 }
 0x270   : > { %v2042_v17 = vpop.permute.xlu0 %2041 }
 0x271   : > { %v2036_v51 = vpop.permute.xlu1 %2035  ;;  %2127 = vst.msk [vmem:[#allocation3 + $0x2c] sm:$0xf] %vm2115_vm8, %v2042_v17 }
 0x272   : > { %2124 = vst.msk [vmem:[#allocation3 + $0x20] sm:$0xf] %vm2115_vm8, %v2036_v51  ;;  %2314 = vrot.lane.b32.xlu0 %v6024_v61, %s5072_s19 }
 0x273   : > { %1794 = vrot.lane.b32.xlu1 %v5490_v8, %s5070_s12 }
 0x274   : > { %v2299_v1 = vpop.permute.xlu0 %2298 }
 0x275   : > { %v2293_v42 = vpop.permute.xlu1 %2292  ;;  %2384 = vst.msk [vmem:[#allocation3 + $0x2c] sm:$0xf] %vm2372_vm9, %v2299_v1 }
 0x276   : > { %2381 = vst.msk [vmem:[#allocation3 + $0x20] sm:$0xf] %vm2372_vm9, %v2293_v42  ;;  %2568 = vrot.lane.b32.xlu0 %v5482_v56, %s5066_s24 }
 0x277   : > { %1798 = vrot.lane.b32.xlu1 %v5482_v56, %s5070_s12 }
 0x278   : > { %v1781_v41 = vpop.permute.xlu0 %1780 }
 0x279   : > { %v2555_v22 = vpop.permute.xlu1 %2554  ;;  %1868 = vst.msk [vmem:[#allocation3 + $0x24] sm:$0xf] %vm1858_vm7, %v1781_v41 }
 0x27a   : > { %2572 = vrot.lane.b32.xlu0 %v5725_v47, %s5066_s24 }
 0x27b   : > { %2051 = vrot.lane.b32.xlu1 %v4678_v57, %s5071_s18 }
 0x27c   : > { %v2038_v50 = vpop.permute.xlu0 %2037 }
 0x27d   : > { %v2812_v8 = vpop.permute.xlu1 %2811  ;;  %2125 = vst.msk [vmem:[#allocation3 + $0x24] sm:$0xf] %vm2115_vm8, %v2038_v50 }
 0x27e   : > { %2825 = vrot.lane.b32.xlu0 %v5950_v2, %s5067_s25 }
 0x27f   : > { %2055 = vrot.lane.b32.xlu1 %v5950_v2, %s5071_s18 }
 0x280   : > { %v2295_v5 = vpop.permute.xlu0 %2294 }
 0x281   : > { %v1273_v56 = vpop.permute.xlu1 %1272  ;;  %2382 = vst.msk [vmem:[#allocation3 + $0x24] sm:$0xf] %vm2372_vm9, %v2295_v5  ;;  %v1914_v5 = vld [vmem:[#allocation2 + $0x1c1] sm:$0xff] }
 0x282   : > { %1357 = vst.msk [vmem:[#allocation3 + $0x30] sm:$0xf] %vm1344_vm3, %v1273_v56  ;;  %2829 = vrot.lane.b32.xlu0 %v6047_v59, %s5067_s25 }
 0x283   : > { %2640 = vst.msk [vmem:[#allocation3 + $0x24] sm:$0xf] %vm2630_vm10, %v5973_v19  ;;  %2308 = vrot.lane.b32.xlu1 %v5963_v4, %s5072_s19  ;;  %v3649_v4 = vld [vmem:[%s6743_s3] sm:$0x3] }
 0x284   : > { %2897 = vst.msk [vmem:[#allocation3 + $0x24] sm:$0xf] %vm2887_vm11, %v5982_v26  ;;  %v1279_v16 = vpop.permute.xlu0 %1278  ;;  %4984 = vmatprep.subr.msk.bf16.mxu0 %vm3358_vm6, %v3649_v4  ;;  %v3699_v19 = vsel %vm3358_vm6, %v3649_v4, 0  ;;  %v6146_v4 = vpack.c.bf16 %v1914_v5, %v1914_v5 }
 0x285   : > { %3154 = vst.msk [vmem:[#allocation3 + $0x24] sm:$0xf] %vm3144_vm12, %v5990_v60  ;;  %v3069_v2 = vpop.permute.xlu1 %3068  ;;  %4948 = vmatpush3.bf16.msra.mxu0 %v3699_v19  ;;  %v1399_v19 = vld [vmem:[#allocation2 + $0x1a2] sm:$0xff] }
 0x286   : > { %1360 = vst.msk [vmem:[#allocation3 + $0x3c] sm:$0xf] %vm1344_vm3, %v1279_v16  ;;  %3082 = vrot.lane.b32.xlu0 %v5975_v9, %s5069_s27  ;;  %v6153_v45 = vpack.c.bf16 %v1399_v19, %v1399_v19  ;;  %v1402_v19 = vld [vmem:[#allocation2 + $0x1f2] sm:$0xff] }
 0x287   : > { %2312 = vrot.lane.b32.xlu1 %v5975_v9, %s5072_s19 }
 0x288   : > { %v1536_v60 = vpop.permute.xlu0 %1535 }
 0x289   : > { %v1530_v26 = vpop.permute.xlu1 %1529  ;;  %1617 = vst.msk [vmem:[#allocation3 + $0x3c] sm:$0xf] %vm1601_vm5, %v1536_v60 }
 0x28a   : > { %1614 = vst.msk [vmem:[#allocation3 + $0x30] sm:$0xf] %vm1601_vm5, %v1530_v26  ;;  %1290 = vrot.lane.b32.xlu0 %v6047_v59, %s5065_s23 }
 0x28b   : > { %2566 = vrot.lane.b32.xlu1 %v5510_v43, %s5066_s24  ;;  %v6088_v43 = vpack.c.bf16 %v1143_v48, %v1143_v48  ;;  %v2171_v48 = vld [vmem:[#allocation2 + $0x1c2] sm:$0xff] }
 0x28c   : > { %v6077_v63 = vpop.permute.xlu0 %2560 }
 0x28d   : > { %v1269_v9 = vpop.permute.xlu1 %1268 }
 0x28e   : > { %1355 = vst.msk [vmem:[#allocation3 + $0x28] sm:$0xf] %vm1344_vm3, %v1269_v9  ;;  %3086 = vrot.lane.b32.xlu0 %v6079_v53, %s5069_s27 }
 0x28f   : > { %2570 = vrot.lane.b32.xlu1 %v5992_v46, %s5066_s24 }
 0x290   : > { %v6086_v17 = vpop.permute.xlu0 %2817 }
 0x291   : > { %v1526_v51 = vpop.permute.xlu1 %1525 }
 0x292   : > { %1612 = vst.msk [vmem:[#allocation3 + $0x28] sm:$0xf] %vm1601_vm5, %v1526_v51  ;;  %1294 = vrot.lane.b32.xlu0 %v6088_v43, %s5065_s23 }
 0x293   : > { %1869 = vst.msk [vmem:[#allocation3 + $0x28] sm:$0xf] %vm1858_vm7, %v5988_v0  ;;  %2823 = vrot.lane.b32.xlu1 %v5999_v54, %s5067_s25  ;;  %v1400_v0 = vld [vmem:[#allocation2 + $0x1b2] sm:$0xff] }
 0x294   : > { %2126 = vst.msk [vmem:[#allocation3 + $0x28] sm:$0xf] %vm2115_vm8, %v5997_v58  ;;  %v6101_v42 = vpop.permute.xlu0 %3074 }
 0x295   : > { %2383 = vst.msk [vmem:[#allocation3 + $0x28] sm:$0xf] %vm2372_vm9, %v6007_v6  ;;  %v2551_v46 = vpop.permute.xlu1 %2550  ;;  %v6111_v6 = vpack.c.bf16 %v1400_v0, %v1400_v0  ;;  %v2429_v0 = vld [vmem:[#allocation2 + $0x1d0] sm:$0xff] }
 0x296   : > { %2641 = vst.msk [vmem:[#allocation3 + $0x28] sm:$0xf] %vm2630_vm10, %v2555_v22  ;;  %2639 = vst.msk [vmem:[#allocation3 + $0x20] sm:$0xf] %vm2630_vm10, %v2551_v46  ;;  %1547 = vrot.lane.b32.xlu0 %v6079_v53, %s5068_s26  ;;  %v1657_v22 = vld [vmem:[#allocation2 + $0x1c0] sm:$0xff]  ;;  %v6162_v46 = vpack.c.bf16 %v2171_v48, %v2171_v48 }
 0x297   : > { %2898 = vst.msk [vmem:[#allocation3 + $0x28] sm:$0xf] %vm2887_vm11, %v2812_v8  ;;  %2827 = vrot.lane.b32.xlu1 %v6010_v52, %s5067_s25  ;;  %v1142_v8 = vld [vmem:[#allocation2 + $0x1a1] sm:$0xff] }
 0x298   : > { %3155 = vst.msk [vmem:[#allocation3 + $0x28] sm:$0xf] %vm3144_vm12, %v3069_v2  ;;  %v2557_v54 = vpop.permute.xlu0 %2556  ;;  %v6136_v44 = vpack.c.bf16 %v1142_v8, %v1142_v8  ;;  %v1145_v8 = vld [vmem:[#allocation2 + $0x1f1] sm:$0xff]  ;;  %v1144_v48 = vld [vmem:[#allocation2 + $0x1e1] sm:$0xff] }
 0x299   : > { %v2808_v58 = vpop.permute.xlu1 %2807  ;;  %2642 = vst.msk [vmem:[#allocation3 + $0x2c] sm:$0xf] %vm2630_vm10, %v2557_v54 }
 0x29a   : > { %2896 = vst.msk [vmem:[#allocation3 + $0x20] sm:$0xf] %vm2887_vm11, %v2808_v58  ;;  %1551 = vrot.lane.b32.xlu0 %v6111_v6, %s5068_s26 }
 0x29b   : > { %3080 = vrot.lane.b32.xlu1 %v6016_v38, %s5069_s27  ;;  %v6127_v38 = vpack.c.bf16 %v1657_v22, %v1657_v22 }
 0x29c   : > { %v2814_v15 = vpop.permute.xlu0 %2813 }
 0x29d   : > { %v3065_v1 = vpop.permute.xlu1 %3064  ;;  %2899 = vst.msk [vmem:[#allocation3 + $0x2c] sm:$0xf] %vm2887_vm11, %v2814_v15 }
 0x29e   : > { %3153 = vst.msk [vmem:[#allocation3 + $0x20] sm:$0xf] %vm3144_vm12, %v3065_v1  ;;  %1804 = vrot.lane.b32.xlu0 %v5742_v10, %s5070_s12 }
 0x29f   : > { %1288 = vrot.lane.b32.xlu1 %v6010_v52, %s5065_s23 }
 0x2a0   : > { %v1275_v57 = vpop.permute.xlu0 %1274 }
 0x2a1   : > { %v6125_v41 = vpop.permute.xlu1 %1790  ;;  %1358 = vst.msk [vmem:[#allocation3 + $0x34] sm:$0xf] %vm1344_vm3, %v1275_v57 }
 0x2a2   : > { %1808 = vrot.lane.b32.xlu0 %v6127_v38, %s5070_s12 }
 0x2a3   : > { %3084 = vrot.lane.b32.xlu1 %v6024_v61, %s5069_s27 }
 0x2a4   : > { %v3071_v52 = vpop.permute.xlu0 %3070 }
 0x2a5   : > { %v6134_v50 = vpop.permute.xlu1 %2047  ;;  %v5026_v56 = vld [vmem:[#allocation3 + $0x20] sm:$0xff]   ;;  %3156 = vst.msk [vmem:[#allocation3 + $0x2c] sm:$0xf] %vm3144_vm12, %v3071_v52 }
 0x2a6   : > { %2061 = vrot.lane.b32.xlu0 %v6136_v44, %s5071_s18  ;;  %4923 = vmatprep.mubr.msk.bf16.mxu1 %vm3309_vm13, %v5026_v56 }
 0x2a7   : > { %1292 = vrot.lane.b32.xlu1 %v6136_v44, %s5065_s23 }
 0x2a8   : > { %v1532_v16 = vpop.permute.xlu0 %1531 }
 0x2a9   : > { %v6144_v2 = vpop.permute.xlu1 %2304  ;;  %1615 = vst.msk [vmem:[#allocation3 + $0x34] sm:$0xf] %vm1601_vm5, %v1532_v16 }
 0x2aa   : > { %2065 = vrot.lane.b32.xlu0 %v6146_v4, %s5071_s18 }
 0x2ab   : > { %1545 = vrot.lane.b32.xlu1 %v6024_v61, %s5068_s26 }
 0x2ac   : > { %v1793_v60 = vpop.permute.xlu0 %1792  ;;  %v5027_v9 = vld [vmem:[#allocation3 + $0x28] sm:$0xff]  }
 0x2ad   : > { %v1787_v26 = vpop.permute.xlu1 %1786  ;;  %1874 = vst.msk [vmem:[#allocation3 + $0x3c] sm:$0xf] %vm1858_vm7, %v1793_v60  ;;  %4924 = vmatmul.mubr.msk.bf16.gmra.mxu1 %vm3309_vm13, %v5027_v9  ;;  %v6238_v60 = vpack.c.bf16 %v1402_v19, %v1402_v19  ;;  %v1404_v9 = vld [vmem:[#allocation2 + $0x212] sm:$0xff]  ;;  %v6313_v19 = vld [vmem:[%s6746_s6] ss:$0 sm:$0xff] }
 0x2ae   : > { %1871 = vst.msk [vmem:[#allocation3 + $0x30] sm:$0xf] %vm1858_vm7, %v1787_v26  ;;  %2318 = vrot.lane.b32.xlu0 %v6153_v45, %s5072_s19 }
 0x2af   : > { %1549 = vrot.lane.b32.xlu1 %v6153_v45, %s5068_s26 }
 0x2b0   : > { %v2050_v51 = vpop.permute.xlu0 %2049 }
 0x2b1   : > { %v2044_v61 = vpop.permute.xlu1 %2043  ;;  %2131 = vst.msk [vmem:[#allocation3 + $0x3c] sm:$0xf] %vm2115_vm8, %v2050_v51  ;;  %v6246_v51 = vpack.c.bf16 %v1404_v9, %v1404_v9  ;;  %v2690_v9 = vld [vmem:[#allocation2 + $0x231] sm:$0xff] }
 0x2b2   : > { %2128 = vst.msk [vmem:[#allocation3 + $0x30] sm:$0xf] %vm2115_vm8, %v2044_v61  ;;  %2322 = vrot.lane.b32.xlu0 %v6162_v46, %s5072_s19 }
 0x2b3   : > { %1802 = vrot.lane.b32.xlu1 %v5725_v47, %s5070_s12  ;;  %v4749_v47 = vpack.c.bf16 %v2429_v0, %v2429_v0  ;;  %v4590_v0 = vpack.c.bf16 %v1144_v48, %v1144_v48 }
 0x2b4   : > { %v2307_v54 = vpop.permute.xlu0 %2306 }
 0x2b5   : > { %v2301_v58 = vpop.permute.xlu1 %2300  ;;  %2388 = vst.msk [vmem:[#allocation3 + $0x3c] sm:$0xf] %vm2372_vm9, %v2307_v54 }
 0x2b6   : > { %2385 = vst.msk [vmem:[#allocation3 + $0x30] sm:$0xf] %vm2372_vm9, %v2301_v58  ;;  %2576 = vrot.lane.b32.xlu0 %v5749_v32, %s5066_s24 }
 0x2b7   : > { %2646 = vst.msk [vmem:[#allocation3 + $0x3c] sm:$0xf] %vm2630_vm10, %v5660_v29  ;;  %1806 = vrot.lane.b32.xlu1 %v5749_v32, %s5070_s12  ;;  %v2686_v29 = vld [vmem:[#allocation2 + $0x1d1] sm:$0xff] }
 0x2b8   : > { %2903 = vst.msk [vmem:[#allocation3 + $0x3c] sm:$0xf] %vm2887_vm11, %v5665_v23  ;;  %v1789_v15 = vpop.permute.xlu0 %1788  ;;  %v4781_v23 = vpack.c.bf16 %v2686_v29, %v2686_v29  ;;  %v1401_v29 = vld [vmem:[#allocation2 + $0x1e2] sm:$0xff] }
 0x2b9   : > { %3160 = vst.msk [vmem:[#allocation3 + $0x3c] sm:$0xf] %vm3144_vm12, %v5671_v35  ;;  %v2563_v1 = vpop.permute.xlu1 %2562 }
 0x2ba   : > { %1872 = vst.msk [vmem:[#allocation3 + $0x34] sm:$0xf] %vm1858_vm7, %v1789_v15  ;;  %2580 = vrot.lane.b32.xlu0 %v4749_v47, %s5066_s24  ;;  %v1146_v15 = vld [vmem:[#allocation2 + $0x201] sm:$0xff] }
 0x2bb   : > { %2059 = vrot.lane.b32.xlu1 %v6047_v59, %s5071_s18 }
 0x2bc   : > { %v2046_v57 = vpop.permute.xlu0 %2045 }
 0x2bd   : > { %v2820_v22 = vpop.permute.xlu1 %2819  ;;  %2129 = vst.msk [vmem:[#allocation3 + $0x34] sm:$0xf] %vm2115_vm8, %v2046_v57 }
 0x2be   : > { %2833 = vrot.lane.b32.xlu0 %v6088_v43, %s5067_s25 }
 0x2bf   : > { %2063 = vrot.lane.b32.xlu1 %v6088_v43, %s5071_s18 }
 0x2c0   : > { %v2303_v32 = vpop.permute.xlu0 %2302 }
 0x2c1   : > { %v3077_v35 = vpop.permute.xlu1 %3076  ;;  %2386 = vst.msk [vmem:[#allocation3 + $0x34] sm:$0xf] %vm2372_vm9, %v2303_v32 }
 0x2c2   : > { %2644 = vst.msk [vmem:[#allocation3 + $0x34] sm:$0xf] %vm2630_vm10, %v6077_v63  ;;  %2837 = vrot.lane.b32.xlu0 %v4781_v23, %s5067_s25  ;;  %v2943_v63 = vld [vmem:[#allocation2 + $0x1d2] sm:$0xff]  ;;  %v6267_v23 = vpack.c.bf16 %v1146_v15, %v1146_v15 }
 0x2c3   : > { %2316 = vrot.lane.b32.xlu1 %v6079_v53, %s5072_s19  ;;  %2901 = vst.msk [vmem:[#allocation3 + $0x34] sm:$0xf] %vm2887_vm11, %v6086_v17  ;;  %v6207_v17 = vpack.c.bf16 %v1145_v8, %v1145_v8  ;;  %v1403_v8 = vld [vmem:[#allocation2 + $0x202] sm:$0xff] }
 0x2c4   : > { %3158 = vst.msk [vmem:[#allocation3 + $0x34] sm:$0xf] %vm3144_vm12, %v6101_v42  ;;  %v1287_v43 = vpop.permute.xlu0 %1286  ;;  %v4813_v42 = vpack.c.bf16 %v2943_v63, %v2943_v63 }
 0x2c5   : > { %v1277_v59 = vpop.permute.xlu1 %1276  ;;  %1364 = vst.msk [vmem:[#allocation3 + $0x4c] sm:$0xf] %vm1344_vm3, %v1287_v43 }
 0x2c6   : > { %1359 = vst.msk [vmem:[#allocation3 + $0x38] sm:$0xf] %vm1344_vm3, %v1277_v59  ;;  %3090 = vrot.lane.b32.xlu0 %v6111_v6, %s5069_s27 }
 0x2c7   : > { %2320 = vrot.lane.b32.xlu1 %v6111_v6, %s5072_s19 }
 0x2c8   : > { %v1540_v52 = vpop.permute.xlu0 %1539 }
 0x2c9   : > { %v1534_v53 = vpop.permute.xlu1 %1533  ;;  %1619 = vst.msk [vmem:[#allocation3 + $0x44] sm:$0xf] %vm1601_vm5, %v1540_v52  ;;  %v6282_v52 = vpack.c.bf16 %v1403_v8, %v1403_v8 }
 0x2ca   : > { %1616 = vst.msk [vmem:[#allocation3 + $0x38] sm:$0xf] %vm1601_vm5, %v1534_v53  ;;  %1298 = vrot.lane.b32.xlu0 %v6207_v17, %s5065_s23 }
 0x2cb   : > { %1873 = vst.msk [vmem:[#allocation3 + $0x38] sm:$0xf] %vm1858_vm7, %v6125_v41  ;;  %2574 = vrot.lane.b32.xlu1 %v5742_v10, %s5066_s24  ;;  %v1147_v41 = vld [vmem:[#allocation2 + $0x211] sm:$0xff]  ;;  %v951_v10 = vld [vmem:[#allocation2 + $0x1e0] sm:$0xff] }
 0x2cc   : > { %2130 = vst.msk [vmem:[#allocation3 + $0x38] sm:$0xf] %vm2115_vm8, %v6134_v50  ;;  %v1544_v56 = vpop.permute.xlu0 %1543  ;;  %v4558_v50 = vpack.c.bf16 %v951_v10, %v951_v10  ;;  %v6229_v16 = vpack.c.bf16 %v1147_v41, %v1147_v41 }
 0x2cd   : > { %2387 = vst.msk [vmem:[#allocation3 + $0x38] sm:$0xf] %vm2372_vm9, %v6144_v2  ;;  %v2559_v6 = vpop.permute.xlu1 %2558 }
 0x2ce   : > { %2645 = vst.msk [vmem:[#allocation3 + $0x38] sm:$0xf] %vm2630_vm10, %v2563_v1  ;;  %2643 = vst.msk [vmem:[#allocation3 + $0x30] sm:$0xf] %vm2630_vm10, %v2559_v6  ;;  %3094 = vrot.lane.b32.xlu0 %v4813_v42, %s5069_s27  ;;  %v2175_v42 = vld [vmem:[#allocation2 + $0x222] sm:$0xff] }
 0x2cf   : > { %1621 = vst.msk [vmem:[#allocation3 + $0x4c] sm:$0xf] %vm1601_vm5, %v1544_v56  ;;  %2578 = vrot.lane.b32.xlu1 %v6127_v38, %s5066_s24  ;;  %v6290_v41 = vpack.c.bf16 %v2175_v42, %v2175_v42  ;;  %v2947_v42 = vld [vmem:[#allocation2 + $0x232] sm:$0xff] }
 0x2d0   : > { %2902 = vst.msk [vmem:[#allocation3 + $0x38] sm:$0xf] %vm2887_vm11, %v2820_v22  ;;  %v1797_v2 = vpop.permute.xlu0 %1796 }
 0x2d1   : > { %3159 = vst.msk [vmem:[#allocation3 + $0x38] sm:$0xf] %vm3144_vm12, %v3077_v35  ;;  %v2816_v5 = vpop.permute.xlu1 %2815  ;;  %v1918_v35 = vld [vmem:[#allocation2 + $0x221] sm:$0xff] }
 0x2d2   : > { %2900 = vst.msk [vmem:[#allocation3 + $0x30] sm:$0xf] %vm2887_vm11, %v2816_v5  ;;  %1302 = vrot.lane.b32.xlu0 %v6229_v16, %s5065_s23  ;;  %v6275_v43 = vpack.c.bf16 %v1918_v35, %v1918_v35 }
 0x2d3   : > { %1876 = vst.msk [vmem:[#allocation3 + $0x44] sm:$0xf] %vm1858_vm7, %v1797_v2  ;;  %2831 = vrot.lane.b32.xlu1 %v6136_v44, %s5067_s25 }
 0x2d4   : > { %1112 = vst.msk [vmem:[#allocation3 + $0x60] sm:$0xf] %vm1087_vm4, %v4558_v50  ;;  %v1801_v26 = vpop.permute.xlu0 %1800 }
 0x2d5   : > { %v3073_v38 = vpop.permute.xlu1 %3072  ;;  %1878 = vst.msk [vmem:[#allocation3 + $0x4c] sm:$0xf] %vm1858_vm7, %v1801_v26 }
 0x2d6   : > { %3157 = vst.msk [vmem:[#allocation3 + $0x30] sm:$0xf] %vm3144_vm12, %v3073_v38  ;;  %1555 = vrot.lane.b32.xlu0 %v6238_v60, %s5068_s26 }
 0x2d7   : > { %2835 = vrot.lane.b32.xlu1 %v6146_v4, %s5067_s25 }
 0x2d8   : > { %v2054_v61 = vpop.permute.xlu0 %2053  ;;  %v5029_v47 = vld [vmem:[#allocation3 + $0x38] sm:$0xff]  }
 0x2d9   : > { %v1285_v44 = vpop.permute.xlu1 %1284  ;;  %2133 = vst.msk [vmem:[#allocation3 + $0x44] sm:$0xf] %vm2115_vm8, %v2054_v61  ;;  %v6326_v61 = vld [vmem:[%s6747_s7] ss:$0 sm:$0xff] }
 0x2da   : > { %1363 = vst.msk [vmem:[#allocation3 + $0x48] sm:$0xf] %vm1344_vm3, %v1285_v44  ;;  %1559 = vrot.lane.b32.xlu0 %v6246_v51, %s5068_s26 }
 0x2db   : > { %3088 = vrot.lane.b32.xlu1 %v6153_v45, %s5069_s27 }
 0x2dc   : > { %v2058_v58 = vpop.permute.xlu0 %2057 }
 0x2dd   : > { %v1538_v4 = vpop.permute.xlu1 %1537  ;;  %v5028_v54 = vld [vmem:[#allocation3 + $0x30] sm:$0xff]   ;;  %2135 = vst.msk [vmem:[#allocation3 + $0x4c] sm:$0xf] %vm2115_vm8, %v2058_v58 }
 0x2de   : > { %1618 = vst.msk [vmem:[#allocation3 + $0x40] sm:$0xf] %vm1601_vm5, %v1538_v4  ;;  %1812 = vrot.lane.b32.xlu0 %v5793_v49, %s5070_s12  ;;  %4927 = vmatprep.mubr.msk.bf16.mxu1 %vm3309_vm13, %v5028_v54  ;;  %v6329_v54 = vpack.c.bf16 %v2690_v9, %v2690_v9 }
 0x2df   : > { %1296 = vrot.lane.b32.xlu1 %v4590_v0, %s5065_s23  ;;  %4928 = vmatmul.mubr.msk.bf16.gmra.mxu1 %vm3309_vm13, %v5029_v47 }
 0x2e0   : > { %v2311_v1 = vpop.permute.xlu0 %2310 }
 0x2e1   : > { %v1542_v45 = vpop.permute.xlu1 %1541  ;;  %2390 = vst.msk [vmem:[#allocation3 + $0x44] sm:$0xf] %vm2372_vm9, %v2311_v1 }
 0x2e2   : > { %1620 = vst.msk [vmem:[#allocation3 + $0x48] sm:$0xf] %vm1601_vm5, %v1542_v45  ;;  %1816 = vrot.lane.b32.xlu0 %v5795_v21, %s5070_s12 }
 0x2e3   : > { %3092 = vrot.lane.b32.xlu1 %v6162_v46, %s5069_s27  ;;  %v4622_v46 = vpack.c.bf16 %v1401_v29, %v1401_v29 }
 0x2e4   : > { %v2315_v57 = vpop.permute.xlu0 %2314 }
 0x2e5   : > { %v1795_v22 = vpop.permute.xlu1 %1794  ;;  %2392 = vst.msk [vmem:[#allocation3 + $0x4c] sm:$0xf] %vm2372_vm9, %v2315_v57 }
 0x2e6   : > { %1875 = vst.msk [vmem:[#allocation3 + $0x40] sm:$0xf] %vm1858_vm7, %v1795_v22  ;;  %2069 = vrot.lane.b32.xlu0 %v6267_v23, %s5071_s18 }
 0x2e7   : > { %1300 = vrot.lane.b32.xlu1 %v6267_v23, %s5065_s23 }
 0x2e8   : > { %v2569_v59 = vpop.permute.xlu0 %2568 }
 0x2e9   : > { %v1799_v32 = vpop.permute.xlu1 %1798  ;;  %2648 = vst.msk [vmem:[#allocation3 + $0x44] sm:$0xf] %vm2630_vm10, %v2569_v59 }
 0x2ea   : > { %1877 = vst.msk [vmem:[#allocation3 + $0x48] sm:$0xf] %vm1858_vm7, %v1799_v32  ;;  %2073 = vrot.lane.b32.xlu0 %v6275_v43, %s5071_s18 }
 0x2eb   : > { %1553 = vrot.lane.b32.xlu1 %v4622_v46, %s5068_s26 }
 0x2ec   : > { %v2573_v53 = vpop.permute.xlu0 %2572 }
 0x2ed   : > { %v2052_v63 = vpop.permute.xlu1 %2051  ;;  %2650 = vst.msk [vmem:[#allocation3 + $0x4c] sm:$0xf] %vm2630_vm10, %v2573_v53 }
 0x2ee   : > { %2132 = vst.msk [vmem:[#allocation3 + $0x40] sm:$0xf] %vm2115_vm8, %v2052_v63  ;;  %2326 = vrot.lane.b32.xlu0 %v6282_v52, %s5072_s19 }
 0x2ef   : > { %1557 = vrot.lane.b32.xlu1 %v6282_v52, %s5068_s26 }
 0x2f0   : > { %v2826_v56 = vpop.permute.xlu0 %2825 }
 0x2f1   : > { %v2056_v6 = vpop.permute.xlu1 %2055  ;;  %2905 = vst.msk [vmem:[#allocation3 + $0x44] sm:$0xf] %vm2887_vm11, %v2826_v56  ;;  %v6358_v56 = vpack.c.bf16 %v2947_v42, %v2947_v42  ;;  %v2179_v42 = vld [vmem:[#allocation2 + $0x262] sm:$0xff] }
 0x2f2   : > { %2134 = vst.msk [vmem:[#allocation3 + $0x48] sm:$0xf] %vm2115_vm8, %v2056_v6  ;;  %2330 = vrot.lane.b32.xlu0 %v6290_v41, %s5072_s19 }
 0x2f3   : > { %1810 = vrot.lane.b32.xlu1 %v5807_v62, %s5070_s12 }
 0x2f4   : > { %v2830_v50 = vpop.permute.xlu0 %2829 }
 0x2f5   : > { %v2309_v10 = vpop.permute.xlu1 %2308  ;;  %2907 = vst.msk [vmem:[#allocation3 + $0x4c] sm:$0xf] %vm2887_vm11, %v2830_v50 }
 0x2f6   : > { %2389 = vst.msk [vmem:[#allocation3 + $0x40] sm:$0xf] %vm2372_vm9, %v2309_v10  ;;  %2584 = vrot.lane.b32.xlu0 %v5811_v55, %s5066_s24 }
 0x2f7   : > { %1814 = vrot.lane.b32.xlu1 %v5811_v55, %s5070_s12 }
 0x2f8   : > { %v3083_v2 = vpop.permute.xlu0 %3082 }
 0x2f9   : > { %v2313_v5 = vpop.permute.xlu1 %2312  ;;  %3162 = vst.msk [vmem:[#allocation3 + $0x44] sm:$0xf] %vm3144_vm12, %v3083_v2  ;;  %v4917_v62 = vpop.f32.mrf.mxu1 }
 0x2fa   : > { %2391 = vst.msk [vmem:[#allocation3 + $0x48] sm:$0xf] %vm2372_vm9, %v2313_v5  ;;  %2588 = vrot.lane.b32.xlu0 %v5850_v3, %s5066_s24 }
 0x2fb   : > { %2067 = vrot.lane.b32.xlu1 %v6207_v17, %s5071_s18  ;;  %v3396_v26 = vpop.f32.mrf.mxu1  ;;  %v3532_v17 = vmul.f32 %v4917_v62, %v6313_v19 }
 0x2fc   : > { %v1291_v55 = vpop.permute.xlu0 %1290  ;;  %v3530_v48 = vmul.f32 %v6313_v19, %v3396_v26 }
 0x2fd   : > { %v2567_v38 = vpop.permute.xlu1 %2566  ;;  %1366 = vst.msk [vmem:[#allocation3 + $0x54] sm:$0xf] %vm1344_vm3, %v1291_v55  ;;  %v4918_v44 = vpop.f32.mrf.mxu1  ;;  %v3571_v15 = vadd.f32 %v6326_v61, %v3532_v17 }
 0x2fe   : > { %2647 = vst.msk [vmem:[#allocation3 + $0x40] sm:$0xf] %vm2630_vm10, %v2567_v38  ;;  %2841 = vrot.lane.b32.xlu0 %v6229_v16, %s5067_s25  ;;  %v3533_v0 = vmul.f32 %v4918_v44, %v6313_v19  ;;  %v1408_v38 = vld [vmem:[#allocation2 + $0x252] sm:$0xff]  ;;  %v1665_v44 = vld [vmem:[#allocation2 + $0x260] sm:$0xff] }
 0x2ff   : > { %2071 = vrot.lane.b32.xlu1 %v6229_v16, %s5071_s18  ;;  %v3399_v47 = vpop.f32.mrf.mxu1  ;;  %v3569_v16 = vadd.f32 %v6326_v61, %v3530_v48  ;;  %v6381_v26 = vpack.c.bf16 %v1408_v38, %v1408_v38 }
 0x300   : > { %v3087_v58 = vpop.permute.xlu0 %3086  ;;  %v3572_v45 = vadd.f32 %v6326_v61, %v3533_v0  ;;  %v3531_v1 = vmul.f32 %v6313_v19, %v3399_v47 }
 0x301   : > { %v2571_v4 = vpop.permute.xlu1 %2570  ;;  %3164 = vst.msk [vmem:[#allocation3 + $0x4c] sm:$0xf] %vm3144_vm12, %v3087_v58  ;;  %v3601_v46 = vmax.f32 %v3569_v16, 0.0  ;;  %v1150_v58 = vld [vmem:[#allocation2 + $0x241] sm:$0xff] }
 0x302   : > { %2649 = vst.msk [vmem:[#allocation3 + $0x48] sm:$0xf] %vm2630_vm10, %v2571_v4  ;;  %2845 = vrot.lane.b32.xlu0 %v6329_v54, %s5067_s25  ;;  %v3570_v29 = vadd.f32 %v6326_v61, %v3531_v1  ;;  %v3604_v35 = vmax.f32 %v3572_v45, 0.0  ;;  %v6396_v4 = vpack.c.bf16 %v1665_v44, %v1665_v44  ;;  %v6402_v16 = vpack.c.bf16 %v1150_v58, %v1150_v58  ;;  %v1922_v45 = vld [vmem:[#allocation2 + $0x261] sm:$0xff] }
 0x303   : > { %2324 = vrot.lane.b32.xlu1 %v6238_v60, %s5072_s19  ;;  %v3603_v60 = vmax.f32 %v3571_v15, 0.0 }
 0x304   : > { %v1295_v57 = vpop.permute.xlu0 %1294  ;;  %v3602_v32 = vmax.f32 %v3570_v29, 0.0 }
 0x305   : > { %v2824_v22 = vpop.permute.xlu1 %2823  ;;  %1368 = vst.msk [vmem:[#allocation3 + $0x5c] sm:$0xf] %vm1344_vm3, %v1295_v57  ;;  %v3634_v53 = vpack.c.bf16 %v3604_v35, %v3603_v60  ;;  %v1407_v57 = vld [vmem:[#allocation2 + $0x242] sm:$0xff] }
 0x306   : > { %2904 = vst.msk [vmem:[#allocation3 + $0x40] sm:$0xf] %vm2887_vm11, %v2824_v22  ;;  %3098 = vrot.lane.b32.xlu0 %v6246_v51, %s5069_s27  ;;  %v3633_v59 = vpack.c.bf16 %v3602_v32, %v3601_v46  ;;  %v6411_v22 = vpack.c.bf16 %v1922_v45, %v1922_v45  ;;  %v2694_v45 = vld [vmem:[#allocation2 + $0x271] sm:$0xff] }
 0x307   : > { %2328 = vrot.lane.b32.xlu1 %v6246_v51, %s5072_s19 }
 0x308   : > { %v1548_v63 = vpop.permute.xlu0 %1547  ;;  %4949 = vmatprep.mubr.msk.bf16.mxu0 %vm812_vm0, %v3633_v59 }
 0x309   : > { %v2828_v8 = vpop.permute.xlu1 %2827  ;;  %1623 = vst.msk [vmem:[#allocation3 + $0x54] sm:$0xf] %vm1601_vm5, %v1548_v63  ;;  %4950 = vmatmul.mubr.msk.bf16.vlgmr.msra.gmra.mxu0 %vm812_vm0, %v3634_v53 }
 0x30a   : > { %2906 = vst.msk [vmem:[#allocation3 + $0x48] sm:$0xf] %vm2887_vm11, %v2828_v8  ;;  %1306 = vrot.lane.b32.xlu0 %v6329_v54, %s5065_s23  ;;  %v6420_v8 = vpack.c.bf16 %v1407_v57, %v1407_v57  ;;  %v2951_v57 = vld [vmem:[#allocation2 + $0x272] sm:$0xff] }
 0x30b   : > { %2582 = vrot.lane.b32.xlu1 %v5793_v49, %s5066_s24  ;;  %v1151_v49 = vld [vmem:[#allocation2 + $0x251] sm:$0xff] }
 0x30c   : > { %v1552_v6 = vpop.permute.xlu0 %1551  ;;  %v6366_v5 = vpack.c.bf16 %v1151_v49, %v1151_v49 }
 0x30d   : > { %v3081_v51 = vpop.permute.xlu1 %3080  ;;  %1625 = vst.msk [vmem:[#allocation3 + $0x5c] sm:$0xf] %vm1601_vm5, %v1552_v6 }
 0x30e   : > { %3161 = vst.msk [vmem:[#allocation3 + $0x40] sm:$0xf] %vm3144_vm12, %v3081_v51  ;;  %3102 = vrot.lane.b32.xlu0 %v6358_v56, %s5069_s27 }
 0x30f   : > { %2586 = vrot.lane.b32.xlu1 %v5795_v21, %s5066_s24 }
 0x310   : > { %v1805_v50 = vpop.permute.xlu0 %1804 }
 0x311   : > { %v1289_v10 = vpop.permute.xlu1 %1288  ;;  %1880 = vst.msk [vmem:[#allocation3 + $0x54] sm:$0xf] %vm1858_vm7, %v1805_v50 }
 0x312   : > { %1365 = vst.msk [vmem:[#allocation3 + $0x50] sm:$0xf] %vm1344_vm3, %v1289_v10  ;;  %1310 = vrot.lane.b32.xlu0 %v6366_v5, %s5065_s23 }
 0x313   : > { %2839 = vrot.lane.b32.xlu1 %v6267_v23, %s5067_s25 }
 0x314   : > { %v1809_v21 = vpop.permute.xlu0 %1808 }
 0x315   : > { %v3085_v2 = vpop.permute.xlu1 %3084  ;;  %v5030_v62 = vld [vmem:[#allocation3 + $0x40] sm:$0xff]   ;;  %1882 = vst.msk [vmem:[#allocation3 + $0x5c] sm:$0xf] %vm1858_vm7, %v1809_v21 }
 0x316   : > { %3163 = vst.msk [vmem:[#allocation3 + $0x48] sm:$0xf] %vm3144_vm12, %v3085_v2  ;;  %4931 = vmatprep.mubr.msk.bf16.mxu1 %vm3309_vm13, %v5030_v62  ;;  %1563 = vrot.lane.b32.xlu0 %v6358_v56, %s5068_s26  ;;  %v6435_v62 = vpack.c.bf16 %v2179_v42, %v2179_v42 }
 0x317   : > { %2843 = vrot.lane.b32.xlu1 %v6275_v43, %s5067_s25 }
 0x318   : > { %v2062_v55 = vpop.permute.xlu0 %2061 }
 0x319   : > { %v1293_v23 = vpop.permute.xlu1 %1292  ;;  %2137 = vst.msk [vmem:[#allocation3 + $0x54] sm:$0xf] %vm2115_vm8, %v2062_v55 }
 0x31a   : > { %1367 = vst.msk [vmem:[#allocation3 + $0x58] sm:$0xf] %vm1344_vm3, %v1293_v23  ;;  %1567 = vrot.lane.b32.xlu0 %v6381_v26, %s5068_s26 }
 0x31b   : > { %3096 = vrot.lane.b32.xlu1 %v6282_v52, %s5069_s27 }
 0x31c   : > { %v2066_v48 = vpop.permute.xlu0 %2065 }
 0x31d   : > { %v1546_v9 = vpop.permute.xlu1 %1545  ;;  %v5031_v17 = vld [vmem:[#allocation3 + $0x48] sm:$0xff]   ;;  %2139 = vst.msk [vmem:[#allocation3 + $0x5c] sm:$0xf] %vm2115_vm8, %v2066_v48 }
 0x31e   : > { %1622 = vst.msk [vmem:[#allocation3 + $0x50] sm:$0xf] %vm1601_vm5, %v1546_v9  ;;  %4932 = vmatmul.mubr.msk.bf16.gmra.mxu1 %vm3309_vm13, %v5031_v17  ;;  %1820 = vrot.lane.b32.xlu0 %v5856_v11, %s5070_s12  ;;  %v2437_v17 = vld [vmem:[#allocation2 + $0x270] sm:$0xff] }
 0x31f   : > { %1304 = vrot.lane.b32.xlu1 %v6275_v43, %s5065_s23 }
 0x320   : > { %v2319_v0 = vpop.permute.xlu0 %2318 }
 0x321   : > { %v1550_v52 = vpop.permute.xlu1 %1549  ;;  %2394 = vst.msk [vmem:[#allocation3 + $0x54] sm:$0xf] %vm2372_vm9, %v2319_v0 }
 0x322   : > { %1624 = vst.msk [vmem:[#allocation3 + $0x58] sm:$0xf] %vm1601_vm5, %v1550_v52  ;;  %1824 = vrot.lane.b32.xlu0 %v6396_v4, %s5070_s12 }
 0x323   : > { %3100 = vrot.lane.b32.xlu1 %v6290_v41, %s5069_s27 }
 0x324   : > { %v2323_v47 = vpop.permute.xlu0 %2322 }
 0x325   : > { %v1803_v43 = vpop.permute.xlu1 %1802  ;;  %2396 = vst.msk [vmem:[#allocation3 + $0x5c] sm:$0xf] %vm2372_vm9, %v2323_v47 }
 0x326   : > { %1879 = vst.msk [vmem:[#allocation3 + $0x50] sm:$0xf] %vm1858_vm7, %v1803_v43  ;;  %2077 = vrot.lane.b32.xlu0 %v6402_v16, %s5071_s18 }
 0x327   : > { %1308 = vrot.lane.b32.xlu1 %v6402_v16, %s5065_s23  ;;  %v4921_v15 = vpop.f32.mrf.mxu1 }
 0x328   : > { %v2577_v29 = vpop.permute.xlu0 %2576  ;;  %v3536_v32 = vmul.f32 %v4921_v15, %v6313_v19 }
 0x329   : > { %v1807_v1 = vpop.permute.xlu1 %1806  ;;  %2652 = vst.msk [vmem:[#allocation3 + $0x54] sm:$0xf] %vm2630_vm10, %v2577_v29  ;;  %v3412_v35 = vpop.f32.mrf.mxu1 }
 0x32a   : > { %1881 = vst.msk [vmem:[#allocation3 + $0x58] sm:$0xf] %vm1858_vm7, %v1807_v1  ;;  %v3534_v46 = vmul.f32 %v6313_v19, %v3412_v35  ;;  %2081 = vrot.lane.b32.xlu0 %v6411_v22, %s5071_s18  ;;  %v3575_v10 = vadd.f32 %v6326_v61, %v3536_v32  ;;  %v4789_v1 = vpack.c.bf16 %v2694_v45, %v2694_v45 }
 0x32b   : > { %1561 = vrot.lane.b32.xlu1 %v6290_v41, %s5068_s26  ;;  %v4922_v59 = vpop.f32.mrf.mxu1 }
 0x32c   : > { %v3537_v63 = vmul.f32 %v4922_v59, %v6313_v19  ;;  %v2581_v53 = vpop.permute.xlu0 %2580  ;;  %v3573_v51 = vadd.f32 %v6326_v61, %v3534_v46  ;;  %v3607_v9 = vmax.f32 %v3575_v10, 0.0 }
 0x32d   : > { %v2060_v60 = vpop.permute.xlu1 %2059  ;;  %2654 = vst.msk [vmem:[#allocation3 + $0x5c] sm:$0xf] %vm2630_vm10, %v2581_v53  ;;  %v3415_v41 = vpop.f32.mrf.mxu1 }
 0x32e   : > { %2136 = vst.msk [vmem:[#allocation3 + $0x50] sm:$0xf] %vm2115_vm8, %v2060_v60  ;;  %v3576_v6 = vadd.f32 %v6326_v61, %v3537_v63  ;;  %v3535_v49 = vmul.f32 %v6313_v19, %v3415_v41  ;;  %2334 = vrot.lane.b32.xlu0 %v6420_v8, %s5072_s19  ;;  %v3605_v23 = vmax.f32 %v3573_v51, 0.0 }
 0x32f   : > { %1565 = vrot.lane.b32.xlu1 %v6420_v8, %s5068_s26 }
 0x330   : > { %v3574_v2 = vadd.f32 %v6326_v61, %v3535_v49  ;;  %v2834_v21 = vpop.permute.xlu0 %2833  ;;  %v3608_v38 = vmax.f32 %v3576_v6, 0.0 }
 0x331   : > { %v2064_v50 = vpop.permute.xlu1 %2063  ;;  %2909 = vst.msk [vmem:[#allocation3 + $0x54] sm:$0xf] %vm2887_vm11, %v2834_v21 }
 0x332   : > { %2138 = vst.msk [vmem:[#allocation3 + $0x58] sm:$0xf] %vm2115_vm8, %v2064_v50  ;;  %v3606_v55 = vmax.f32 %v3574_v2, 0.0  ;;  %2338 = vrot.lane.b32.xlu0 %v6435_v62, %s5072_s19  ;;  %v3636_v0 = vpack.c.bf16 %v3608_v38, %v3607_v9 }
 0x333   : > { %1818 = vrot.lane.b32.xlu1 %v5850_v3, %s5070_s12  ;;  %v4757_v3 = vpack.c.bf16 %v2437_v17, %v2437_v17 }
 0x334   : > { %v3635_v44 = vpack.c.bf16 %v3606_v55, %v3605_v23  ;;  %v2838_v52 = vpop.permute.xlu0 %2837 }
 0x335   : > { %v2317_v48 = vpop.permute.xlu1 %2316  ;;  %2911 = vst.msk [vmem:[#allocation3 + $0x5c] sm:$0xf] %vm2887_vm11, %v2838_v52 }
 0x336   : > { %2393 = vst.msk [vmem:[#allocation3 + $0x50] sm:$0xf] %vm2372_vm9, %v2317_v48  ;;  %2592 = vrot.lane.b32.xlu0 %v5869_v7, %s5066_s24  ;;  %4953 = vmatprep.mubr.msk.bf16.mxu0 %vm812_vm0, %v3635_v44 }
 0x337   : > { %1822 = vrot.lane.b32.xlu1 %v5869_v7, %s5070_s12  ;;  %4954 = vmatmul.mubr.msk.bf16.gmra.mxu0 %vm812_vm0, %v3636_v0 }
 0x338   : > { %v3091_v43 = vpop.permute.xlu0 %3090 }
 0x339   : > { %v2321_v58 = vpop.permute.xlu1 %2320  ;;  %3166 = vst.msk [vmem:[#allocation3 + $0x54] sm:$0xf] %vm3144_vm12, %v3091_v43 }
 0x33a   : > { %2395 = vst.msk [vmem:[#allocation3 + $0x58] sm:$0xf] %vm2372_vm9, %v2321_v58  ;;  %2596 = vrot.lane.b32.xlu0 %v4757_v3, %s5066_s24 }
 0x33b   : > { %2075 = vrot.lane.b32.xlu1 %v6329_v54, %s5071_s18 }
 0x33c   : > { %v1299_v7 = vpop.permute.xlu0 %1298 }
 0x33d   : > { %v2575_v47 = vpop.permute.xlu1 %2574  ;;  %1370 = vst.msk [vmem:[#allocation3 + $0x64] sm:$0xf] %vm1344_vm3, %v1299_v7 }
 0x33e   : > { %2651 = vst.msk [vmem:[#allocation3 + $0x50] sm:$0xf] %vm2630_vm10, %v2575_v47  ;;  %2849 = vrot.lane.b32.xlu0 %v6366_v5, %s5067_s25 }
 0x33f   : > { %2079 = vrot.lane.b32.xlu1 %v6366_v5, %s5071_s18  ;;  %v4821_v5 = vpack.c.bf16 %v2951_v57, %v2951_v57 }
 0x340   : > { %v3095_v54 = vpop.permute.xlu0 %3094 }
 0x341   : > { %v2579_v15 = vpop.permute.xlu1 %2578  ;;  %3168 = vst.msk [vmem:[#allocation3 + $0x5c] sm:$0xf] %vm3144_vm12, %v3095_v54 }
 0x342   : > { %2653 = vst.msk [vmem:[#allocation3 + $0x58] sm:$0xf] %vm2630_vm10, %v2579_v15  ;;  %2853 = vrot.lane.b32.xlu0 %v4789_v1, %s5067_s25 }
 0x343   : > { %2332 = vrot.lane.b32.xlu1 %v6358_v56, %s5072_s19 }
 0x344   : > { %v1303_v35 = vpop.permute.xlu0 %1302 }
 0x345   : > { %v2832_v29 = vpop.permute.xlu1 %2831  ;;  %1372 = vst.msk [vmem:[#allocation3 + $0x6c] sm:$0xf] %vm1344_vm3, %v1303_v35 }
 0x346   : > { %2908 = vst.msk [vmem:[#allocation3 + $0x50] sm:$0xf] %vm2887_vm11, %v2832_v29  ;;  %3106 = vrot.lane.b32.xlu0 %v6381_v26, %s5069_s27 }
 0x347   : > { %2336 = vrot.lane.b32.xlu1 %v6381_v26, %s5072_s19 }
 0x348   : > { %v1556_v56 = vpop.permute.xlu0 %1555 }
 0x349   : > { %v2836_v46 = vpop.permute.xlu1 %2835  ;;  %1627 = vst.msk [vmem:[#allocation3 + $0x64] sm:$0xf] %vm1601_vm5, %v1556_v56 }
 0x34a   : > { %2910 = vst.msk [vmem:[#allocation3 + $0x58] sm:$0xf] %vm2887_vm11, %v2836_v46  ;;  %3110 = vrot.lane.b32.xlu0 %v4821_v5, %s5069_s27 }
 0x34b   : > { %2590 = vrot.lane.b32.xlu1 %v5856_v11, %s5066_s24 }
 0x34c   : > { %v1560_v60 = vpop.permute.xlu0 %1559 }
 0x34d   : > { %v3089_v32 = vpop.permute.xlu1 %3088  ;;  %1629 = vst.msk [vmem:[#allocation3 + $0x6c] sm:$0xf] %vm1601_vm5, %v1560_v60 }
 0x34e   : > { %3165 = vst.msk [vmem:[#allocation3 + $0x50] sm:$0xf] %vm3144_vm12, %v3089_v32 }
 0x34f   : > { %2594 = vrot.lane.b32.xlu1 %v6396_v4, %s5066_s24 }
 0x350   : > { %v1813_v59 = vpop.permute.xlu0 %1812 }
 0x351   : > { %v1297_v26 = vpop.permute.xlu1 %1296  ;;  %1884 = vst.msk [vmem:[#allocation3 + $0x64] sm:$0xf] %vm1858_vm7, %v1813_v59 }
 0x352   : > { %1369 = vst.msk [vmem:[#allocation3 + $0x60] sm:$0xf] %vm1344_vm3, %v1297_v26 }
 0x353   : > { %2847 = vrot.lane.b32.xlu1 %v6402_v16, %s5067_s25 }
 0x354   : > { %v1817_v53 = vpop.permute.xlu0 %1816 }
 0x355   : > { %v3093_v11 = vpop.permute.xlu1 %3092  ;;  %v5032_v63 = vld [vmem:[#allocation3 + $0x50] sm:$0xff]   ;;  %1886 = vst.msk [vmem:[#allocation3 + $0x6c] sm:$0xf] %vm1858_vm7, %v1817_v53 }
 0x356   : > { %3167 = vst.msk [vmem:[#allocation3 + $0x58] sm:$0xf] %vm3144_vm12, %v3093_v11  ;;  %4935 = vmatprep.mubr.msk.bf16.mxu1 %vm3309_vm13, %v5032_v63 }
 0x357   : > { %2851 = vrot.lane.b32.xlu1 %v6411_v22, %s5067_s25 }
 0x358   : > { %v2070_v41 = vpop.permute.xlu0 %2069 }
 0x359   : > { %v1301_v4 = vpop.permute.xlu1 %1300  ;;  %2141 = vst.msk [vmem:[#allocation3 + $0x64] sm:$0xf] %vm2115_vm8, %v2070_v41 }
 0x35a   : > { %1371 = vst.msk [vmem:[#allocation3 + $0x68] sm:$0xf] %vm1344_vm3, %v1301_v4 }
 0x35b   : > { %3104 = vrot.lane.b32.xlu1 %v6420_v8, %s5069_s27 }
 0x35c   : > { %v2074_v51 = vpop.permute.xlu0 %2073 }
 0x35d   : > { %v1554_v16 = vpop.permute.xlu1 %1553  ;;  %v5033_v42 = vld [vmem:[#allocation3 + $0x58] sm:$0xff]   ;;  %2143 = vst.msk [vmem:[#allocation3 + $0x6c] sm:$0xf] %vm2115_vm8, %v2074_v51 }
 0x35e   : > { %1626 = vst.msk [vmem:[#allocation3 + $0x60] sm:$0xf] %vm1601_vm5, %v1554_v16  ;;  %4936 = vmatmul.mubr.msk.bf16.gmra.mxu1 %vm3309_vm13, %v5033_v42 }
 0x35f   : > { %3108 = vrot.lane.b32.xlu1 %v6435_v62, %s5069_s27 }
 0x360   : > { %v2327_v6 = vpop.permute.xlu0 %2326 }
 0x361   : > { %v1558_v22 = vpop.permute.xlu1 %1557  ;;  %2398 = vst.msk [vmem:[#allocation3 + $0x64] sm:$0xf] %vm2372_vm9, %v2327_v6 }
 0x362   : > { %1628 = vst.msk [vmem:[#allocation3 + $0x68] sm:$0xf] %vm1601_vm5, %v1558_v22 }
 0x364   : > { %v2331_v8 = vpop.permute.xlu0 %2330 }
 0x365   : > { %v1811_v49 = vpop.permute.xlu1 %1810  ;;  %2400 = vst.msk [vmem:[#allocation3 + $0x6c] sm:$0xf] %vm2372_vm9, %v2331_v8 }
 0x366   : > { %1883 = vst.msk [vmem:[#allocation3 + $0x60] sm:$0xf] %vm1858_vm7, %v1811_v49 }
 0x368   : > { %v2585_v50 = vpop.permute.xlu0 %2584 }
 0x369   : > { %v1815_v10 = vpop.permute.xlu1 %1814  ;;  %2656 = vst.msk [vmem:[#allocation3 + $0x64] sm:$0xf] %vm2630_vm10, %v2585_v50 }
 0x36a   : > { %1885 = vst.msk [vmem:[#allocation3 + $0x68] sm:$0xf] %vm1858_vm7, %v1815_v10 }
 0x36c   : > { %v2589_v21 = vpop.permute.xlu0 %2588 }
 0x36d   : > { %v2068_v2 = vpop.permute.xlu1 %2067  ;;  %2658 = vst.msk [vmem:[#allocation3 + $0x6c] sm:$0xf] %vm2630_vm10, %v2589_v21  ;;  %v4925_v62 = vpop.f32.mrf.mxu1 }
 0x36e   : > { %2140 = vst.msk [vmem:[#allocation3 + $0x60] sm:$0xf] %vm2115_vm8, %v2068_v2  ;;  %v3540_v48 = vmul.f32 %v4925_v62, %v6313_v19 }
 0x36f   : > { %v3428_v55 = vpop.f32.mrf.mxu1 }
 0x370   : > { %v2842_v23 = vpop.permute.xlu0 %2841  ;;  %v3538_v9 = vmul.f32 %v6313_v19, %v3428_v55  ;;  %v3579_v45 = vadd.f32 %v6326_v61, %v3540_v48 }
 0x371   : > { %v2072_v38 = vpop.permute.xlu1 %2071  ;;  %2913 = vst.msk [vmem:[#allocation3 + $0x64] sm:$0xf] %vm2887_vm11, %v2842_v23  ;;  %v4926_v17 = vpop.f32.mrf.mxu1 }
 0x372   : > { %2142 = vst.msk [vmem:[#allocation3 + $0x68] sm:$0xf] %vm2115_vm8, %v2072_v38  ;;  %v3541_v44 = vmul.f32 %v4926_v17, %v6313_v19  ;;  %v3577_v58 = vadd.f32 %v6326_v61, %v3538_v9  ;;  %v3611_v35 = vmax.f32 %v3579_v45, 0.0 }
 0x373   : > { %v3431_v3 = vpop.f32.mrf.mxu1 }
 0x374   : > { %v2846_v0 = vpop.permute.xlu0 %2845  ;;  %v3580_v43 = vadd.f32 %v6326_v61, %v3541_v44  ;;  %v3539_v47 = vmul.f32 %v6313_v19, %v3431_v3  ;;  %v3609_v29 = vmax.f32 %v3577_v58, 0.0 }
 0x375   : > { %v2325_v52 = vpop.permute.xlu1 %2324  ;;  %2915 = vst.msk [vmem:[#allocation3 + $0x6c] sm:$0xf] %vm2887_vm11, %v2846_v0 }
 0x376   : > { %2397 = vst.msk [vmem:[#allocation3 + $0x60] sm:$0xf] %vm2372_vm9, %v2325_v52  ;;  %v3578_v7 = vadd.f32 %v6326_v61, %v3539_v47  ;;  %v3612_v15 = vmax.f32 %v3580_v43, 0.0 }
 0x378   : > { %v3099_v54 = vpop.permute.xlu0 %3098  ;;  %v3610_v57 = vmax.f32 %v3578_v7, 0.0  ;;  %v3638_v56 = vpack.c.bf16 %v3612_v15, %v3611_v35 }
 0x379   : > { %v2329_v1 = vpop.permute.xlu1 %2328  ;;  %3170 = vst.msk [vmem:[#allocation3 + $0x64] sm:$0xf] %vm3144_vm12, %v3099_v54 }
 0x37a   : > { %2399 = vst.msk [vmem:[#allocation3 + $0x68] sm:$0xf] %vm2372_vm9, %v2329_v1  ;;  %v3637_v5 = vpack.c.bf16 %v3610_v57, %v3609_v29 }
 0x37c   : > { %v1307_v32 = vpop.permute.xlu0 %1306  ;;  %4957 = vmatprep.mubr.msk.bf16.mxu0 %vm812_vm0, %v3637_v5 }
 0x37d   : > { %v2583_v46 = vpop.permute.xlu1 %2582  ;;  %1374 = vst.msk [vmem:[#allocation3 + $0x74] sm:$0xf] %vm1344_vm3, %v1307_v32  ;;  %4958 = vmatmul.mubr.msk.bf16.gmra.mxu0 %vm812_vm0, %v3638_v56 }
 0x37e   : > { %2655 = vst.msk [vmem:[#allocation3 + $0x60] sm:$0xf] %vm2630_vm10, %v2583_v46 }
 0x380   : > { %v3103_v26 = vpop.permute.xlu0 %3102 }
 0x381   : > { %v2587_v60 = vpop.permute.xlu1 %2586  ;;  %3172 = vst.msk [vmem:[#allocation3 + $0x6c] sm:$0xf] %vm3144_vm12, %v3103_v26 }
 0x382   : > { %2657 = vst.msk [vmem:[#allocation3 + $0x68] sm:$0xf] %vm2630_vm10, %v2587_v60 }
 0x384   : > { %v1311_v11 = vpop.permute.xlu0 %1310 }
 0x385   : > { %v2840_v59 = vpop.permute.xlu1 %2839  ;;  %1376 = vst.msk [vmem:[#allocation3 + $0x7c] sm:$0xf] %vm1344_vm3, %v1311_v11 }
 0x386   : > { %2912 = vst.msk [vmem:[#allocation3 + $0x60] sm:$0xf] %vm2887_vm11, %v2840_v59 }
 0x388   : > { %v1564_v53 = vpop.permute.xlu0 %1563 }
 0x389   : > { %v2844_v63 = vpop.permute.xlu1 %2843  ;;  %1631 = vst.msk [vmem:[#allocation3 + $0x74] sm:$0xf] %vm1601_vm5, %v1564_v53 }
 0x38a   : > { %2914 = vst.msk [vmem:[#allocation3 + $0x68] sm:$0xf] %vm2887_vm11, %v2844_v63 }
 0x38c   : > { %v1568_v41 = vpop.permute.xlu0 %1567 }
 0x38d   : > { %v3097_v4 = vpop.permute.xlu1 %3096  ;;  %1633 = vst.msk [vmem:[#allocation3 + $0x7c] sm:$0xf] %vm1601_vm5, %v1568_v41 }
 0x38e   : > { %3169 = vst.msk [vmem:[#allocation3 + $0x60] sm:$0xf] %vm3144_vm12, %v3097_v4 }
 0x390   : > { %v1821_v42 = vpop.permute.xlu0 %1820 }
 0x391   : > { %v1305_v16 = vpop.permute.xlu1 %1304  ;;  %1888 = vst.msk [vmem:[#allocation3 + $0x74] sm:$0xf] %vm1858_vm7, %v1821_v42 }
 0x392   : > { %1373 = vst.msk [vmem:[#allocation3 + $0x70] sm:$0xf] %vm1344_vm3, %v1305_v16 }
 0x394   : > { %v1825_v6 = vpop.permute.xlu0 %1824 }
 0x395   : > { %v3101_v51 = vpop.permute.xlu1 %3100  ;;  %v5034_v22 = vld [vmem:[#allocation3 + $0x60] sm:$0xff]   ;;  %1890 = vst.msk [vmem:[#allocation3 + $0x7c] sm:$0xf] %vm1858_vm7, %v1825_v6 }
 0x396   : > { %3171 = vst.msk [vmem:[#allocation3 + $0x68] sm:$0xf] %vm3144_vm12, %v3101_v51  ;;  %4939 = vmatprep.mubr.msk.bf16.mxu1 %vm3309_vm13, %v5034_v22  ;;  %v6575_v6 = vld [vmem:[%s6748_s8] ss:$0 sm:$0xff] }
 0x398   : > { %v2078_v8 = vpop.permute.xlu0 %2077 }
 0x399   : > { %v1309_v49 = vpop.permute.xlu1 %1308  ;;  %2145 = vst.msk [vmem:[#allocation3 + $0x74] sm:$0xf] %vm2115_vm8, %v2078_v8 }
 0x39a   : > { %1375 = vst.msk [vmem:[#allocation3 + $0x78] sm:$0xf] %vm1344_vm3, %v1309_v49 }
 0x39c   : > { %v2082_v2 = vpop.permute.xlu0 %2081 }
 0x39d   : > { %v1562_v10 = vpop.permute.xlu1 %1561  ;;  %v5035_v50 = vld [vmem:[#allocation3 + $0x68] sm:$0xff]   ;;  %2147 = vst.msk [vmem:[#allocation3 + $0x7c] sm:$0xf] %vm2115_vm8, %v2082_v2 }
 0x39e   : > { %1630 = vst.msk [vmem:[#allocation3 + $0x70] sm:$0xf] %vm1601_vm5, %v1562_v10  ;;  %4940 = vmatmul.mubr.msk.bf16.gmra.mxu1 %vm3309_vm13, %v5035_v50  ;;  %v6582_v10 = vld [vmem:[%s6749_s9] ss:$0 sm:$0xff] }
 0x39f   : > { %v4929_v62 = vpop.f32.mrf.mxu1 }
 0x3a0   : > { %v2335_v38 = vpop.permute.xlu0 %2334  ;;  %v3544_v9 = vmul.f32 %v4929_v62, %v6313_v19 }
 0x3a1   : > { %v1566_v21 = vpop.permute.xlu1 %1565  ;;  %2402 = vst.msk [vmem:[#allocation3 + $0x74] sm:$0xf] %vm2372_vm9, %v2335_v38  ;;  %v3444_v23 = vpop.f32.mrf.mxu1 }
 0x3a2   : > { %1632 = vst.msk [vmem:[#allocation3 + $0x78] sm:$0xf] %vm1601_vm5, %v1566_v21  ;;  %v3542_v55 = vmul.f32 %v6313_v19, %v3444_v23  ;;  %v3583_v47 = vadd.f32 %v6326_v61, %v3544_v9 }
 0x3a3   : > { %v4930_v17 = vpop.f32.mrf.mxu1 }
 0x3a4   : > { %v3545_v44 = vmul.f32 %v4930_v17, %v6313_v19  ;;  %v2339_v52 = vpop.permute.xlu0 %2338  ;;  %v3581_v3 = vadd.f32 %v6326_v61, %v3542_v55  ;;  %v3615_v57 = vmax.f32 %v3583_v47, 0.0 }
 0x3a5   : > { %v1819_v48 = vpop.permute.xlu1 %1818  ;;  %2404 = vst.msk [vmem:[#allocation3 + $0x7c] sm:$0xf] %vm2372_vm9, %v2339_v52  ;;  %v3447_v0 = vpop.f32.mrf.mxu1 }
 0x3a6   : > { %1887 = vst.msk [vmem:[#allocation3 + $0x70] sm:$0xf] %vm1858_vm7, %v1819_v48  ;;  %v3584_v58 = vadd.f32 %v6326_v61, %v3545_v44  ;;  %v3543_v43 = vmul.f32 %v6313_v19, %v3447_v0  ;;  %v3613_v54 = vmax.f32 %v3581_v3, 0.0 }
 0x3a8   : > { %v3582_v7 = vadd.f32 %v6326_v61, %v3543_v43  ;;  %v2593_v1 = vpop.permute.xlu0 %2592  ;;  %v3616_v15 = vmax.f32 %v3584_v58, 0.0 }
 0x3a9   : > { %v1823_v45 = vpop.permute.xlu1 %1822  ;;  %2660 = vst.msk [vmem:[#allocation3 + $0x74] sm:$0xf] %vm2630_vm10, %v2593_v1 }
 0x3aa   : > { %1889 = vst.msk [vmem:[#allocation3 + $0x78] sm:$0xf] %vm1858_vm7, %v1823_v45  ;;  %v3614_v29 = vmax.f32 %v3582_v7, 0.0  ;;  %v3640_v56 = vpack.c.bf16 %v3616_v15, %v3615_v57 }
 0x3ac   : > { %v3639_v5 = vpack.c.bf16 %v3614_v29, %v3613_v54  ;;  %v2597_v46 = vpop.permute.xlu0 %2596 }
 0x3ad   : > { %v2076_v35 = vpop.permute.xlu1 %2075  ;;  %2662 = vst.msk [vmem:[#allocation3 + $0x7c] sm:$0xf] %vm2630_vm10, %v2597_v46 }
 0x3ae   : > { %2144 = vst.msk [vmem:[#allocation3 + $0x70] sm:$0xf] %vm2115_vm8, %v2076_v35  ;;  %4961 = vmatprep.mubr.msk.bf16.mxu0 %vm812_vm0, %v3639_v5 }
 0x3af   : > { %4962 = vmatmul.mubr.msk.bf16.gmra.mxu0 %vm812_vm0, %v3640_v56 }
 0x3b0   : > { %v2850_v60 = vpop.permute.xlu0 %2849 }
 0x3b1   : > { %v2080_v32 = vpop.permute.xlu1 %2079  ;;  %2917 = vst.msk [vmem:[#allocation3 + $0x74] sm:$0xf] %vm2887_vm11, %v2850_v60 }
 0x3b2   : > { %2146 = vst.msk [vmem:[#allocation3 + $0x78] sm:$0xf] %vm2115_vm8, %v2080_v32 }
 0x3b4   : > { %v2854_v59 = vpop.permute.xlu0 %2853 }
 0x3b5   : > { %v2333_v26 = vpop.permute.xlu1 %2332  ;;  %2919 = vst.msk [vmem:[#allocation3 + $0x7c] sm:$0xf] %vm2887_vm11, %v2854_v59 }
 0x3b6   : > { %2401 = vst.msk [vmem:[#allocation3 + $0x70] sm:$0xf] %vm2372_vm9, %v2333_v26 }
 0x3b8   : > { %v3107_v63 = vpop.permute.xlu0 %3106 }
 0x3b9   : > { %v2337_v11 = vpop.permute.xlu1 %2336  ;;  %3174 = vst.msk [vmem:[#allocation3 + $0x74] sm:$0xf] %vm3144_vm12, %v3107_v63 }
 0x3ba   : > { %2403 = vst.msk [vmem:[#allocation3 + $0x78] sm:$0xf] %vm2372_vm9, %v2337_v11 }
 0x3bc   : > { %v3111_v4 = vpop.permute.xlu0 %3110 }
 0x3bd   : > { %v2591_v53 = vpop.permute.xlu1 %2590  ;;  %3176 = vst.msk [vmem:[#allocation3 + $0x7c] sm:$0xf] %vm3144_vm12, %v3111_v4 }
 0x3be   : > { %2659 = vst.msk [vmem:[#allocation3 + $0x70] sm:$0xf] %vm2630_vm10, %v2591_v53 }
 0x3c1   : > { %v2595_v41 = vpop.permute.xlu1 %2594 }
 0x3c2   : > { %2661 = vst.msk [vmem:[#allocation3 + $0x78] sm:$0xf] %vm2630_vm10, %v2595_v41 }
 0x3c5   : > { %v2848_v16 = vpop.permute.xlu1 %2847 }
 0x3c6   : > { %2916 = vst.msk [vmem:[#allocation3 + $0x70] sm:$0xf] %vm2887_vm11, %v2848_v16 }
 0x3c9   : > { %v2852_v42 = vpop.permute.xlu1 %2851  ;;  %v4951_v51 = vpop.f32.mrf.mxu0 }
 0x3ca   : > { %2918 = vst.msk [vmem:[#allocation3 + $0x78] sm:$0xf] %vm2887_vm11, %v2852_v42  ;;  %v3871_v2 = vmul.f32 %v4951_v51, %v6575_v6 }
 0x3cb   : > { %v3735_v49 = vpop.f32.mrf.mxu0 }
 0x3cc   : > { %v3869_v8 = vmul.f32 %v6575_v6, %v3735_v49  ;;  %v3910_v9 = vadd.f32 %v6582_v10, %v3871_v2 }
 0x3cd   : > { %v3105_v22 = vpop.permute.xlu1 %3104  ;;  %v4952_v50 = vpop.f32.mrf.mxu0 }
 0x3ce   : > { %3173 = vst.msk [vmem:[#allocation3 + $0x70] sm:$0xf] %vm3144_vm12, %v3105_v22  ;;  %v3908_v21 = vadd.f32 %v6582_v10, %v3869_v8  ;;  %v3872_v17 = vmul.f32 %v4952_v50, %v6575_v6  ;;  %v3942_v3 = vadd.f32 %v3910_v9, %v5334_v18 }
 0x3cf   : > { %v3738_v38 = vpop.f32.mrf.mxu0 }
 0x3d0   : > { %v3940_v23 = vadd.f32 %v3908_v21, %v5320_v12  ;;  %v3870_v55 = vmul.f32 %v6575_v6, %v3738_v38  ;;  %v3911_v58 = vadd.f32 %v6582_v10, %v3872_v17  ;;  %v3974_v47 = vmax.f32 %v3942_v3, 0.0 }
 0x3d1   : > { %v3109_v62 = vpop.permute.xlu1 %3108 }
 0x3d2   : > { %3175 = vst.msk [vmem:[#allocation3 + $0x78] sm:$0xf] %vm3144_vm12, %v3109_v62  ;;  %v3972_v48 = vmax.f32 %v3940_v23, 0.0  ;;  %v3909_v44 = vadd.f32 %v6582_v10, %v3870_v55  ;;  %v3943_v45 = vadd.f32 %v3911_v58, %v5338_v20 }
 0x3d4   : > { %v3941_v0 = vadd.f32 %v3909_v44, %v5324_v14  ;;  %4004 = vxpose.xlu1.b32.start [1/16] (narrow) %v3972_v48, 16  ;;  %v3975_v1 = vmax.f32 %v3943_v45, 0.0 }
 0x3d5   : > { %v5036_v52 = vld [vmem:[#allocation3 + $0x70] sm:$0xff]  }
 0x3d6   : > { %4943 = vmatprep.mubr.msk.bf16.mxu1 %vm3309_vm13, %v5036_v52  ;;  %v3973_v12 = vmax.f32 %v3941_v0, 0.0 }
 0x3d8   : > { %4005 = vxpose.xlu1.b32.cont [2/16] (narrow) %v3973_v12, 16 }
 0x3d9   : > { %v5037_v43 = vld [vmem:[#allocation3 + $0x78] sm:$0xff]  }
 0x3da   : > { %4944 = vmatmul.mubr.msk.bf16.gmra.mxu1 %vm3309_vm13, %v5037_v43 }
 0x3dc   : > { %4006 = vxpose.xlu1.b32.cont [3/16] (narrow) %v3974_v47, 16 }
 0x3de   : > { %v4933_v7 = vpop.f32.mrf.mxu1 }
 0x3df   : > { %v3548_v54 = vmul.f32 %v4933_v7, %v6313_v19 }
 0x3e0   : > { %v3460_v15 = vpop.f32.mrf.mxu1  ;;  %4007 = vxpose.xlu1.b32.cont [4/16] (narrow) %v3975_v1, 16 }
 0x3e1   : > { %v3546_v14 = vmul.f32 %v6313_v19, %v3460_v15  ;;  %v3587_v20 = vadd.f32 %v6326_v61, %v3548_v54 }
 0x3e2   : > { %v4934_v18 = vpop.f32.mrf.mxu1 }
 0x3e3   : > { %v3549_v29 = vmul.f32 %v4934_v18, %v6313_v19  ;;  %v3585_v35 = vadd.f32 %v6326_v61, %v3546_v14  ;;  %v3619_v59 = vmax.f32 %v3587_v20, 0.0 }
 0x3e4   : > { %v3463_v57 = vpop.f32.mrf.mxu1 }
 0x3e5   : > { %v3588_v5 = vadd.f32 %v6326_v61, %v3549_v29  ;;  %v3547_v46 = vmul.f32 %v6313_v19, %v3463_v57  ;;  %v3617_v60 = vmax.f32 %v3585_v35, 0.0 }
 0x3e7   : > { %v3586_v56 = vadd.f32 %v6326_v61, %v3547_v46  ;;  %v3620_v32 = vmax.f32 %v3588_v5, 0.0 }
 0x3e9   : > { %v3618_v26 = vmax.f32 %v3586_v56, 0.0  ;;  %v3642_v63 = vpack.c.bf16 %v3620_v32, %v3619_v59 }
 0x3eb   : > { %v3641_v11 = vpack.c.bf16 %v3618_v26, %v3617_v60 }
 0x3ed   : > { %4965 = vmatprep.mubr.msk.bf16.mxu0 %vm812_vm0, %v3641_v11 }
 0x3ee   : > { %4966 = vmatmul.mubr.msk.bf16.gmra.mxu0 %vm812_vm0, %v3642_v63 }
 0x3f7   : > { %v4955_v53 = vpop.f32.mrf.mxu0 }
 0x3f8   : > { %v3875_v42 = vmul.f32 %v4955_v53, %v6575_v6 }
 0x3f9   : > { %v3751_v4 = vpop.f32.mrf.mxu0 }
 0x3fa   : > { %v3873_v41 = vmul.f32 %v6575_v6, %v3751_v4  ;;  %v3914_v50 = vadd.f32 %v6582_v10, %v3875_v42 }
 0x3fb   : > { %v4956_v16 = vpop.f32.mrf.mxu0 }
 0x3fc   : > { %v3912_v51 = vadd.f32 %v6582_v10, %v3873_v41  ;;  %v3876_v21 = vmul.f32 %v4956_v16, %v6575_v6  ;;  %v3946_v23 = vadd.f32 %v3914_v50, %v5355_v27 }
 0x3fd   : > { %v3754_v22 = vpop.f32.mrf.mxu0 }
 0x3fe   : > { %v3944_v49 = vadd.f32 %v3912_v51, %v5348_v24  ;;  %v3874_v8 = vmul.f32 %v6575_v6, %v3754_v22  ;;  %v3915_v55 = vadd.f32 %v6582_v10, %v3876_v21  ;;  %v3978_v48 = vmax.f32 %v3946_v23, 0.0 }
 0x400   : > { %v3976_v2 = vmax.f32 %v3944_v49, 0.0  ;;  %v3913_v62 = vadd.f32 %v6582_v10, %v3874_v8  ;;  %v3947_v24 = vadd.f32 %v3915_v55, %v5357_v28 }
 0x402   : > { %v3945_v38 = vadd.f32 %v3913_v62, %v5350_v25  ;;  %4008 = vxpose.xlu1.b32.cont [5/16] (narrow) %v3976_v2, 16  ;;  %v3979_v17 = vmax.f32 %v3947_v24, 0.0 }
 0x404   : > { %v3977_v9 = vmax.f32 %v3945_v38, 0.0 }
 0x406   : > { %4009 = vxpose.xlu1.b32.cont [6/16] (narrow) %v3977_v9, 16 }
 0x40a   : > { %4010 = vxpose.xlu1.b32.cont [7/16] (narrow) %v3978_v48, 16 }
 0x40e   : > { %4011 = vxpose.xlu1.b32.cont [8/16] (narrow) %v3979_v17, 16 }
 0x41e   : > { %v4937_v44 = vpop.f32.mrf.mxu1 }
 0x41f   : > { %v3552_v3 = vmul.f32 %v4937_v44, %v6313_v19 }
 0x420   : > { %v3476_v52 = vpop.f32.mrf.mxu1 }
 0x421   : > { %v3550_v0 = vmul.f32 %v6313_v19, %v3476_v52  ;;  %v3591_v28 = vadd.f32 %v6326_v61, %v3552_v3 }
 0x422   : > { %v4938_v25 = vpop.f32.mrf.mxu1 }
 0x423   : > { %v3553_v58 = vmul.f32 %v4938_v25, %v6313_v19  ;;  %v3589_v12 = vadd.f32 %v6326_v61, %v3550_v0  ;;  %v3623_v14 = vmax.f32 %v3591_v28, 0.0 }
 0x424   : > { %v3479_v27 = vpop.f32.mrf.mxu1 }
 0x425   : > { %v3592_v43 = vadd.f32 %v6326_v61, %v3553_v58  ;;  %v3551_v47 = vmul.f32 %v6313_v19, %v3479_v27  ;;  %v3621_v1 = vmax.f32 %v3589_v12, 0.0 }
 0x427   : > { %v3590_v45 = vadd.f32 %v6326_v61, %v3551_v47  ;;  %v3624_v7 = vmax.f32 %v3592_v43, 0.0 }
 0x429   : > { %v3622_v15 = vmax.f32 %v3590_v45, 0.0  ;;  %v3644_v18 = vpack.c.bf16 %v3624_v7, %v3623_v14 }
 0x42b   : > { %v3643_v54 = vpack.c.bf16 %v3622_v15, %v3621_v1 }
 0x42d   : > { %4969 = vmatprep.mubr.msk.bf16.mxu0 %vm812_vm0, %v3643_v54 }
 0x42e   : > { %4970 = vmatmul.mubr.msk.bf16.gmra.mxu0 %vm812_vm0, %v3644_v18 }
 0x43d   : > { %v4959_v29 = vpop.f32.mrf.mxu0 }
 0x43e   : > { %v3879_v46 = vmul.f32 %v4959_v29, %v6575_v6 }
 0x43f   : > { %v3767_v57 = vpop.f32.mrf.mxu0 }
 0x440   : > { %v3877_v35 = vmul.f32 %v6575_v6, %v3767_v57  ;;  %v3918_v26 = vadd.f32 %v6582_v10, %v3879_v46 }
 0x441   : > { %v4960_v5 = vpop.f32.mrf.mxu0 }
 0x442   : > { %v3916_v20 = vadd.f32 %v6582_v10, %v3877_v35  ;;  %v3880_v11 = vmul.f32 %v4960_v5, %v6575_v6  ;;  %v3950_v4 = vadd.f32 %v3918_v26, %v5369_v33  ;;  %v5038_v35 = vld [vmem:[%s6746_s6] ss:$0 sm:$0xff] }
 0x443   : > { %v3770_v56 = vpop.f32.mrf.mxu0 }
 0x444   : > { %v3948_v32 = vadd.f32 %v3916_v20, %v5362_v30  ;;  %v3878_v60 = vmul.f32 %v6575_v6, %v3770_v56  ;;  %v3919_v41 = vadd.f32 %v6582_v10, %v3880_v11  ;;  %v3982_v42 = vmax.f32 %v3950_v4, 0.0  ;;  %v5039_v56 = vld [vmem:[%s6747_s7] ss:$0 sm:$0xff] }
 0x446   : > { %v3980_v59 = vmax.f32 %v3948_v32, 0.0  ;;  %v3917_v63 = vadd.f32 %v6582_v10, %v3878_v60  ;;  %v3951_v30 = vadd.f32 %v3919_v41, %v5371_v34 }
 0x448   : > { %v3949_v53 = vadd.f32 %v3917_v63, %v5364_v31  ;;  %4012 = vxpose.xlu1.b32.cont [9/16] (narrow) %v3980_v59, 16  ;;  %v3983_v51 = vmax.f32 %v3951_v30, 0.0 }
 0x44a   : > { %v3981_v16 = vmax.f32 %v3949_v53, 0.0 }
 0x44c   : > { %4013 = vxpose.xlu1.b32.cont [10/16] (narrow) %v3981_v16, 16 }
 0x450   : > { %4014 = vxpose.xlu1.b32.cont [11/16] (narrow) %v3982_v42, 16 }
 0x454   : > { %4015 = vxpose.xlu1.b32.cont [12/16] (narrow) %v3983_v51, 16 }
 0x45e   : > { %v4941_v22 = vpop.f32.mrf.mxu1 }
 0x45f   : > { %v3556_v50 = vmul.f32 %v4941_v22, %v6313_v19 }
 0x460   : > { %v3492_v49 = vpop.f32.mrf.mxu1 }
 0x461   : > { %v3554_v8 = vmul.f32 %v6313_v19, %v3492_v49  ;;  %v3595_v34 = vadd.f32 %v6326_v61, %v3556_v50 }
 0x462   : > { %v4942_v31 = vpop.f32.mrf.mxu1 }
 0x463   : > { %v3557_v2 = vmul.f32 %v4942_v31, %v6313_v19  ;;  %v3593_v21 = vadd.f32 %v6326_v61, %v3554_v8  ;;  %v3627_v24 = vmax.f32 %v3595_v34, 0.0  ;;  %v6781_v34 = vld [vmem:[#allocation4_spill] sm:$0xff] }
 0x464   : > { %v3495_v33 = vpop.f32.mrf.mxu1 }
 0x465   : > { %v3596_v62 = vadd.f32 %v6326_v61, %v3557_v2  ;;  %v3555_v38 = vmul.f32 %v6313_v19, %v3495_v33  ;;  %v3625_v9 = vmax.f32 %v3593_v21, 0.0 }
 0x467   : > { %v3594_v23 = vadd.f32 %v6326_v61, %v3555_v38  ;;  %v3628_v55 = vmax.f32 %v3596_v62, 0.0 }
 0x469   : > { %v3626_v48 = vmax.f32 %v3594_v23, 0.0  ;;  %v3646_v44 = vpack.c.bf16 %v3628_v55, %v3627_v24  ;;  %v6782_v55 = vld [vmem:[#allocation5_spill] sm:$0xff] }
 0x46b   : > { %v3645_v17 = vpack.c.bf16 %v3626_v48, %v3625_v9 }
 0x46d   : > { %4973 = vmatprep.mubr.msk.bf16.mxu0 %vm812_vm0, %v3645_v17 }
 0x46e   : > { %4974 = vmatmul.mubr.msk.bf16.gmra.mxu0 %vm812_vm0, %v3646_v44 }
 0x46f   : > { %v4963_v52 = vpop.f32.mrf.mxu0 }
 0x470   : > { %v3883_v19 = vmul.f32 %v4963_v52, %v6575_v6 }
 0x471   : > { %v3783_v0 = vpop.f32.mrf.mxu0 }
 0x472   : > { %v3881_v3 = vmul.f32 %v6575_v6, %v3783_v0  ;;  %v3922_v43 = vadd.f32 %v6582_v10, %v3883_v19 }
 0x473   : > { %v4964_v25 = vpop.f32.mrf.mxu0 }
 0x474   : > { %v3920_v58 = vadd.f32 %v6582_v10, %v3881_v3  ;;  %v3884_v28 = vmul.f32 %v4964_v25, %v6575_v6  ;;  %v3954_v1 = vadd.f32 %v3922_v43, %v5383_v39 }
 0x475   : > { %v3786_v61 = vpop.f32.mrf.mxu0 }
 0x476   : > { %v3952_v27 = vadd.f32 %v3920_v58, %v5376_v36  ;;  %v3882_v12 = vmul.f32 %v6575_v6, %v3786_v61  ;;  %v3923_v15 = vadd.f32 %v6582_v10, %v3884_v28  ;;  %v3986_v54 = vmax.f32 %v3954_v1, 0.0 }
 0x478   : > { %v3984_v47 = vmax.f32 %v3952_v27, 0.0  ;;  %v3921_v45 = vadd.f32 %v6582_v10, %v3882_v12  ;;  %v3955_v36 = vadd.f32 %v3923_v15, %v5385_v40  ;;  %v6784_v12 = vld [vmem:[#allocation7_spill] sm:$0xff]  ;;  %v6785_v15 = vld [vmem:[#allocation8_spill] sm:$0xff] }
 0x47a   : > { %v3953_v7 = vadd.f32 %v3921_v45, %v5378_v37  ;;  %4016 = vxpose.xlu1.b32.cont [13/16] (narrow) %v3984_v47, 16  ;;  %v3987_v18 = vmax.f32 %v3955_v36, 0.0 }
 0x47c   : > { %v3985_v14 = vmax.f32 %v3953_v7, 0.0 }
 0x47e   : > { %4017 = vxpose.xlu1.b32.cont [14/16] (narrow) %v3985_v14, 16 }
 0x482   : > { %4018 = vxpose.xlu1.b32.cont [15/16] (narrow) %v3986_v54, 16  ;;  %v6786_v54 = vld [vmem:[#allocation9_spill] sm:$0xff] }
 0x486   : > { %4019 = vxpose.xlu1.b32.end [16/16] (narrow) %v3987_v18, 16 }
 0x49a   : > { %v4945_v29 = vpop.f32.mrf.mxu1 }
 0x49b   : > { %v3560_v5 = vmul.f32 %v5038_v35, %v4945_v29 }
 0x49c   : > { %v3508_v57 = vpop.f32.mrf.mxu1 }
 0x49d   : > { %v3558_v37 = vmul.f32 %v5038_v35, %v3508_v57  ;;  %v3599_v26 = vadd.f32 %v5039_v56, %v3560_v5 }
 0x49e   : > { %v4946_v46 = vpop.f32.mrf.mxu1 }
 0x49f   : > { %v3561_v39 = vmul.f32 %v5038_v35, %v4946_v46  ;;  %v3597_v32 = vadd.f32 %v5039_v56, %v3558_v37  ;;  %v3631_v4 = vmax.f32 %v3599_v26, 0.0 }
 0x4a0   : > { %v3511_v20 = vpop.f32.mrf.mxu1 }
 0x4a1   : > { %v3600_v40 = vadd.f32 %v5039_v56, %v3561_v39  ;;  %v3559_v60 = vmul.f32 %v5038_v35, %v3511_v20  ;;  %v3629_v63 = vmax.f32 %v3597_v32, 0.0  ;;  %v6787_v35 = vld [vmem:[#allocation10_spill] sm:$0xff] }
 0x4a3   : > { %v3598_v59 = vadd.f32 %v5039_v56, %v3559_v60  ;;  %v3632_v11 = vmax.f32 %v3600_v40, 0.0 }
 0x4a5   : > { %v3630_v53 = vmax.f32 %v3598_v59, 0.0  ;;  %v3648_v16 = vpack.c.bf16 %v3632_v11, %v3631_v4  ;;  %v6788_v59 = vld [vmem:[#allocation11_spill] sm:$0xff] }
 0x4a7   : > { %v3647_v41 = vpack.c.bf16 %v3630_v53, %v3629_v63 }
 0x4a9   : > { %4977 = vmatprep.mubr.msk.bf16.mxu0 %vm812_vm0, %v3647_v41 }
 0x4aa   : > { %4978 = vmatmul.mubr.msk.bf16.gmra.mxu0 %vm812_vm0, %v3648_v16 }
 0x4ae   : > { %v4967_v42 = vpop.f32.mrf.mxu0 }
 0x4af   : > { %v3887_v49 = vmul.f32 %v4967_v42, %v6575_v6  ;;  %v6789_v42 = vld [vmem:[#allocation12_spill] sm:$0xff] }
 0x4b0   : > { %v3799_v30 = vpop.f32.mrf.mxu0 }
 0x4b1   : > { %v3885_v51 = vmul.f32 %v6575_v6, %v3799_v30  ;;  %v3926_v33 = vadd.f32 %v6582_v10, %v3887_v49 }
 0x4b2   : > { %v4968_v22 = vpop.f32.mrf.mxu0 }
 0x4b3   : > { %v3924_v8 = vadd.f32 %v6582_v10, %v3885_v51  ;;  %v3888_v62 = vmul.f32 %v4968_v22, %v6575_v6  ;;  %v3958_v9 = vadd.f32 %v3926_v33, %v6782_v55  ;;  %v6790_v51 = vld [vmem:[#allocation13_spill] sm:$0xff] }
 0x4b4   : > { %v3802_v50 = vpop.f32.mrf.mxu0 }
 0x4b5   : > { %v3956_v31 = vadd.f32 %v3924_v8, %v5322_v13  ;;  %v3886_v2 = vmul.f32 %v6575_v6, %v3802_v50  ;;  %v3927_v48 = vadd.f32 %v6582_v10, %v3888_v62  ;;  %v3990_v17 = vmax.f32 %v3958_v9, 0.0  ;;  %v6783_v13 = vld [vmem:[#allocation6_spill] sm:$0xff] }
 0x4b7   : > { %v3988_v21 = vmax.f32 %v3956_v31, 0.0  ;;  %v3925_v38 = vadd.f32 %v6582_v10, %v3886_v2  ;;  %v3959_v44 = vadd.f32 %v3927_v48, %v6783_v13  ;;  %v6791_v31 = vld [vmem:[#allocation14_spill] sm:$0xff] }
 0x4b9   : > { %v3957_v23 = vadd.f32 %v3925_v38, %v6781_v34  ;;  %4036 = vxpose.xlu0.b32.start [1/16] (narrow) %v3988_v21, 16  ;;  %v3991_v52 = vmax.f32 %v3959_v44, 0.0 }
 0x4bb   : > { %v3989_v24 = vmax.f32 %v3957_v23, 0.0 }
 0x4bd   : > { %4037 = vxpose.xlu0.b32.cont [2/16] (narrow) %v3989_v24, 16  ;;  %v6792_v24 = vld [vmem:[#allocation15_spill] sm:$0xff] }
 0x4c1   : > { %4038 = vxpose.xlu0.b32.cont [3/16] (narrow) %v3990_v17, 16 }
 0x4c5   : > { %4039 = vxpose.xlu0.b32.cont [4/16] (narrow) %v3991_v52, 16 }
 0x4c6   : > { %v4020_v5 = vpop.trf.xlu1 }
 0x4c7   : > { %4068 = vst [vmem:[%s6701_s20] sm:$0xff] %v4020_v5 }
 0x4ca   : > { %v4021_v33 = vpop.trf.xlu1 }
 0x4cb   : > { %4070 = vst [vmem:[%s6701_s20 + $0x10] sm:$0xff] %v4021_v33 }
 0x4ee   : > { %v4971_v0 = vpop.f32.mrf.mxu0 }
 0x4ef   : > { %v3891_v58 = vmul.f32 %v4971_v0, %v6575_v6 }
 0x4f0   : > { %v3815_v3 = vpop.f32.mrf.mxu0 }
 0x4f1   : > { %v3889_v25 = vmul.f32 %v6575_v6, %v3815_v3  ;;  %v3930_v28 = vadd.f32 %v6582_v10, %v3891_v58  ;;  %v6794_v58 = vld [vmem:[#allocation17_spill] sm:$0xff] }
 0x4f2   : > { %v4972_v19 = vpop.f32.mrf.mxu0 }
 0x4f3   : > { %v3928_v61 = vadd.f32 %v6582_v10, %v3889_v25  ;;  %v3892_v7 = vmul.f32 %v4972_v19, %v6575_v6  ;;  %v3962_v36 = vadd.f32 %v3930_v28, %v6786_v54  ;;  %v6793_v25 = vld [vmem:[#allocation16_spill] sm:$0xff] }
 0x4f4   : > { %v3818_v27 = vpop.f32.mrf.mxu0 }
 0x4f5   : > { %v3960_v43 = vadd.f32 %v3928_v61, %v6784_v12  ;;  %v3890_v47 = vmul.f32 %v6575_v6, %v3818_v27  ;;  %v3931_v18 = vadd.f32 %v6582_v10, %v3892_v7  ;;  %v3994_v57 = vmax.f32 %v3962_v36, 0.0 }
 0x4f7   : > { %v3992_v45 = vmax.f32 %v3960_v43, 0.0  ;;  %v3929_v1 = vadd.f32 %v6582_v10, %v3890_v47  ;;  %v3963_v37 = vadd.f32 %v3931_v18, %v6787_v35  ;;  %v6795_v47 = vld [vmem:[#allocation18_spill] sm:$0xff] }
 0x4f9   : > { %v3961_v14 = vadd.f32 %v3929_v1, %v6785_v15  ;;  %4040 = vxpose.xlu0.b32.cont [5/16] (narrow) %v3992_v45, 16  ;;  %v3995_v46 = vmax.f32 %v3963_v37, 0.0 }
 0x4fb   : > { %v3993_v29 = vmax.f32 %v3961_v14, 0.0 }
 0x4fd   : > { %4041 = vxpose.xlu0.b32.cont [6/16] (narrow) %v3993_v29, 16 }
 0x501   : > { %4042 = vxpose.xlu0.b32.cont [7/16] (narrow) %v3994_v57, 16 }
 0x505   : > { %4043 = vxpose.xlu0.b32.cont [8/16] (narrow) %v3995_v46, 16 }
 0x52e   : > { %v4975_v39 = vpop.f32.mrf.mxu0 }
 0x52f   : > { %v3895_v40 = vmul.f32 %v4975_v39, %v6575_v6 }
 0x530   : > { %v3831_v20 = vpop.f32.mrf.mxu0 }
 0x531   : > { %v3893_v56 = vmul.f32 %v6575_v6, %v3831_v20  ;;  %v3934_v53 = vadd.f32 %v6582_v10, %v3895_v40 }
 0x532   : > { %v4976_v32 = vpop.f32.mrf.mxu0 }
 0x533   : > { %v3932_v60 = vadd.f32 %v6582_v10, %v3893_v56  ;;  %v3896_v41 = vmul.f32 %v4976_v32, %v6575_v6  ;;  %v3966_v22 = vadd.f32 %v3934_v53, %v6790_v51 }
 0x534   : > { %v3834_v26 = vpop.f32.mrf.mxu0 }
 0x535   : > { %v3964_v11 = vadd.f32 %v3932_v60, %v6788_v59  ;;  %v3894_v63 = vmul.f32 %v6575_v6, %v3834_v26  ;;  %v3935_v49 = vadd.f32 %v6582_v10, %v3896_v41  ;;  %v3998_v50 = vmax.f32 %v3966_v22, 0.0 }
 0x537   : > { %v3996_v4 = vmax.f32 %v3964_v11, 0.0  ;;  %v3933_v16 = vadd.f32 %v6582_v10, %v3894_v63  ;;  %v3967_v2 = vadd.f32 %v3935_v49, %v6791_v31 }
 0x539   : > { %v3965_v30 = vadd.f32 %v3933_v16, %v6789_v42  ;;  %4044 = vxpose.xlu0.b32.cont [9/16] (narrow) %v3996_v4, 16  ;;  %v3999_v21 = vmax.f32 %v3967_v2, 0.0 }
 0x53b   : > { %v3997_v8 = vmax.f32 %v3965_v30, 0.0 }
 0x53d   : > { %4045 = vxpose.xlu0.b32.cont [10/16] (narrow) %v3997_v8, 16 }
 0x541   : > { %4046 = vxpose.xlu0.b32.cont [11/16] (narrow) %v3998_v50, 16 }
 0x545   : > { %4047 = vxpose.xlu0.b32.cont [12/16] (narrow) %v3999_v21, 16 }
 0x56a   : > { %v4979_v62 = vpop.f32.mrf.mxu0 }
 0x56b   : > { %v3899_v55 = vmul.f32 %v4979_v62, %v6575_v6 }
 0x56c   : > { %v3847_v38 = vpop.f32.mrf.mxu0 }
 0x56d   : > { %v3897_v34 = vmul.f32 %v6575_v6, %v3847_v38  ;;  %v3938_v44 = vadd.f32 %v6582_v10, %v3899_v55 }
 0x56e   : > { %v4980_v23 = vpop.f32.mrf.mxu0 }
 0x56f   : > { %v3936_v9 = vadd.f32 %v6582_v10, %v3897_v34  ;;  %v3900_v0 = vmul.f32 %v4980_v23, %v6575_v6  ;;  %v3970_v61 = vadd.f32 %v3938_v44, %v6794_v58 }
 0x570   : > { %v3850_v48 = vpop.f32.mrf.mxu0 }
 0x571   : > { %v3968_v17 = vadd.f32 %v3936_v9, %v6792_v24  ;;  %v3898_v13 = vmul.f32 %v6575_v6, %v3850_v48  ;;  %v3939_v27 = vadd.f32 %v6582_v10, %v3900_v0  ;;  %v4002_v43 = vmax.f32 %v3970_v61, 0.0 }
 0x573   : > { %v4000_v52 = vmax.f32 %v3968_v17, 0.0  ;;  %v3937_v3 = vadd.f32 %v6582_v10, %v3898_v13  ;;  %v3971_v28 = vadd.f32 %v3939_v27, %v6795_v47 }
 0x575   : > { %v3969_v19 = vadd.f32 %v3937_v3, %v6793_v25  ;;  %4048 = vxpose.xlu0.b32.cont [13/16] (narrow) %v4000_v52, 16  ;;  %v4003_v45 = vmax.f32 %v3971_v28, 0.0 }
 0x577   : > { %v4001_v12 = vmax.f32 %v3969_v19, 0.0 }
 0x579   : > { %4049 = vxpose.xlu0.b32.cont [14/16] (narrow) %v4001_v12, 16 }
 0x57d   : > { %4050 = vxpose.xlu0.b32.cont [15/16] (narrow) %v4002_v43, 16 }
 0x581   : > { %4051 = vxpose.xlu0.b32.end [16/16] (narrow) %v4003_v45, 16 }
 0x5c1   : > { %v4052_v7 = vpop.trf.xlu0 }
 0x5c2   : > { %4069 = vst [vmem:[%s6701_s20 + $0x8] sm:$0xff] %v4052_v7 }
 0x5c5   : > { %v4053_v6 = vpop.trf.xlu0 }
 0x5c6   : > { %4071 = vst [vmem:[%s6701_s20 + $0x18] sm:$0xff] %v4053_v6 }
 0x5c7 PF: > { %s20_s15 = sadd.s32 1, %s5062_s15   ;;  %s6796_s13 = smov %s5058_s14 }
 0x5c8   : > { %p17_p5 = scmp.ge.s32.totalorder %s20_s15, 4   ;;  %s6797_s14 = smov %s6799_s16 }
 0x5ca   :  { %19 = sbr.rel (!%p17_p5) target bundleno = 2 (0x2), region = 92 }

</bundles_post_ra>
